<compile_context>
chip_gen: v7x
topology: tpu7x:2x2x1
jax: 0.10.0
libtpu: 0.0.40
codegen_flags: <defaults>
</compile_context>

<pallas_src>
import functools

import jax
import jax.numpy as jnp
from jax import lax
from jax.experimental import pallas as pl
from jax.experimental.pallas import tpu as pltpu

_VMEM_LIMIT_BYTES = 48 * 1024 * 1024   # safe on v5e/v6e (128 MiB) and v7x (64 MiB)
_CONV_CH = 64                          # conv1x1x1 output channels (fixed by module)


# ----------------------------------------------------------------------------
# YOLO head epilogue: per anchor keep box logits [:4], softmax over class
# logits [4:].  Single exp pass; per-anchor masked max/sum via a lane iota.
# ----------------------------------------------------------------------------
def _yolo_head_epilogue(logits, num_anchors, span):
    col = lax.broadcasted_iota(jnp.int32, logits.shape, 1)
    neg_inf = jnp.float32(-jnp.inf)
    cls_masks = []
    m_bcast = logits                       # box columns: exp(x - x) = 1 (finite)
    for a in range(num_anchors):
        lo = a * span
        in_cls = (col >= lo + 4) & (col < lo + span)
        cls_masks.append(in_cls)
        m_a = jnp.max(jnp.where(in_cls, logits, neg_inf), axis=-1, keepdims=True)
        m_bcast = jnp.where(in_cls, m_a, m_bcast)
    e = jnp.exp(logits - m_bcast)          # one EUP pass for all anchors
    out = logits
    for in_cls in cls_masks:
        d = jnp.sum(jnp.where(in_cls, e, 0.0), axis=-1, keepdims=True)
        out = jnp.where(in_cls, e / d, out)   # exact division (once per call)
    return out


# ----------------------------------------------------------------------------
# Fused kernel: conv1x1x1 (channel-major) + FC reduction + YOLO epilogue.
#   grid = (B, num_voxel_tiles); voxel tiles are the reduction axis.
# ----------------------------------------------------------------------------
def _fused_head_kernel(wt_ref, cb_ref, fb_ref, x_ref, fcw_ref, o_ref, acc_ref,
                       *, num_anchors, span, v_total, tv, needs_mask):
    j = pl.program_id(1)

    @pl.when(j == 0)
    def _():
        acc_ref[...] = jnp.zeros_like(acc_ref)

    # ---- 1x1x1 conv on this voxel tile (no activation transposes) ----------
    x = x_ref[...].astype(jnp.bfloat16)                       # (Cin, tv)
    conv = jnp.dot(wt_ref[...], x,
                   preferred_element_type=jnp.float32)        # (64, tv) f32
    conv = conv + cb_ref[...]
    if needs_mask:
        # Last tile may extend past V: zero those columns (finite zeros).  The
        # matching fc-weight columns are real zeros (padded once at prep time).
        v_idx = j * tv + lax.broadcasted_iota(jnp.int32, conv.shape, 1)
        conv = jnp.where(v_idx < v_total, conv, 0.0)
    conv = conv.astype(jnp.bfloat16)

    # ---- FC contribution of this tile: sum_c conv[c, :] @ fcw[c, :, :] -----
    part = jnp.dot(conv[0:1, :], fcw_ref[0],
                   preferred_element_type=jnp.float32)        # (1, Out)
    for c in range(1, conv.shape[0]):                          # static unroll
        part = part + jnp.dot(conv[c:c + 1, :], fcw_ref[c],
                              preferred_element_type=jnp.float32)
    acc_ref[...] += part

    # ---- finalize: bias + YOLO head epilogue --------------------------------
    @pl.when(j == pl.num_programs(1) - 1)
    def _():
        logits = acc_ref[...] + fb_ref[...]
        o_ref[...] = _yolo_head_epilogue(logits, num_anchors,
                                         span).astype(o_ref.dtype)


# ----------------------------------------------------------------------------
# One-time weight preparation + wrapper.
# ----------------------------------------------------------------------------
def _choose_tv(V, tv_max=512):
    """Lane-dense voxel tile (multiple of 128) or the full extent."""
    if V <= 256:
        return V
    return min(tv_max, max(128, (V // 2) // 128 * 128))


def prepare_head_params(params, fmap_dhw, *, tv_max=512):
    """Static weight prep (done once at init, not per forward call)."""
    D, H, W = fmap_dhw
    V = D * H * W
    out_dim = params["fc_b"].shape[0]
    tv = _choose_tv(V, tv_max)
    nv = pl.cdiv(V, tv)
    vp = nv * tv
    wt = params["conv_w"].T.astype(jnp.bfloat16)                     # (64, Cin)
    cb = params["conv_b"].astype(jnp.float32).reshape(_CONV_CH, 1)
    # torch.flatten(conv_out, 1) is channel-major: fc_w row index = c*V + v,
    # so a free reshape exposes the per-voxel weight slabs.
    fcw3 = params["fc_w"].astype(jnp.bfloat16).reshape(_CONV_CH, V, out_dim)
    if vp != V:
        fcw3 = jnp.pad(fcw3, ((0, 0), (0, vp - V), (0, 0)))          # once, static
    fb = params["fc_b"].astype(jnp.float32).reshape(1, out_dim)
    return dict(wt=wt, cb=cb, fcw3=fcw3, fb=fb, V=V, tv=tv, nv=nv)


def yolo3d_head(feat, prepared, *, num_classes=6, num_anchors=5):
    """feat: backbone output in PyTorch NCDHW layout (B, C, D, H, W)."""
    B, C, D, H, W = feat.shape
    V = D * H * W
    assert V == prepared["V"], "prepared params built for a different fmap size"
    span = 4 + num_classes
    out_dim = num_anchors * span
    tv, nv = prepared["tv"], prepared["nv"]

    feat3 = feat.reshape(B, C, V)           # free reshape of contiguous NCDHW

    kernel = functools.partial(
        _fused_head_kernel, num_anchors=num_anchors, span=span,
        v_total=V, tv=tv, needs_mask=(nv * tv != V))

    out = pl.pallas_call(
        kernel,
        out_shape=jax.ShapeDtypeStruct((B, 1, out_dim), jnp.float32),
        grid_spec=pltpu.PrefetchScalarGridSpec(
            num_scalar_prefetch=0,
            grid=(B, nv),
            in_specs=[
                pl.BlockSpec((_CONV_CH, C), lambda b, j: (0, 0)),         # conv W^T
                pl.BlockSpec((_CONV_CH, 1), lambda b, j: (0, 0)),         # conv bias
                pl.BlockSpec((1, out_dim), lambda b, j: (0, 0)),          # fc bias
                pl.BlockSpec((None, C, tv), lambda b, j: (b, 0, j)),      # features
                pl.BlockSpec((_CONV_CH, tv, out_dim),
                             lambda b, j: (0, j, 0)),                     # fc weight
            ],
            out_specs=pl.BlockSpec((None, 1, out_dim), lambda b, j: (b, 0, 0)),
            scratch_shapes=[pltpu.VMEM((1, out_dim), jnp.float32)],
        ),
        compiler_params=pltpu.CompilerParams(
            dimension_semantics=("parallel", "arbitrary"),
            vmem_limit_bytes=_VMEM_LIMIT_BYTES),
    )(prepared["wt"], prepared["cb"], prepared["fb"], feat3, prepared["fcw3"])
    return out.reshape(B, num_anchors, span)


# ----------------------------------------------------------------------------
# Parameter init + pure-jnp reference (torch semantics with bf16 casts).
# ----------------------------------------------------------------------------
def init_params(key, feature_depth, num_classes, num_anchors, fmap_dhw):
    D, H, W = fmap_dhw
    out_dim = num_anchors * (4 + num_classes)
    fc_in = _CONV_CH * D * H * W
    k1, k2, k3, k4 = jax.random.split(key, 4)
    conv_w = jax.random.normal(k1, (feature_depth, _CONV_CH), jnp.float32) / jnp.sqrt(
        jnp.float32(feature_depth))
    conv_b = jax.random.normal(k2, (_CONV_CH,), jnp.float32) * 0.01
    fc_w = jax.random.normal(k3, (fc_in, out_dim), jnp.float32) / jnp.sqrt(
        jnp.float32(fc_in))
    fc_b = jax.random.normal(k4, (out_dim,), jnp.float32) * 0.01
    return dict(conv_w=conv_w, conv_b=conv_b, fc_w=fc_w, fc_b=fc_b)


def reference_forward(feat, params, *, num_classes, num_anchors):
    B, C, D, H, W = feat.shape
    V = D * H * W
    f32, bf16 = jnp.float32, jnp.bfloat16
    wt = params["conv_w"].T.astype(bf16).astype(f32)          # (64, C)
    xr = feat.reshape(B, C, V).astype(bf16).astype(f32)
    conv = jnp.einsum("oc,bcv->bov", wt, xr) + params["conv_b"].reshape(1, _CONV_CH, 1)
    conv = conv.astype(bf16).astype(f32)                      # kernel uses bf16 conv
    flat = conv.reshape(B, _CONV_CH * V)
    fw = params["fc_w"].astype(bf16).astype(f32)
    logits = flat @ fw + params["fc_b"]
    x = logits.reshape(B, num_anchors, 4 + num_classes)
    cls = jax.nn.softmax(x[..., 4:], axis=-1)
    return jnp.concatenate([x[..., :4], cls], axis=-1)


if __name__ == "__main__":
    num_classes, num_anchors = 6, 5
    key = jax.random.PRNGKey(0)

    # ---- test 1: tiny feature map, single voxel tile, f32 features ----------
    B, C, D, H, W = 2, 128, 2, 4, 4                     # V = 32
    k1, k2, key = jax.random.split(key, 3)
    feat = jax.random.normal(k1, (B, C, D, H, W), jnp.float32)
    params = init_params(k2, C, num_classes, num_anchors, (D, H, W))
    prepared = prepare_head_params(params, (D, H, W))
    out = jax.block_until_ready(
        yolo3d_head(feat, prepared, num_classes=num_classes,
                    num_anchors=num_anchors))
    assert out.shape == (B, num_anchors, 4 + num_classes), out.shape
    cls_sums = jnp.sum(out[..., 4:], axis=-1)           # probs must sum to 1
    assert bool(jnp.allclose(cls_sums, 1.0, atol=1e-3)), cls_sums
    ref = reference_forward(feat, params, num_classes=num_classes,
                            num_anchors=num_anchors)
    assert bool(jnp.allclose(out, ref, atol=2e-2, rtol=2e-2)), float(
        jnp.max(jnp.abs(out - ref)))

    # ---- test 2: larger map -> multi-tile reduction with remainder masking,
    #      bf16 features (recommended backbone output dtype) ------------------
    D2, H2, W2 = 2, 10, 16                              # V = 320 -> tv=128, nv=3
    k3, k4 = jax.random.split(key)
    feat2 = jax.random.normal(k3, (B, C, D2, H2, W2),
                              jnp.float32).astype(jnp.bfloat16)
    params2 = init_params(k4, C, num_classes, num_anchors, (D2, H2, W2))
    prepared2 = prepare_head_params(params2, (D2, H2, W2), tv_max=512)
    out2 = jax.block_until_ready(
        yolo3d_head(feat2, prepared2, num_classes=num_classes,
                    num_anchors=num_anchors))
    ref2 = reference_forward(feat2, params2, num_classes=num_classes,
                             num_anchors=num_anchors)
    assert bool(jnp.allclose(out2, ref2, atol=2e-2, rtol=2e-2)), float(
        jnp.max(jnp.abs(out2 - ref2)))

    print("KERNEL_OK")
</pallas_src>

<mosaic_0001>
module attributes {stable_mosaic.version = 11 : i64} {
  func.func @_fused_head_kernel(%arg0: i32, %arg1: i32, %arg2: memref<64x128xbf16, #tpu.memory_space<vmem>>, %arg3: memref<64x1xf32, #tpu.memory_space<vmem>>, %arg4: memref<1x50xf32, #tpu.memory_space<vmem>>, %arg5: memref<1x128x32xf32, #tpu.memory_space<vmem>>, %arg6: memref<64x32x50xbf16, #tpu.memory_space<vmem>>, %arg7: memref<1x1x50xf32, #tpu.memory_space<vmem>>, %arg8: memref<1x50xf32, #tpu.memory_space<vmem>>) attributes {dimension_semantics = [#tpu.dimension_semantics<parallel>, #tpu.dimension_semantics<arbitrary>], iteration_bounds = array<i64: 2, 1>, scalar_prefetch = 0 : i64, scratch_operands = 1 : i64, tpu.core_type = #tpu.core_type<tc>, window_params = [{pipeline_mode = #tpu.pipeline_mode<synchronous>, transform_indices = @transform_0, window_bounds = array<i64: 64, 128>}, {pipeline_mode = #tpu.pipeline_mode<synchronous>, transform_indices = @transform_1, window_bounds = array<i64: 64, 1>}, {pipeline_mode = #tpu.pipeline_mode<synchronous>, transform_indices = @transform_2, window_bounds = array<i64: 1, 50>}, {transform_indices = @transform_3, window_bounds = array<i64: 1, 128, 32>}, {transform_indices = @transform_4, window_bounds = array<i64: 64, 32, 50>}, {transform_indices = @transform_5, window_bounds = array<i64: 1, 1, 50>}]} {
    %c0_i32 = arith.constant 0 : i32
    %0 = arith.cmpi eq, %arg1, %c0_i32 : i32
    %1 = arith.extui %0 : i1 to i32
    %c0_i32_0 = arith.constant 0 : i32
    %2 = arith.cmpi ne, %1, %c0_i32_0 : i32
    scf.if %2 {
      %cst_206 = arith.constant 0.000000e+00 : f32
      %337 = vector.broadcast %cst_206 : f32 to vector<1x50xf32>
      %c0_207 = arith.constant 0 : index
      %c0_208 = arith.constant 0 : index
      %338 = vector.load %arg8[%c0_207, %c0_208] : memref<1x50xf32, #tpu.memory_space<vmem>>, vector<1x50xf32>
      tpu.vector_store %arg8[%c0_207, %c0_208], %337 {strides = array<i32>} : memref<1x50xf32, #tpu.memory_space<vmem>>, vector<1x50xf32>,
    } else {
    }
    %c0 = arith.constant 0 : index
    %c0_1 = arith.constant 0 : index
    %c0_2 = arith.constant 0 : index
    %3 = vector.load %arg5[%c0, %c0_1, %c0_2] : memref<1x128x32xf32, #tpu.memory_space<vmem>>, vector<1x128x32xf32>
    %4 = vector.shape_cast %3 : vector<1x128x32xf32> to vector<128x32xf32>
    %5 = arith.truncf %4 : vector<128x32xf32> to vector<128x32xbf16>
    %c0_3 = arith.constant 0 : index
    %c0_4 = arith.constant 0 : index
    %6 = vector.load %arg2[%c0_3, %c0_4] : memref<64x128xbf16, #tpu.memory_space<vmem>>, vector<64x128xbf16>
    %cst = arith.constant dense<0.000000e+00> : vector<64x32xf32>
    %7 = tpu.matmul %6, %5, %cst {dimension_numbers = #tpu.dot_dimension_numbers<[1], [0], [0], [1], [0, 0, 1, 1], [], []>} : vector<64x128xbf16>, vector<128x32xbf16>, vector<64x32xf32> -> vector<64x32xf32>
    %c0_5 = arith.constant 0 : index
    %c0_6 = arith.constant 0 : index
    %8 = vector.load %arg3[%c0_5, %c0_6] : memref<64x1xf32, #tpu.memory_space<vmem>>, vector<64x1xf32>
    %9 = vector.broadcast %8 : vector<64x1xf32> to vector<64x32xf32>
    %10 = arith.addf %7, %9 : vector<64x32xf32>
    %11 = arith.truncf %10 : vector<64x32xf32> to vector<64x32xbf16>
    %12 = vector.extract_strided_slice %11 {offsets = [0, 0], sizes = [1, 32], strides = [1, 1]} : vector<64x32xbf16> to vector<1x32xbf16>
    %c0_7 = arith.constant 0 : index
    %c0_8 = arith.constant 0 : index
    %c0_9 = arith.constant 0 : index
    %13 = vector.load %arg6[%c0_7, %c0_8, %c0_9] : memref<64x32x50xbf16, #tpu.memory_space<vmem>>, vector<1x32x50xbf16>
    %14 = vector.shape_cast %13 : vector<1x32x50xbf16> to vector<32x50xbf16>
    %cst_10 = arith.constant dense<0.000000e+00> : vector<1x50xf32>
    %15 = tpu.matmul %12, %14, %cst_10 {dimension_numbers = #tpu.dot_dimension_numbers<[1], [0], [0], [1], [0, 0, 1, 1], [], []>} : vector<1x32xbf16>, vector<32x50xbf16>, vector<1x50xf32> -> vector<1x50xf32>
    %16 = vector.extract_strided_slice %11 {offsets = [1, 0], sizes = [1, 32], strides = [1, 1]} : vector<64x32xbf16> to vector<1x32xbf16>
    %c1 = arith.constant 1 : index
    %c0_11 = arith.constant 0 : index
    %c0_12 = arith.constant 0 : index
    %17 = vector.load %arg6[%c1, %c0_11, %c0_12] : memref<64x32x50xbf16, #tpu.memory_space<vmem>>, vector<1x32x50xbf16>
    %18 = vector.shape_cast %17 : vector<1x32x50xbf16> to vector<32x50xbf16>
    %cst_13 = arith.constant dense<0.000000e+00> : vector<1x50xf32>
    %19 = tpu.matmul %16, %18, %cst_13 {dimension_numbers = #tpu.dot_dimension_numbers<[1], [0], [0], [1], [0, 0, 1, 1], [], []>} : vector<1x32xbf16>, vector<32x50xbf16>, vector<1x50xf32> -> vector<1x50xf32>
    %20 = arith.addf %15, %19 : vector<1x50xf32>
    %21 = vector.extract_strided_slice %11 {offsets = [2, 0], sizes = [1, 32], strides = [1, 1]} : vector<64x32xbf16> to vector<1x32xbf16>
    %c2 = arith.constant 2 : index
    %c0_14 = arith.constant 0 : index
    %c0_15 = arith.constant 0 : index
    %22 = vector.load %arg6[%c2, %c0_14, %c0_15] : memref<64x32x50xbf16, #tpu.memory_space<vmem>>, vector<1x32x50xbf16>
    %23 = vector.shape_cast %22 : vector<1x32x50xbf16> to vector<32x50xbf16>
    %cst_16 = arith.constant dense<0.000000e+00> : vector<1x50xf32>
    %24 = tpu.matmul %21, %23, %cst_16 {dimension_numbers = #tpu.dot_dimension_numbers<[1], [0], [0], [1], [0, 0, 1, 1], [], []>} : vector<1x32xbf16>, vector<32x50xbf16>, vector<1x50xf32> -> vector<1x50xf32>
    %25 = arith.addf %20, %24 : vector<1x50xf32>
    %26 = vector.extract_strided_slice %11 {offsets = [3, 0], sizes = [1, 32], strides = [1, 1]} : vector<64x32xbf16> to vector<1x32xbf16>
    %c3 = arith.constant 3 : index
    %c0_17 = arith.constant 0 : index
    %c0_18 = arith.constant 0 : index
    %27 = vector.load %arg6[%c3, %c0_17, %c0_18] : memref<64x32x50xbf16, #tpu.memory_space<vmem>>, vector<1x32x50xbf16>
    %28 = vector.shape_cast %27 : vector<1x32x50xbf16> to vector<32x50xbf16>
    %cst_19 = arith.constant dense<0.000000e+00> : vector<1x50xf32>
    %29 = tpu.matmul %26, %28, %cst_19 {dimension_numbers = #tpu.dot_dimension_numbers<[1], [0], [0], [1], [0, 0, 1, 1], [], []>} : vector<1x32xbf16>, vector<32x50xbf16>, vector<1x50xf32> -> vector<1x50xf32>
    %30 = arith.addf %25, %29 : vector<1x50xf32>
    %31 = vector.extract_strided_slice %11 {offsets = [4, 0], sizes = [1, 32], strides = [1, 1]} : vector<64x32xbf16> to vector<1x32xbf16>
    %c4 = arith.constant 4 : index
    %c0_20 = arith.constant 0 : index
    %c0_21 = arith.constant 0 : index
    %32 = vector.load %arg6[%c4, %c0_20, %c0_21] : memref<64x32x50xbf16, #tpu.memory_space<vmem>>, vector<1x32x50xbf16>
    %33 = vector.shape_cast %32 : vector<1x32x50xbf16> to vector<32x50xbf16>
    %cst_22 = arith.constant dense<0.000000e+00> : vector<1x50xf32>
    %34 = tpu.matmul %31, %33, %cst_22 {dimension_numbers = #tpu.dot_dimension_numbers<[1], [0], [0], [1], [0, 0, 1, 1], [], []>} : vector<1x32xbf16>, vector<32x50xbf16>, vector<1x50xf32> -> vector<1x50xf32>
    %35 = arith.addf %30, %34 : vector<1x50xf32>
    %36 = vector.extract_strided_slice %11 {offsets = [5, 0], sizes = [1, 32], strides = [1, 1]} : vector<64x32xbf16> to vector<1x32xbf16>
    %c5 = arith.constant 5 : index
    %c0_23 = arith.constant 0 : index
    %c0_24 = arith.constant 0 : index
    %37 = vector.load %arg6[%c5, %c0_23, %c0_24] : memref<64x32x50xbf16, #tpu.memory_space<vmem>>, vector<1x32x50xbf16>
    %38 = vector.shape_cast %37 : vector<1x32x50xbf16> to vector<32x50xbf16>
    %cst_25 = arith.constant dense<0.000000e+00> : vector<1x50xf32>
    %39 = tpu.matmul %36, %38, %cst_25 {dimension_numbers = #tpu.dot_dimension_numbers<[1], [0], [0], [1], [0, 0, 1, 1], [], []>} : vector<1x32xbf16>, vector<32x50xbf16>, vector<1x50xf32> -> vector<1x50xf32>
    %40 = arith.addf %35, %39 : vector<1x50xf32>
    %41 = vector.extract_strided_slice %11 {offsets = [6, 0], sizes = [1, 32], strides = [1, 1]} : vector<64x32xbf16> to vector<1x32xbf16>
    %c6 = arith.constant 6 : index
    %c0_26 = arith.constant 0 : index
    %c0_27 = arith.constant 0 : index
    %42 = vector.load %arg6[%c6, %c0_26, %c0_27] : memref<64x32x50xbf16, #tpu.memory_space<vmem>>, vector<1x32x50xbf16>
    %43 = vector.shape_cast %42 : vector<1x32x50xbf16> to vector<32x50xbf16>
    %cst_28 = arith.constant dense<0.000000e+00> : vector<1x50xf32>
    %44 = tpu.matmul %41, %43, %cst_28 {dimension_numbers = #tpu.dot_dimension_numbers<[1], [0], [0], [1], [0, 0, 1, 1], [], []>} : vector<1x32xbf16>, vector<32x50xbf16>, vector<1x50xf32> -> vector<1x50xf32>
    %45 = arith.addf %40, %44 : vector<1x50xf32>
    %46 = vector.extract_strided_slice %11 {offsets = [7, 0], sizes = [1, 32], strides = [1, 1]} : vector<64x32xbf16> to vector<1x32xbf16>
    %c7 = arith.constant 7 : index
    %c0_29 = arith.constant 0 : index
    %c0_30 = arith.constant 0 : index
    %47 = vector.load %arg6[%c7, %c0_29, %c0_30] : memref<64x32x50xbf16, #tpu.memory_space<vmem>>, vector<1x32x50xbf16>
    %48 = vector.shape_cast %47 : vector<1x32x50xbf16> to vector<32x50xbf16>
    %cst_31 = arith.constant dense<0.000000e+00> : vector<1x50xf32>
    %49 = tpu.matmul %46, %48, %cst_31 {dimension_numbers = #tpu.dot_dimension_numbers<[1], [0], [0], [1], [0, 0, 1, 1], [], []>} : vector<1x32xbf16>, vector<32x50xbf16>, vector<1x50xf32> -> vector<1x50xf32>
    %50 = arith.addf %45, %49 : vector<1x50xf32>
    %51 = vector.extract_strided_slice %11 {offsets = [8, 0], sizes = [1, 32], strides = [1, 1]} : vector<64x32xbf16> to vector<1x32xbf16>
    %c8 = arith.constant 8 : index
    %c0_32 = arith.constant 0 : index
    %c0_33 = arith.constant 0 : index
    %52 = vector.load %arg6[%c8, %c0_32, %c0_33] : memref<64x32x50xbf16, #tpu.memory_space<vmem>>, vector<1x32x50xbf16>
    %53 = vector.shape_cast %52 : vector<1x32x50xbf16> to vector<32x50xbf16>
    %cst_34 = arith.constant dense<0.000000e+00> : vector<1x50xf32>
    %54 = tpu.matmul %51, %53, %cst_34 {dimension_numbers = #tpu.dot_dimension_numbers<[1], [0], [0], [1], [0, 0, 1, 1], [], []>} : vector<1x32xbf16>, vector<32x50xbf16>, vector<1x50xf32> -> vector<1x50xf32>
    %55 = arith.addf %50, %54 : vector<1x50xf32>
    %56 = vector.extract_strided_slice %11 {offsets = [9, 0], sizes = [1, 32], strides = [1, 1]} : vector<64x32xbf16> to vector<1x32xbf16>
    %c9 = arith.constant 9 : index
    %c0_35 = arith.constant 0 : index
    %c0_36 = arith.constant 0 : index
    %57 = vector.load %arg6[%c9, %c0_35, %c0_36] : memref<64x32x50xbf16, #tpu.memory_space<vmem>>, vector<1x32x50xbf16>
    %58 = vector.shape_cast %57 : vector<1x32x50xbf16> to vector<32x50xbf16>
    %cst_37 = arith.constant dense<0.000000e+00> : vector<1x50xf32>
    %59 = tpu.matmul %56, %58, %cst_37 {dimension_numbers = #tpu.dot_dimension_numbers<[1], [0], [0], [1], [0, 0, 1, 1], [], []>} : vector<1x32xbf16>, vector<32x50xbf16>, vector<1x50xf32> -> vector<1x50xf32>
    %60 = arith.addf %55, %59 : vector<1x50xf32>
    %61 = vector.extract_strided_slice %11 {offsets = [10, 0], sizes = [1, 32], strides = [1, 1]} : vector<64x32xbf16> to vector<1x32xbf16>
    %c10 = arith.constant 10 : index
    %c0_38 = arith.constant 0 : index
    %c0_39 = arith.constant 0 : index
    %62 = vector.load %arg6[%c10, %c0_38, %c0_39] : memref<64x32x50xbf16, #tpu.memory_space<vmem>>, vector<1x32x50xbf16>
    %63 = vector.shape_cast %62 : vector<1x32x50xbf16> to vector<32x50xbf16>
    %cst_40 = arith.constant dense<0.000000e+00> : vector<1x50xf32>
    %64 = tpu.matmul %61, %63, %cst_40 {dimension_numbers = #tpu.dot_dimension_numbers<[1], [0], [0], [1], [0, 0, 1, 1], [], []>} : vector<1x32xbf16>, vector<32x50xbf16>, vector<1x50xf32> -> vector<1x50xf32>
    %65 = arith.addf %60, %64 : vector<1x50xf32>
    %66 = vector.extract_strided_slice %11 {offsets = [11, 0], sizes = [1, 32], strides = [1, 1]} : vector<64x32xbf16> to vector<1x32xbf16>
    %c11 = arith.constant 11 : index
    %c0_41 = arith.constant 0 : index
    %c0_42 = arith.constant 0 : index
    %67 = vector.load %arg6[%c11, %c0_41, %c0_42] : memref<64x32x50xbf16, #tpu.memory_space<vmem>>, vector<1x32x50xbf16>
    %68 = vector.shape_cast %67 : vector<1x32x50xbf16> to vector<32x50xbf16>
    %cst_43 = arith.constant dense<0.000000e+00> : vector<1x50xf32>
    %69 = tpu.matmul %66, %68, %cst_43 {dimension_numbers = #tpu.dot_dimension_numbers<[1], [0], [0], [1], [0, 0, 1, 1], [], []>} : vector<1x32xbf16>, vector<32x50xbf16>, vector<1x50xf32> -> vector<1x50xf32>
    %70 = arith.addf %65, %69 : vector<1x50xf32>
    %71 = vector.extract_strided_slice %11 {offsets = [12, 0], sizes = [1, 32], strides = [1, 1]} : vector<64x32xbf16> to vector<1x32xbf16>
    %c12 = arith.constant 12 : index
    %c0_44 = arith.constant 0 : index
    %c0_45 = arith.constant 0 : index
    %72 = vector.load %arg6[%c12, %c0_44, %c0_45] : memref<64x32x50xbf16, #tpu.memory_space<vmem>>, vector<1x32x50xbf16>
    %73 = vector.shape_cast %72 : vector<1x32x50xbf16> to vector<32x50xbf16>
    %cst_46 = arith.constant dense<0.000000e+00> : vector<1x50xf32>
    %74 = tpu.matmul %71, %73, %cst_46 {dimension_numbers = #tpu.dot_dimension_numbers<[1], [0], [0], [1], [0, 0, 1, 1], [], []>} : vector<1x32xbf16>, vector<32x50xbf16>, vector<1x50xf32> -> vector<1x50xf32>
    %75 = arith.addf %70, %74 : vector<1x50xf32>
    %76 = vector.extract_strided_slice %11 {offsets = [13, 0], sizes = [1, 32], strides = [1, 1]} : vector<64x32xbf16> to vector<1x32xbf16>
    %c13 = arith.constant 13 : index
    %c0_47 = arith.constant 0 : index
    %c0_48 = arith.constant 0 : index
    %77 = vector.load %arg6[%c13, %c0_47, %c0_48] : memref<64x32x50xbf16, #tpu.memory_space<vmem>>, vector<1x32x50xbf16>
    %78 = vector.shape_cast %77 : vector<1x32x50xbf16> to vector<32x50xbf16>
    %cst_49 = arith.constant dense<0.000000e+00> : vector<1x50xf32>
    %79 = tpu.matmul %76, %78, %cst_49 {dimension_numbers = #tpu.dot_dimension_numbers<[1], [0], [0], [1], [0, 0, 1, 1], [], []>} : vector<1x32xbf16>, vector<32x50xbf16>, vector<1x50xf32> -> vector<1x50xf32>
    %80 = arith.addf %75, %79 : vector<1x50xf32>
    %81 = vector.extract_strided_slice %11 {offsets = [14, 0], sizes = [1, 32], strides = [1, 1]} : vector<64x32xbf16> to vector<1x32xbf16>
    %c14 = arith.constant 14 : index
    %c0_50 = arith.constant 0 : index
    %c0_51 = arith.constant 0 : index
    %82 = vector.load %arg6[%c14, %c0_50, %c0_51] : memref<64x32x50xbf16, #tpu.memory_space<vmem>>, vector<1x32x50xbf16>
    %83 = vector.shape_cast %82 : vector<1x32x50xbf16> to vector<32x50xbf16>
    %cst_52 = arith.constant dense<0.000000e+00> : vector<1x50xf32>
    %84 = tpu.matmul %81, %83, %cst_52 {dimension_numbers = #tpu.dot_dimension_numbers<[1], [0], [0], [1], [0, 0, 1, 1], [], []>} : vector<1x32xbf16>, vector<32x50xbf16>, vector<1x50xf32> -> vector<1x50xf32>
    %85 = arith.addf %80, %84 : vector<1x50xf32>
    %86 = vector.extract_strided_slice %11 {offsets = [15, 0], sizes = [1, 32], strides = [1, 1]} : vector<64x32xbf16> to vector<1x32xbf16>
    %c15 = arith.constant 15 : index
    %c0_53 = arith.constant 0 : index
    %c0_54 = arith.constant 0 : index
    %87 = vector.load %arg6[%c15, %c0_53, %c0_54] : memref<64x32x50xbf16, #tpu.memory_space<vmem>>, vector<1x32x50xbf16>
    %88 = vector.shape_cast %87 : vector<1x32x50xbf16> to vector<32x50xbf16>
    %cst_55 = arith.constant dense<0.000000e+00> : vector<1x50xf32>
    %89 = tpu.matmul %86, %88, %cst_55 {dimension_numbers = #tpu.dot_dimension_numbers<[1], [0], [0], [1], [0, 0, 1, 1], [], []>} : vector<1x32xbf16>, vector<32x50xbf16>, vector<1x50xf32> -> vector<1x50xf32>
    %90 = arith.addf %85, %89 : vector<1x50xf32>
    %91 = vector.extract_strided_slice %11 {offsets = [16, 0], sizes = [1, 32], strides = [1, 1]} : vector<64x32xbf16> to vector<1x32xbf16>
    %c16 = arith.constant 16 : index
    %c0_56 = arith.constant 0 : index
    %c0_57 = arith.constant 0 : index
    %92 = vector.load %arg6[%c16, %c0_56, %c0_57] : memref<64x32x50xbf16, #tpu.memory_space<vmem>>, vector<1x32x50xbf16>
    %93 = vector.shape_cast %92 : vector<1x32x50xbf16> to vector<32x50xbf16>
    %cst_58 = arith.constant dense<0.000000e+00> : vector<1x50xf32>
    %94 = tpu.matmul %91, %93, %cst_58 {dimension_numbers = #tpu.dot_dimension_numbers<[1], [0], [0], [1], [0, 0, 1, 1], [], []>} : vector<1x32xbf16>, vector<32x50xbf16>, vector<1x50xf32> -> vector<1x50xf32>
    %95 = arith.addf %90, %94 : vector<1x50xf32>
    %96 = vector.extract_strided_slice %11 {offsets = [17, 0], sizes = [1, 32], strides = [1, 1]} : vector<64x32xbf16> to vector<1x32xbf16>
    %c17 = arith.constant 17 : index
    %c0_59 = arith.constant 0 : index
    %c0_60 = arith.constant 0 : index
    %97 = vector.load %arg6[%c17, %c0_59, %c0_60] : memref<64x32x50xbf16, #tpu.memory_space<vmem>>, vector<1x32x50xbf16>
    %98 = vector.shape_cast %97 : vector<1x32x50xbf16> to vector<32x50xbf16>
    %cst_61 = arith.constant dense<0.000000e+00> : vector<1x50xf32>
    %99 = tpu.matmul %96, %98, %cst_61 {dimension_numbers = #tpu.dot_dimension_numbers<[1], [0], [0], [1], [0, 0, 1, 1], [], []>} : vector<1x32xbf16>, vector<32x50xbf16>, vector<1x50xf32> -> vector<1x50xf32>
    %100 = arith.addf %95, %99 : vector<1x50xf32>
    %101 = vector.extract_strided_slice %11 {offsets = [18, 0], sizes = [1, 32], strides = [1, 1]} : vector<64x32xbf16> to vector<1x32xbf16>
    %c18 = arith.constant 18 : index
    %c0_62 = arith.constant 0 : index
    %c0_63 = arith.constant 0 : index
    %102 = vector.load %arg6[%c18, %c0_62, %c0_63] : memref<64x32x50xbf16, #tpu.memory_space<vmem>>, vector<1x32x50xbf16>
    %103 = vector.shape_cast %102 : vector<1x32x50xbf16> to vector<32x50xbf16>
    %cst_64 = arith.constant dense<0.000000e+00> : vector<1x50xf32>
    %104 = tpu.matmul %101, %103, %cst_64 {dimension_numbers = #tpu.dot_dimension_numbers<[1], [0], [0], [1], [0, 0, 1, 1], [], []>} : vector<1x32xbf16>, vector<32x50xbf16>, vector<1x50xf32> -> vector<1x50xf32>
    %105 = arith.addf %100, %104 : vector<1x50xf32>
    %106 = vector.extract_strided_slice %11 {offsets = [19, 0], sizes = [1, 32], strides = [1, 1]} : vector<64x32xbf16> to vector<1x32xbf16>
    %c19 = arith.constant 19 : index
    %c0_65 = arith.constant 0 : index
    %c0_66 = arith.constant 0 : index
    %107 = vector.load %arg6[%c19, %c0_65, %c0_66] : memref<64x32x50xbf16, #tpu.memory_space<vmem>>, vector<1x32x50xbf16>
    %108 = vector.shape_cast %107 : vector<1x32x50xbf16> to vector<32x50xbf16>
    %cst_67 = arith.constant dense<0.000000e+00> : vector<1x50xf32>
    %109 = tpu.matmul %106, %108, %cst_67 {dimension_numbers = #tpu.dot_dimension_numbers<[1], [0], [0], [1], [0, 0, 1, 1], [], []>} : vector<1x32xbf16>, vector<32x50xbf16>, vector<1x50xf32> -> vector<1x50xf32>
    %110 = arith.addf %105, %109 : vector<1x50xf32>
    %111 = vector.extract_strided_slice %11 {offsets = [20, 0], sizes = [1, 32], strides = [1, 1]} : vector<64x32xbf16> to vector<1x32xbf16>
    %c20 = arith.constant 20 : index
    %c0_68 = arith.constant 0 : index
    %c0_69 = arith.constant 0 : index
    %112 = vector.load %arg6[%c20, %c0_68, %c0_69] : memref<64x32x50xbf16, #tpu.memory_space<vmem>>, vector<1x32x50xbf16>
    %113 = vector.shape_cast %112 : vector<1x32x50xbf16> to vector<32x50xbf16>
    %cst_70 = arith.constant dense<0.000000e+00> : vector<1x50xf32>
    %114 = tpu.matmul %111, %113, %cst_70 {dimension_numbers = #tpu.dot_dimension_numbers<[1], [0], [0], [1], [0, 0, 1, 1], [], []>} : vector<1x32xbf16>, vector<32x50xbf16>, vector<1x50xf32> -> vector<1x50xf32>
    %115 = arith.addf %110, %114 : vector<1x50xf32>
    %116 = vector.extract_strided_slice %11 {offsets = [21, 0], sizes = [1, 32], strides = [1, 1]} : vector<64x32xbf16> to vector<1x32xbf16>
    %c21 = arith.constant 21 : index
    %c0_71 = arith.constant 0 : index
    %c0_72 = arith.constant 0 : index
    %117 = vector.load %arg6[%c21, %c0_71, %c0_72] : memref<64x32x50xbf16, #tpu.memory_space<vmem>>, vector<1x32x50xbf16>
    %118 = vector.shape_cast %117 : vector<1x32x50xbf16> to vector<32x50xbf16>
    %cst_73 = arith.constant dense<0.000000e+00> : vector<1x50xf32>
    %119 = tpu.matmul %116, %118, %cst_73 {dimension_numbers = #tpu.dot_dimension_numbers<[1], [0], [0], [1], [0, 0, 1, 1], [], []>} : vector<1x32xbf16>, vector<32x50xbf16>, vector<1x50xf32> -> vector<1x50xf32>
    %120 = arith.addf %115, %119 : vector<1x50xf32>
    %121 = vector.extract_strided_slice %11 {offsets = [22, 0], sizes = [1, 32], strides = [1, 1]} : vector<64x32xbf16> to vector<1x32xbf16>
    %c22 = arith.constant 22 : index
    %c0_74 = arith.constant 0 : index
    %c0_75 = arith.constant 0 : index
    %122 = vector.load %arg6[%c22, %c0_74, %c0_75] : memref<64x32x50xbf16, #tpu.memory_space<vmem>>, vector<1x32x50xbf16>
    %123 = vector.shape_cast %122 : vector<1x32x50xbf16> to vector<32x50xbf16>
    %cst_76 = arith.constant dense<0.000000e+00> : vector<1x50xf32>
    %124 = tpu.matmul %121, %123, %cst_76 {dimension_numbers = #tpu.dot_dimension_numbers<[1], [0], [0], [1], [0, 0, 1, 1], [], []>} : vector<1x32xbf16>, vector<32x50xbf16>, vector<1x50xf32> -> vector<1x50xf32>
    %125 = arith.addf %120, %124 : vector<1x50xf32>
    %126 = vector.extract_strided_slice %11 {offsets = [23, 0], sizes = [1, 32], strides = [1, 1]} : vector<64x32xbf16> to vector<1x32xbf16>
    %c23 = arith.constant 23 : index
    %c0_77 = arith.constant 0 : index
    %c0_78 = arith.constant 0 : index
    %127 = vector.load %arg6[%c23, %c0_77, %c0_78] : memref<64x32x50xbf16, #tpu.memory_space<vmem>>, vector<1x32x50xbf16>
    %128 = vector.shape_cast %127 : vector<1x32x50xbf16> to vector<32x50xbf16>
    %cst_79 = arith.constant dense<0.000000e+00> : vector<1x50xf32>
    %129 = tpu.matmul %126, %128, %cst_79 {dimension_numbers = #tpu.dot_dimension_numbers<[1], [0], [0], [1], [0, 0, 1, 1], [], []>} : vector<1x32xbf16>, vector<32x50xbf16>, vector<1x50xf32> -> vector<1x50xf32>
    %130 = arith.addf %125, %129 : vector<1x50xf32>
    %131 = vector.extract_strided_slice %11 {offsets = [24, 0], sizes = [1, 32], strides = [1, 1]} : vector<64x32xbf16> to vector<1x32xbf16>
    %c24 = arith.constant 24 : index
    %c0_80 = arith.constant 0 : index
    %c0_81 = arith.constant 0 : index
    %132 = vector.load %arg6[%c24, %c0_80, %c0_81] : memref<64x32x50xbf16, #tpu.memory_space<vmem>>, vector<1x32x50xbf16>
    %133 = vector.shape_cast %132 : vector<1x32x50xbf16> to vector<32x50xbf16>
    %cst_82 = arith.constant dense<0.000000e+00> : vector<1x50xf32>
    %134 = tpu.matmul %131, %133, %cst_82 {dimension_numbers = #tpu.dot_dimension_numbers<[1], [0], [0], [1], [0, 0, 1, 1], [], []>} : vector<1x32xbf16>, vector<32x50xbf16>, vector<1x50xf32> -> vector<1x50xf32>
    %135 = arith.addf %130, %134 : vector<1x50xf32>
    %136 = vector.extract_strided_slice %11 {offsets = [25, 0], sizes = [1, 32], strides = [1, 1]} : vector<64x32xbf16> to vector<1x32xbf16>
    %c25 = arith.constant 25 : index
    %c0_83 = arith.constant 0 : index
    %c0_84 = arith.constant 0 : index
    %137 = vector.load %arg6[%c25, %c0_83, %c0_84] : memref<64x32x50xbf16, #tpu.memory_space<vmem>>, vector<1x32x50xbf16>
    %138 = vector.shape_cast %137 : vector<1x32x50xbf16> to vector<32x50xbf16>
    %cst_85 = arith.constant dense<0.000000e+00> : vector<1x50xf32>
    %139 = tpu.matmul %136, %138, %cst_85 {dimension_numbers = #tpu.dot_dimension_numbers<[1], [0], [0], [1], [0, 0, 1, 1], [], []>} : vector<1x32xbf16>, vector<32x50xbf16>, vector<1x50xf32> -> vector<1x50xf32>
    %140 = arith.addf %135, %139 : vector<1x50xf32>
    %141 = vector.extract_strided_slice %11 {offsets = [26, 0], sizes = [1, 32], strides = [1, 1]} : vector<64x32xbf16> to vector<1x32xbf16>
    %c26 = arith.constant 26 : index
    %c0_86 = arith.constant 0 : index
    %c0_87 = arith.constant 0 : index
    %142 = vector.load %arg6[%c26, %c0_86, %c0_87] : memref<64x32x50xbf16, #tpu.memory_space<vmem>>, vector<1x32x50xbf16>
    %143 = vector.shape_cast %142 : vector<1x32x50xbf16> to vector<32x50xbf16>
    %cst_88 = arith.constant dense<0.000000e+00> : vector<1x50xf32>
    %144 = tpu.matmul %141, %143, %cst_88 {dimension_numbers = #tpu.dot_dimension_numbers<[1], [0], [0], [1], [0, 0, 1, 1], [], []>} : vector<1x32xbf16>, vector<32x50xbf16>, vector<1x50xf32> -> vector<1x50xf32>
    %145 = arith.addf %140, %144 : vector<1x50xf32>
    %146 = vector.extract_strided_slice %11 {offsets = [27, 0], sizes = [1, 32], strides = [1, 1]} : vector<64x32xbf16> to vector<1x32xbf16>
    %c27 = arith.constant 27 : index
    %c0_89 = arith.constant 0 : index
    %c0_90 = arith.constant 0 : index
    %147 = vector.load %arg6[%c27, %c0_89, %c0_90] : memref<64x32x50xbf16, #tpu.memory_space<vmem>>, vector<1x32x50xbf16>
    %148 = vector.shape_cast %147 : vector<1x32x50xbf16> to vector<32x50xbf16>
    %cst_91 = arith.constant dense<0.000000e+00> : vector<1x50xf32>
    %149 = tpu.matmul %146, %148, %cst_91 {dimension_numbers = #tpu.dot_dimension_numbers<[1], [0], [0], [1], [0, 0, 1, 1], [], []>} : vector<1x32xbf16>, vector<32x50xbf16>, vector<1x50xf32> -> vector<1x50xf32>
    %150 = arith.addf %145, %149 : vector<1x50xf32>
    %151 = vector.extract_strided_slice %11 {offsets = [28, 0], sizes = [1, 32], strides = [1, 1]} : vector<64x32xbf16> to vector<1x32xbf16>
    %c28 = arith.constant 28 : index
    %c0_92 = arith.constant 0 : index
    %c0_93 = arith.constant 0 : index
    %152 = vector.load %arg6[%c28, %c0_92, %c0_93] : memref<64x32x50xbf16, #tpu.memory_space<vmem>>, vector<1x32x50xbf16>
    %153 = vector.shape_cast %152 : vector<1x32x50xbf16> to vector<32x50xbf16>
    %cst_94 = arith.constant dense<0.000000e+00> : vector<1x50xf32>
    %154 = tpu.matmul %151, %153, %cst_94 {dimension_numbers = #tpu.dot_dimension_numbers<[1], [0], [0], [1], [0, 0, 1, 1], [], []>} : vector<1x32xbf16>, vector<32x50xbf16>, vector<1x50xf32> -> vector<1x50xf32>
    %155 = arith.addf %150, %154 : vector<1x50xf32>
    %156 = vector.extract_strided_slice %11 {offsets = [29, 0], sizes = [1, 32], strides = [1, 1]} : vector<64x32xbf16> to vector<1x32xbf16>
    %c29 = arith.constant 29 : index
    %c0_95 = arith.constant 0 : index
    %c0_96 = arith.constant 0 : index
    %157 = vector.load %arg6[%c29, %c0_95, %c0_96] : memref<64x32x50xbf16, #tpu.memory_space<vmem>>, vector<1x32x50xbf16>
    %158 = vector.shape_cast %157 : vector<1x32x50xbf16> to vector<32x50xbf16>
    %cst_97 = arith.constant dense<0.000000e+00> : vector<1x50xf32>
    %159 = tpu.matmul %156, %158, %cst_97 {dimension_numbers = #tpu.dot_dimension_numbers<[1], [0], [0], [1], [0, 0, 1, 1], [], []>} : vector<1x32xbf16>, vector<32x50xbf16>, vector<1x50xf32> -> vector<1x50xf32>
    %160 = arith.addf %155, %159 : vector<1x50xf32>
    %161 = vector.extract_strided_slice %11 {offsets = [30, 0], sizes = [1, 32], strides = [1, 1]} : vector<64x32xbf16> to vector<1x32xbf16>
    %c30 = arith.constant 30 : index
    %c0_98 = arith.constant 0 : index
    %c0_99 = arith.constant 0 : index
    %162 = vector.load %arg6[%c30, %c0_98, %c0_99] : memref<64x32x50xbf16, #tpu.memory_space<vmem>>, vector<1x32x50xbf16>
    %163 = vector.shape_cast %162 : vector<1x32x50xbf16> to vector<32x50xbf16>
    %cst_100 = arith.constant dense<0.000000e+00> : vector<1x50xf32>
    %164 = tpu.matmul %161, %163, %cst_100 {dimension_numbers = #tpu.dot_dimension_numbers<[1], [0], [0], [1], [0, 0, 1, 1], [], []>} : vector<1x32xbf16>, vector<32x50xbf16>, vector<1x50xf32> -> vector<1x50xf32>
    %165 = arith.addf %160, %164 : vector<1x50xf32>
    %166 = vector.extract_strided_slice %11 {offsets = [31, 0], sizes = [1, 32], strides = [1, 1]} : vector<64x32xbf16> to vector<1x32xbf16>
    %c31 = arith.constant 31 : index
    %c0_101 = arith.constant 0 : index
    %c0_102 = arith.constant 0 : index
    %167 = vector.load %arg6[%c31, %c0_101, %c0_102] : memref<64x32x50xbf16, #tpu.memory_space<vmem>>, vector<1x32x50xbf16>
    %168 = vector.shape_cast %167 : vector<1x32x50xbf16> to vector<32x50xbf16>
    %cst_103 = arith.constant dense<0.000000e+00> : vector<1x50xf32>
    %169 = tpu.matmul %166, %168, %cst_103 {dimension_numbers = #tpu.dot_dimension_numbers<[1], [0], [0], [1], [0, 0, 1, 1], [], []>} : vector<1x32xbf16>, vector<32x50xbf16>, vector<1x50xf32> -> vector<1x50xf32>
    %170 = arith.addf %165, %169 : vector<1x50xf32>
    %171 = vector.extract_strided_slice %11 {offsets = [32, 0], sizes = [1, 32], strides = [1, 1]} : vector<64x32xbf16> to vector<1x32xbf16>
    %c32 = arith.constant 32 : index
    %c0_104 = arith.constant 0 : index
    %c0_105 = arith.constant 0 : index
    %172 = vector.load %arg6[%c32, %c0_104, %c0_105] : memref<64x32x50xbf16, #tpu.memory_space<vmem>>, vector<1x32x50xbf16>
    %173 = vector.shape_cast %172 : vector<1x32x50xbf16> to vector<32x50xbf16>
    %cst_106 = arith.constant dense<0.000000e+00> : vector<1x50xf32>
    %174 = tpu.matmul %171, %173, %cst_106 {dimension_numbers = #tpu.dot_dimension_numbers<[1], [0], [0], [1], [0, 0, 1, 1], [], []>} : vector<1x32xbf16>, vector<32x50xbf16>, vector<1x50xf32> -> vector<1x50xf32>
    %175 = arith.addf %170, %174 : vector<1x50xf32>
    %176 = vector.extract_strided_slice %11 {offsets = [33, 0], sizes = [1, 32], strides = [1, 1]} : vector<64x32xbf16> to vector<1x32xbf16>
    %c33 = arith.constant 33 : index
    %c0_107 = arith.constant 0 : index
    %c0_108 = arith.constant 0 : index
    %177 = vector.load %arg6[%c33, %c0_107, %c0_108] : memref<64x32x50xbf16, #tpu.memory_space<vmem>>, vector<1x32x50xbf16>
    %178 = vector.shape_cast %177 : vector<1x32x50xbf16> to vector<32x50xbf16>
    %cst_109 = arith.constant dense<0.000000e+00> : vector<1x50xf32>
    %179 = tpu.matmul %176, %178, %cst_109 {dimension_numbers = #tpu.dot_dimension_numbers<[1], [0], [0], [1], [0, 0, 1, 1], [], []>} : vector<1x32xbf16>, vector<32x50xbf16>, vector<1x50xf32> -> vector<1x50xf32>
    %180 = arith.addf %175, %179 : vector<1x50xf32>
    %181 = vector.extract_strided_slice %11 {offsets = [34, 0], sizes = [1, 32], strides = [1, 1]} : vector<64x32xbf16> to vector<1x32xbf16>
    %c34 = arith.constant 34 : index
    %c0_110 = arith.constant 0 : index
    %c0_111 = arith.constant 0 : index
    %182 = vector.load %arg6[%c34, %c0_110, %c0_111] : memref<64x32x50xbf16, #tpu.memory_space<vmem>>, vector<1x32x50xbf16>
    %183 = vector.shape_cast %182 : vector<1x32x50xbf16> to vector<32x50xbf16>
    %cst_112 = arith.constant dense<0.000000e+00> : vector<1x50xf32>
    %184 = tpu.matmul %181, %183, %cst_112 {dimension_numbers = #tpu.dot_dimension_numbers<[1], [0], [0], [1], [0, 0, 1, 1], [], []>} : vector<1x32xbf16>, vector<32x50xbf16>, vector<1x50xf32> -> vector<1x50xf32>
    %185 = arith.addf %180, %184 : vector<1x50xf32>
    %186 = vector.extract_strided_slice %11 {offsets = [35, 0], sizes = [1, 32], strides = [1, 1]} : vector<64x32xbf16> to vector<1x32xbf16>
    %c35 = arith.constant 35 : index
    %c0_113 = arith.constant 0 : index
    %c0_114 = arith.constant 0 : index
    %187 = vector.load %arg6[%c35, %c0_113, %c0_114] : memref<64x32x50xbf16, #tpu.memory_space<vmem>>, vector<1x32x50xbf16>
    %188 = vector.shape_cast %187 : vector<1x32x50xbf16> to vector<32x50xbf16>
    %cst_115 = arith.constant dense<0.000000e+00> : vector<1x50xf32>
    %189 = tpu.matmul %186, %188, %cst_115 {dimension_numbers = #tpu.dot_dimension_numbers<[1], [0], [0], [1], [0, 0, 1, 1], [], []>} : vector<1x32xbf16>, vector<32x50xbf16>, vector<1x50xf32> -> vector<1x50xf32>
    %190 = arith.addf %185, %189 : vector<1x50xf32>
    %191 = vector.extract_strided_slice %11 {offsets = [36, 0], sizes = [1, 32], strides = [1, 1]} : vector<64x32xbf16> to vector<1x32xbf16>
    %c36 = arith.constant 36 : index
    %c0_116 = arith.constant 0 : index
    %c0_117 = arith.constant 0 : index
    %192 = vector.load %arg6[%c36, %c0_116, %c0_117] : memref<64x32x50xbf16, #tpu.memory_space<vmem>>, vector<1x32x50xbf16>
    %193 = vector.shape_cast %192 : vector<1x32x50xbf16> to vector<32x50xbf16>
    %cst_118 = arith.constant dense<0.000000e+00> : vector<1x50xf32>
    %194 = tpu.matmul %191, %193, %cst_118 {dimension_numbers = #tpu.dot_dimension_numbers<[1], [0], [0], [1], [0, 0, 1, 1], [], []>} : vector<1x32xbf16>, vector<32x50xbf16>, vector<1x50xf32> -> vector<1x50xf32>
    %195 = arith.addf %190, %194 : vector<1x50xf32>
    %196 = vector.extract_strided_slice %11 {offsets = [37, 0], sizes = [1, 32], strides = [1, 1]} : vector<64x32xbf16> to vector<1x32xbf16>
    %c37 = arith.constant 37 : index
    %c0_119 = arith.constant 0 : index
    %c0_120 = arith.constant 0 : index
    %197 = vector.load %arg6[%c37, %c0_119, %c0_120] : memref<64x32x50xbf16, #tpu.memory_space<vmem>>, vector<1x32x50xbf16>
    %198 = vector.shape_cast %197 : vector<1x32x50xbf16> to vector<32x50xbf16>
    %cst_121 = arith.constant dense<0.000000e+00> : vector<1x50xf32>
    %199 = tpu.matmul %196, %198, %cst_121 {dimension_numbers = #tpu.dot_dimension_numbers<[1], [0], [0], [1], [0, 0, 1, 1], [], []>} : vector<1x32xbf16>, vector<32x50xbf16>, vector<1x50xf32> -> vector<1x50xf32>
    %200 = arith.addf %195, %199 : vector<1x50xf32>
    %201 = vector.extract_strided_slice %11 {offsets = [38, 0], sizes = [1, 32], strides = [1, 1]} : vector<64x32xbf16> to vector<1x32xbf16>
    %c38 = arith.constant 38 : index
    %c0_122 = arith.constant 0 : index
    %c0_123 = arith.constant 0 : index
    %202 = vector.load %arg6[%c38, %c0_122, %c0_123] : memref<64x32x50xbf16, #tpu.memory_space<vmem>>, vector<1x32x50xbf16>
    %203 = vector.shape_cast %202 : vector<1x32x50xbf16> to vector<32x50xbf16>
    %cst_124 = arith.constant dense<0.000000e+00> : vector<1x50xf32>
    %204 = tpu.matmul %201, %203, %cst_124 {dimension_numbers = #tpu.dot_dimension_numbers<[1], [0], [0], [1], [0, 0, 1, 1], [], []>} : vector<1x32xbf16>, vector<32x50xbf16>, vector<1x50xf32> -> vector<1x50xf32>
    %205 = arith.addf %200, %204 : vector<1x50xf32>
    %206 = vector.extract_strided_slice %11 {offsets = [39, 0], sizes = [1, 32], strides = [1, 1]} : vector<64x32xbf16> to vector<1x32xbf16>
    %c39 = arith.constant 39 : index
    %c0_125 = arith.constant 0 : index
    %c0_126 = arith.constant 0 : index
    %207 = vector.load %arg6[%c39, %c0_125, %c0_126] : memref<64x32x50xbf16, #tpu.memory_space<vmem>>, vector<1x32x50xbf16>
    %208 = vector.shape_cast %207 : vector<1x32x50xbf16> to vector<32x50xbf16>
    %cst_127 = arith.constant dense<0.000000e+00> : vector<1x50xf32>
    %209 = tpu.matmul %206, %208, %cst_127 {dimension_numbers = #tpu.dot_dimension_numbers<[1], [0], [0], [1], [0, 0, 1, 1], [], []>} : vector<1x32xbf16>, vector<32x50xbf16>, vector<1x50xf32> -> vector<1x50xf32>
    %210 = arith.addf %205, %209 : vector<1x50xf32>
    %211 = vector.extract_strided_slice %11 {offsets = [40, 0], sizes = [1, 32], strides = [1, 1]} : vector<64x32xbf16> to vector<1x32xbf16>
    %c40 = arith.constant 40 : index
    %c0_128 = arith.constant 0 : index
    %c0_129 = arith.constant 0 : index
    %212 = vector.load %arg6[%c40, %c0_128, %c0_129] : memref<64x32x50xbf16, #tpu.memory_space<vmem>>, vector<1x32x50xbf16>
    %213 = vector.shape_cast %212 : vector<1x32x50xbf16> to vector<32x50xbf16>
    %cst_130 = arith.constant dense<0.000000e+00> : vector<1x50xf32>
    %214 = tpu.matmul %211, %213, %cst_130 {dimension_numbers = #tpu.dot_dimension_numbers<[1], [0], [0], [1], [0, 0, 1, 1], [], []>} : vector<1x32xbf16>, vector<32x50xbf16>, vector<1x50xf32> -> vector<1x50xf32>
    %215 = arith.addf %210, %214 : vector<1x50xf32>
    %216 = vector.extract_strided_slice %11 {offsets = [41, 0], sizes = [1, 32], strides = [1, 1]} : vector<64x32xbf16> to vector<1x32xbf16>
    %c41 = arith.constant 41 : index
    %c0_131 = arith.constant 0 : index
    %c0_132 = arith.constant 0 : index
    %217 = vector.load %arg6[%c41, %c0_131, %c0_132] : memref<64x32x50xbf16, #tpu.memory_space<vmem>>, vector<1x32x50xbf16>
    %218 = vector.shape_cast %217 : vector<1x32x50xbf16> to vector<32x50xbf16>
    %cst_133 = arith.constant dense<0.000000e+00> : vector<1x50xf32>
    %219 = tpu.matmul %216, %218, %cst_133 {dimension_numbers = #tpu.dot_dimension_numbers<[1], [0], [0], [1], [0, 0, 1, 1], [], []>} : vector<1x32xbf16>, vector<32x50xbf16>, vector<1x50xf32> -> vector<1x50xf32>
    %220 = arith.addf %215, %219 : vector<1x50xf32>
    %221 = vector.extract_strided_slice %11 {offsets = [42, 0], sizes = [1, 32], strides = [1, 1]} : vector<64x32xbf16> to vector<1x32xbf16>
    %c42 = arith.constant 42 : index
    %c0_134 = arith.constant 0 : index
    %c0_135 = arith.constant 0 : index
    %222 = vector.load %arg6[%c42, %c0_134, %c0_135] : memref<64x32x50xbf16, #tpu.memory_space<vmem>>, vector<1x32x50xbf16>
    %223 = vector.shape_cast %222 : vector<1x32x50xbf16> to vector<32x50xbf16>
    %cst_136 = arith.constant dense<0.000000e+00> : vector<1x50xf32>
    %224 = tpu.matmul %221, %223, %cst_136 {dimension_numbers = #tpu.dot_dimension_numbers<[1], [0], [0], [1], [0, 0, 1, 1], [], []>} : vector<1x32xbf16>, vector<32x50xbf16>, vector<1x50xf32> -> vector<1x50xf32>
    %225 = arith.addf %220, %224 : vector<1x50xf32>
    %226 = vector.extract_strided_slice %11 {offsets = [43, 0], sizes = [1, 32], strides = [1, 1]} : vector<64x32xbf16> to vector<1x32xbf16>
    %c43 = arith.constant 43 : index
    %c0_137 = arith.constant 0 : index
    %c0_138 = arith.constant 0 : index
    %227 = vector.load %arg6[%c43, %c0_137, %c0_138] : memref<64x32x50xbf16, #tpu.memory_space<vmem>>, vector<1x32x50xbf16>
    %228 = vector.shape_cast %227 : vector<1x32x50xbf16> to vector<32x50xbf16>
    %cst_139 = arith.constant dense<0.000000e+00> : vector<1x50xf32>
    %229 = tpu.matmul %226, %228, %cst_139 {dimension_numbers = #tpu.dot_dimension_numbers<[1], [0], [0], [1], [0, 0, 1, 1], [], []>} : vector<1x32xbf16>, vector<32x50xbf16>, vector<1x50xf32> -> vector<1x50xf32>
    %230 = arith.addf %225, %229 : vector<1x50xf32>
    %231 = vector.extract_strided_slice %11 {offsets = [44, 0], sizes = [1, 32], strides = [1, 1]} : vector<64x32xbf16> to vector<1x32xbf16>
    %c44 = arith.constant 44 : index
    %c0_140 = arith.constant 0 : index
    %c0_141 = arith.constant 0 : index
    %232 = vector.load %arg6[%c44, %c0_140, %c0_141] : memref<64x32x50xbf16, #tpu.memory_space<vmem>>, vector<1x32x50xbf16>
    %233 = vector.shape_cast %232 : vector<1x32x50xbf16> to vector<32x50xbf16>
    %cst_142 = arith.constant dense<0.000000e+00> : vector<1x50xf32>
    %234 = tpu.matmul %231, %233, %cst_142 {dimension_numbers = #tpu.dot_dimension_numbers<[1], [0], [0], [1], [0, 0, 1, 1], [], []>} : vector<1x32xbf16>, vector<32x50xbf16>, vector<1x50xf32> -> vector<1x50xf32>
    %235 = arith.addf %230, %234 : vector<1x50xf32>
    %236 = vector.extract_strided_slice %11 {offsets = [45, 0], sizes = [1, 32], strides = [1, 1]} : vector<64x32xbf16> to vector<1x32xbf16>
    %c45 = arith.constant 45 : index
    %c0_143 = arith.constant 0 : index
    %c0_144 = arith.constant 0 : index
    %237 = vector.load %arg6[%c45, %c0_143, %c0_144] : memref<64x32x50xbf16, #tpu.memory_space<vmem>>, vector<1x32x50xbf16>
    %238 = vector.shape_cast %237 : vector<1x32x50xbf16> to vector<32x50xbf16>
    %cst_145 = arith.constant dense<0.000000e+00> : vector<1x50xf32>
    %239 = tpu.matmul %236, %238, %cst_145 {dimension_numbers = #tpu.dot_dimension_numbers<[1], [0], [0], [1], [0, 0, 1, 1], [], []>} : vector<1x32xbf16>, vector<32x50xbf16>, vector<1x50xf32> -> vector<1x50xf32>
    %240 = arith.addf %235, %239 : vector<1x50xf32>
    %241 = vector.extract_strided_slice %11 {offsets = [46, 0], sizes = [1, 32], strides = [1, 1]} : vector<64x32xbf16> to vector<1x32xbf16>
    %c46 = arith.constant 46 : index
    %c0_146 = arith.constant 0 : index
    %c0_147 = arith.constant 0 : index
    %242 = vector.load %arg6[%c46, %c0_146, %c0_147] : memref<64x32x50xbf16, #tpu.memory_space<vmem>>, vector<1x32x50xbf16>
    %243 = vector.shape_cast %242 : vector<1x32x50xbf16> to vector<32x50xbf16>
    %cst_148 = arith.constant dense<0.000000e+00> : vector<1x50xf32>
    %244 = tpu.matmul %241, %243, %cst_148 {dimension_numbers = #tpu.dot_dimension_numbers<[1], [0], [0], [1], [0, 0, 1, 1], [], []>} : vector<1x32xbf16>, vector<32x50xbf16>, vector<1x50xf32> -> vector<1x50xf32>
    %245 = arith.addf %240, %244 : vector<1x50xf32>
    %246 = vector.extract_strided_slice %11 {offsets = [47, 0], sizes = [1, 32], strides = [1, 1]} : vector<64x32xbf16> to vector<1x32xbf16>
    %c47 = arith.constant 47 : index
    %c0_149 = arith.constant 0 : index
    %c0_150 = arith.constant 0 : index
    %247 = vector.load %arg6[%c47, %c0_149, %c0_150] : memref<64x32x50xbf16, #tpu.memory_space<vmem>>, vector<1x32x50xbf16>
    %248 = vector.shape_cast %247 : vector<1x32x50xbf16> to vector<32x50xbf16>
    %cst_151 = arith.constant dense<0.000000e+00> : vector<1x50xf32>
    %249 = tpu.matmul %246, %248, %cst_151 {dimension_numbers = #tpu.dot_dimension_numbers<[1], [0], [0], [1], [0, 0, 1, 1], [], []>} : vector<1x32xbf16>, vector<32x50xbf16>, vector<1x50xf32> -> vector<1x50xf32>
    %250 = arith.addf %245, %249 : vector<1x50xf32>
    %251 = vector.extract_strided_slice %11 {offsets = [48, 0], sizes = [1, 32], strides = [1, 1]} : vector<64x32xbf16> to vector<1x32xbf16>
    %c48 = arith.constant 48 : index
    %c0_152 = arith.constant 0 : index
    %c0_153 = arith.constant 0 : index
    %252 = vector.load %arg6[%c48, %c0_152, %c0_153] : memref<64x32x50xbf16, #tpu.memory_space<vmem>>, vector<1x32x50xbf16>
    %253 = vector.shape_cast %252 : vector<1x32x50xbf16> to vector<32x50xbf16>
    %cst_154 = arith.constant dense<0.000000e+00> : vector<1x50xf32>
    %254 = tpu.matmul %251, %253, %cst_154 {dimension_numbers = #tpu.dot_dimension_numbers<[1], [0], [0], [1], [0, 0, 1, 1], [], []>} : vector<1x32xbf16>, vector<32x50xbf16>, vector<1x50xf32> -> vector<1x50xf32>
    %255 = arith.addf %250, %254 : vector<1x50xf32>
    %256 = vector.extract_strided_slice %11 {offsets = [49, 0], sizes = [1, 32], strides = [1, 1]} : vector<64x32xbf16> to vector<1x32xbf16>
    %c49 = arith.constant 49 : index
    %c0_155 = arith.constant 0 : index
    %c0_156 = arith.constant 0 : index
    %257 = vector.load %arg6[%c49, %c0_155, %c0_156] : memref<64x32x50xbf16, #tpu.memory_space<vmem>>, vector<1x32x50xbf16>
    %258 = vector.shape_cast %257 : vector<1x32x50xbf16> to vector<32x50xbf16>
    %cst_157 = arith.constant dense<0.000000e+00> : vector<1x50xf32>
    %259 = tpu.matmul %256, %258, %cst_157 {dimension_numbers = #tpu.dot_dimension_numbers<[1], [0], [0], [1], [0, 0, 1, 1], [], []>} : vector<1x32xbf16>, vector<32x50xbf16>, vector<1x50xf32> -> vector<1x50xf32>
    %260 = arith.addf %255, %259 : vector<1x50xf32>
    %261 = vector.extract_strided_slice %11 {offsets = [50, 0], sizes = [1, 32], strides = [1, 1]} : vector<64x32xbf16> to vector<1x32xbf16>
    %c50 = arith.constant 50 : index
    %c0_158 = arith.constant 0 : index
    %c0_159 = arith.constant 0 : index
    %262 = vector.load %arg6[%c50, %c0_158, %c0_159] : memref<64x32x50xbf16, #tpu.memory_space<vmem>>, vector<1x32x50xbf16>
    %263 = vector.shape_cast %262 : vector<1x32x50xbf16> to vector<32x50xbf16>
    %cst_160 = arith.constant dense<0.000000e+00> : vector<1x50xf32>
    %264 = tpu.matmul %261, %263, %cst_160 {dimension_numbers = #tpu.dot_dimension_numbers<[1], [0], [0], [1], [0, 0, 1, 1], [], []>} : vector<1x32xbf16>, vector<32x50xbf16>, vector<1x50xf32> -> vector<1x50xf32>
    %265 = arith.addf %260, %264 : vector<1x50xf32>
    %266 = vector.extract_strided_slice %11 {offsets = [51, 0], sizes = [1, 32], strides = [1, 1]} : vector<64x32xbf16> to vector<1x32xbf16>
    %c51 = arith.constant 51 : index
    %c0_161 = arith.constant 0 : index
    %c0_162 = arith.constant 0 : index
    %267 = vector.load %arg6[%c51, %c0_161, %c0_162] : memref<64x32x50xbf16, #tpu.memory_space<vmem>>, vector<1x32x50xbf16>
    %268 = vector.shape_cast %267 : vector<1x32x50xbf16> to vector<32x50xbf16>
    %cst_163 = arith.constant dense<0.000000e+00> : vector<1x50xf32>
    %269 = tpu.matmul %266, %268, %cst_163 {dimension_numbers = #tpu.dot_dimension_numbers<[1], [0], [0], [1], [0, 0, 1, 1], [], []>} : vector<1x32xbf16>, vector<32x50xbf16>, vector<1x50xf32> -> vector<1x50xf32>
    %270 = arith.addf %265, %269 : vector<1x50xf32>
    %271 = vector.extract_strided_slice %11 {offsets = [52, 0], sizes = [1, 32], strides = [1, 1]} : vector<64x32xbf16> to vector<1x32xbf16>
    %c52 = arith.constant 52 : index
    %c0_164 = arith.constant 0 : index
    %c0_165 = arith.constant 0 : index
    %272 = vector.load %arg6[%c52, %c0_164, %c0_165] : memref<64x32x50xbf16, #tpu.memory_space<vmem>>, vector<1x32x50xbf16>
    %273 = vector.shape_cast %272 : vector<1x32x50xbf16> to vector<32x50xbf16>
    %cst_166 = arith.constant dense<0.000000e+00> : vector<1x50xf32>
    %274 = tpu.matmul %271, %273, %cst_166 {dimension_numbers = #tpu.dot_dimension_numbers<[1], [0], [0], [1], [0, 0, 1, 1], [], []>} : vector<1x32xbf16>, vector<32x50xbf16>, vector<1x50xf32> -> vector<1x50xf32>
    %275 = arith.addf %270, %274 : vector<1x50xf32>
    %276 = vector.extract_strided_slice %11 {offsets = [53, 0], sizes = [1, 32], strides = [1, 1]} : vector<64x32xbf16> to vector<1x32xbf16>
    %c53 = arith.constant 53 : index
    %c0_167 = arith.constant 0 : index
    %c0_168 = arith.constant 0 : index
    %277 = vector.load %arg6[%c53, %c0_167, %c0_168] : memref<64x32x50xbf16, #tpu.memory_space<vmem>>, vector<1x32x50xbf16>
    %278 = vector.shape_cast %277 : vector<1x32x50xbf16> to vector<32x50xbf16>
    %cst_169 = arith.constant dense<0.000000e+00> : vector<1x50xf32>
    %279 = tpu.matmul %276, %278, %cst_169 {dimension_numbers = #tpu.dot_dimension_numbers<[1], [0], [0], [1], [0, 0, 1, 1], [], []>} : vector<1x32xbf16>, vector<32x50xbf16>, vector<1x50xf32> -> vector<1x50xf32>
    %280 = arith.addf %275, %279 : vector<1x50xf32>
    %281 = vector.extract_strided_slice %11 {offsets = [54, 0], sizes = [1, 32], strides = [1, 1]} : vector<64x32xbf16> to vector<1x32xbf16>
    %c54 = arith.constant 54 : index
    %c0_170 = arith.constant 0 : index
    %c0_171 = arith.constant 0 : index
    %282 = vector.load %arg6[%c54, %c0_170, %c0_171] : memref<64x32x50xbf16, #tpu.memory_space<vmem>>, vector<1x32x50xbf16>
    %283 = vector.shape_cast %282 : vector<1x32x50xbf16> to vector<32x50xbf16>
    %cst_172 = arith.constant dense<0.000000e+00> : vector<1x50xf32>
    %284 = tpu.matmul %281, %283, %cst_172 {dimension_numbers = #tpu.dot_dimension_numbers<[1], [0], [0], [1], [0, 0, 1, 1], [], []>} : vector<1x32xbf16>, vector<32x50xbf16>, vector<1x50xf32> -> vector<1x50xf32>
    %285 = arith.addf %280, %284 : vector<1x50xf32>
    %286 = vector.extract_strided_slice %11 {offsets = [55, 0], sizes = [1, 32], strides = [1, 1]} : vector<64x32xbf16> to vector<1x32xbf16>
    %c55 = arith.constant 55 : index
    %c0_173 = arith.constant 0 : index
    %c0_174 = arith.constant 0 : index
    %287 = vector.load %arg6[%c55, %c0_173, %c0_174] : memref<64x32x50xbf16, #tpu.memory_space<vmem>>, vector<1x32x50xbf16>
    %288 = vector.shape_cast %287 : vector<1x32x50xbf16> to vector<32x50xbf16>
    %cst_175 = arith.constant dense<0.000000e+00> : vector<1x50xf32>
    %289 = tpu.matmul %286, %288, %cst_175 {dimension_numbers = #tpu.dot_dimension_numbers<[1], [0], [0], [1], [0, 0, 1, 1], [], []>} : vector<1x32xbf16>, vector<32x50xbf16>, vector<1x50xf32> -> vector<1x50xf32>
    %290 = arith.addf %285, %289 : vector<1x50xf32>
    %291 = vector.extract_strided_slice %11 {offsets = [56, 0], sizes = [1, 32], strides = [1, 1]} : vector<64x32xbf16> to vector<1x32xbf16>
    %c56 = arith.constant 56 : index
    %c0_176 = arith.constant 0 : index
    %c0_177 = arith.constant 0 : index
    %292 = vector.load %arg6[%c56, %c0_176, %c0_177] : memref<64x32x50xbf16, #tpu.memory_space<vmem>>, vector<1x32x50xbf16>
    %293 = vector.shape_cast %292 : vector<1x32x50xbf16> to vector<32x50xbf16>
    %cst_178 = arith.constant dense<0.000000e+00> : vector<1x50xf32>
    %294 = tpu.matmul %291, %293, %cst_178 {dimension_numbers = #tpu.dot_dimension_numbers<[1], [0], [0], [1], [0, 0, 1, 1], [], []>} : vector<1x32xbf16>, vector<32x50xbf16>, vector<1x50xf32> -> vector<1x50xf32>
    %295 = arith.addf %290, %294 : vector<1x50xf32>
    %296 = vector.extract_strided_slice %11 {offsets = [57, 0], sizes = [1, 32], strides = [1, 1]} : vector<64x32xbf16> to vector<1x32xbf16>
    %c57 = arith.constant 57 : index
    %c0_179 = arith.constant 0 : index
    %c0_180 = arith.constant 0 : index
    %297 = vector.load %arg6[%c57, %c0_179, %c0_180] : memref<64x32x50xbf16, #tpu.memory_space<vmem>>, vector<1x32x50xbf16>
    %298 = vector.shape_cast %297 : vector<1x32x50xbf16> to vector<32x50xbf16>
    %cst_181 = arith.constant dense<0.000000e+00> : vector<1x50xf32>
    %299 = tpu.matmul %296, %298, %cst_181 {dimension_numbers = #tpu.dot_dimension_numbers<[1], [0], [0], [1], [0, 0, 1, 1], [], []>} : vector<1x32xbf16>, vector<32x50xbf16>, vector<1x50xf32> -> vector<1x50xf32>
    %300 = arith.addf %295, %299 : vector<1x50xf32>
    %301 = vector.extract_strided_slice %11 {offsets = [58, 0], sizes = [1, 32], strides = [1, 1]} : vector<64x32xbf16> to vector<1x32xbf16>
    %c58 = arith.constant 58 : index
    %c0_182 = arith.constant 0 : index
    %c0_183 = arith.constant 0 : index
    %302 = vector.load %arg6[%c58, %c0_182, %c0_183] : memref<64x32x50xbf16, #tpu.memory_space<vmem>>, vector<1x32x50xbf16>
    %303 = vector.shape_cast %302 : vector<1x32x50xbf16> to vector<32x50xbf16>
    %cst_184 = arith.constant dense<0.000000e+00> : vector<1x50xf32>
    %304 = tpu.matmul %301, %303, %cst_184 {dimension_numbers = #tpu.dot_dimension_numbers<[1], [0], [0], [1], [0, 0, 1, 1], [], []>} : vector<1x32xbf16>, vector<32x50xbf16>, vector<1x50xf32> -> vector<1x50xf32>
    %305 = arith.addf %300, %304 : vector<1x50xf32>
    %306 = vector.extract_strided_slice %11 {offsets = [59, 0], sizes = [1, 32], strides = [1, 1]} : vector<64x32xbf16> to vector<1x32xbf16>
    %c59 = arith.constant 59 : index
    %c0_185 = arith.constant 0 : index
    %c0_186 = arith.constant 0 : index
    %307 = vector.load %arg6[%c59, %c0_185, %c0_186] : memref<64x32x50xbf16, #tpu.memory_space<vmem>>, vector<1x32x50xbf16>
    %308 = vector.shape_cast %307 : vector<1x32x50xbf16> to vector<32x50xbf16>
    %cst_187 = arith.constant dense<0.000000e+00> : vector<1x50xf32>
    %309 = tpu.matmul %306, %308, %cst_187 {dimension_numbers = #tpu.dot_dimension_numbers<[1], [0], [0], [1], [0, 0, 1, 1], [], []>} : vector<1x32xbf16>, vector<32x50xbf16>, vector<1x50xf32> -> vector<1x50xf32>
    %310 = arith.addf %305, %309 : vector<1x50xf32>
    %311 = vector.extract_strided_slice %11 {offsets = [60, 0], sizes = [1, 32], strides = [1, 1]} : vector<64x32xbf16> to vector<1x32xbf16>
    %c60 = arith.constant 60 : index
    %c0_188 = arith.constant 0 : index
    %c0_189 = arith.constant 0 : index
    %312 = vector.load %arg6[%c60, %c0_188, %c0_189] : memref<64x32x50xbf16, #tpu.memory_space<vmem>>, vector<1x32x50xbf16>
    %313 = vector.shape_cast %312 : vector<1x32x50xbf16> to vector<32x50xbf16>
    %cst_190 = arith.constant dense<0.000000e+00> : vector<1x50xf32>
    %314 = tpu.matmul %311, %313, %cst_190 {dimension_numbers = #tpu.dot_dimension_numbers<[1], [0], [0], [1], [0, 0, 1, 1], [], []>} : vector<1x32xbf16>, vector<32x50xbf16>, vector<1x50xf32> -> vector<1x50xf32>
    %315 = arith.addf %310, %314 : vector<1x50xf32>
    %316 = vector.extract_strided_slice %11 {offsets = [61, 0], sizes = [1, 32], strides = [1, 1]} : vector<64x32xbf16> to vector<1x32xbf16>
    %c61 = arith.constant 61 : index
    %c0_191 = arith.constant 0 : index
    %c0_192 = arith.constant 0 : index
    %317 = vector.load %arg6[%c61, %c0_191, %c0_192] : memref<64x32x50xbf16, #tpu.memory_space<vmem>>, vector<1x32x50xbf16>
    %318 = vector.shape_cast %317 : vector<1x32x50xbf16> to vector<32x50xbf16>
    %cst_193 = arith.constant dense<0.000000e+00> : vector<1x50xf32>
    %319 = tpu.matmul %316, %318, %cst_193 {dimension_numbers = #tpu.dot_dimension_numbers<[1], [0], [0], [1], [0, 0, 1, 1], [], []>} : vector<1x32xbf16>, vector<32x50xbf16>, vector<1x50xf32> -> vector<1x50xf32>
    %320 = arith.addf %315, %319 : vector<1x50xf32>
    %321 = vector.extract_strided_slice %11 {offsets = [62, 0], sizes = [1, 32], strides = [1, 1]} : vector<64x32xbf16> to vector<1x32xbf16>
    %c62 = arith.constant 62 : index
    %c0_194 = arith.constant 0 : index
    %c0_195 = arith.constant 0 : index
    %322 = vector.load %arg6[%c62, %c0_194, %c0_195] : memref<64x32x50xbf16, #tpu.memory_space<vmem>>, vector<1x32x50xbf16>
    %323 = vector.shape_cast %322 : vector<1x32x50xbf16> to vector<32x50xbf16>
    %cst_196 = arith.constant dense<0.000000e+00> : vector<1x50xf32>
    %324 = tpu.matmul %321, %323, %cst_196 {dimension_numbers = #tpu.dot_dimension_numbers<[1], [0], [0], [1], [0, 0, 1, 1], [], []>} : vector<1x32xbf16>, vector<32x50xbf16>, vector<1x50xf32> -> vector<1x50xf32>
    %325 = arith.addf %320, %324 : vector<1x50xf32>
    %326 = vector.extract_strided_slice %11 {offsets = [63, 0], sizes = [1, 32], strides = [1, 1]} : vector<64x32xbf16> to vector<1x32xbf16>
    %c63 = arith.constant 63 : index
    %c0_197 = arith.constant 0 : index
    %c0_198 = arith.constant 0 : index
    %327 = vector.load %arg6[%c63, %c0_197, %c0_198] : memref<64x32x50xbf16, #tpu.memory_space<vmem>>, vector<1x32x50xbf16>
    %328 = vector.shape_cast %327 : vector<1x32x50xbf16> to vector<32x50xbf16>
    %cst_199 = arith.constant dense<0.000000e+00> : vector<1x50xf32>
    %329 = tpu.matmul %326, %328, %cst_199 {dimension_numbers = #tpu.dot_dimension_numbers<[1], [0], [0], [1], [0, 0, 1, 1], [], []>} : vector<1x32xbf16>, vector<32x50xbf16>, vector<1x50xf32> -> vector<1x50xf32>
    %330 = arith.addf %325, %329 : vector<1x50xf32>
    %c0_200 = arith.constant 0 : index
    %c0_201 = arith.constant 0 : index
    %331 = vector.load %arg8[%c0_200, %c0_201] : memref<1x50xf32, #tpu.memory_space<vmem>>, vector<1x50xf32>
    %332 = arith.addf %331, %330 : vector<1x50xf32>
    %c0_202 = arith.constant 0 : index
    %c0_203 = arith.constant 0 : index
    %333 = vector.load %arg8[%c0_202, %c0_203] : memref<1x50xf32, #tpu.memory_space<vmem>>, vector<1x50xf32>
    tpu.vector_store %arg8[%c0_202, %c0_203], %332 {strides = array<i32>} : memref<1x50xf32, #tpu.memory_space<vmem>>, vector<1x50xf32>,
    %c0_i32_204 = arith.constant 0 : i32
    %334 = arith.cmpi eq, %arg1, %c0_i32_204 : i32
    %335 = arith.extui %334 : i1 to i32
    %c0_i32_205 = arith.constant 0 : i32
    %336 = arith.cmpi ne, %335, %c0_i32_205 : i32
    scf.if %336 {
      %c0_206 = arith.constant 0 : index
      %c0_207 = arith.constant 0 : index
      %337 = vector.load %arg8[%c0_206, %c0_207] : memref<1x50xf32, #tpu.memory_space<vmem>>, vector<1x50xf32>
      %c0_208 = arith.constant 0 : index
      %c0_209 = arith.constant 0 : index
      %338 = vector.load %arg4[%c0_208, %c0_209] : memref<1x50xf32, #tpu.memory_space<vmem>>, vector<1x50xf32>
      %339 = arith.addf %337, %338 : vector<1x50xf32>
      %340 = tpu.iota {dimensions = array<i32: 1>} : vector<1x50xi32>
      %c4_i32 = arith.constant 4 : i32
      %341 = vector.broadcast %c4_i32 : i32 to vector<1x50xi32>
      %342 = arith.cmpi sge, %340, %341 : vector<1x50xi32>
      %c10_i32 = arith.constant 10 : i32
      %343 = vector.broadcast %c10_i32 : i32 to vector<1x50xi32>
      %344 = arith.cmpi slt, %340, %343 : vector<1x50xi32>
      %345 = arith.andi %342, %344 : vector<1x50xi1>
      %cst_210 = arith.constant 0xFF800000 : f32
      %346 = vector.broadcast %cst_210 : f32 to vector<1x50xf32>
      %347 = arith.select %345, %339, %346 : vector<1x50xi1>, vector<1x50xf32>
      %cst_211 = arith.constant dense<0xFF800000> : vector<1xf32>
      %348 = vector.multi_reduction <maximumf>, %347, %cst_211 [1] : vector<1x50xf32> to vector<1xf32>
      %349 = vector.shape_cast %348 : vector<1xf32> to vector<1x1xf32>
      %350 = vector.shape_cast %349 : vector<1x1xf32> to vector<1x1xf32>
      %351 = vector.broadcast %350 : vector<1x1xf32> to vector<1x50xf32>
      %352 = arith.select %345, %351, %339 : vector<1x50xi1>, vector<1x50xf32>
      %c14_i32 = arith.constant 14 : i32
      %353 = vector.broadcast %c14_i32 : i32 to vector<1x50xi32>
      %354 = arith.cmpi sge, %340, %353 : vector<1x50xi32>
      %c20_i32 = arith.constant 20 : i32
      %355 = vector.broadcast %c20_i32 : i32 to vector<1x50xi32>
      %356 = arith.cmpi slt, %340, %355 : vector<1x50xi32>
      %357 = arith.andi %354, %356 : vector<1x50xi1>
      %cst_212 = arith.constant 0xFF800000 : f32
      %358 = vector.broadcast %cst_212 : f32 to vector<1x50xf32>
      %359 = arith.select %357, %339, %358 : vector<1x50xi1>, vector<1x50xf32>
      %cst_213 = arith.constant dense<0xFF800000> : vector<1xf32>
      %360 = vector.multi_reduction <maximumf>, %359, %cst_213 [1] : vector<1x50xf32> to vector<1xf32>
      %361 = vector.shape_cast %360 : vector<1xf32> to vector<1x1xf32>
      %362 = vector.shape_cast %361 : vector<1x1xf32> to vector<1x1xf32>
      %363 = vector.broadcast %362 : vector<1x1xf32> to vector<1x50xf32>
      %364 = arith.select %357, %363, %352 : vector<1x50xi1>, vector<1x50xf32>
      %c24_i32 = arith.constant 24 : i32
      %365 = vector.broadcast %c24_i32 : i32 to vector<1x50xi32>
      %366 = arith.cmpi sge, %340, %365 : vector<1x50xi32>
      %c30_i32 = arith.constant 30 : i32
      %367 = vector.broadcast %c30_i32 : i32 to vector<1x50xi32>
      %368 = arith.cmpi slt, %340, %367 : vector<1x50xi32>
      %369 = arith.andi %366, %368 : vector<1x50xi1>
      %cst_214 = arith.constant 0xFF800000 : f32
      %370 = vector.broadcast %cst_214 : f32 to vector<1x50xf32>
      %371 = arith.select %369, %339, %370 : vector<1x50xi1>, vector<1x50xf32>
      %cst_215 = arith.constant dense<0xFF800000> : vector<1xf32>
      %372 = vector.multi_reduction <maximumf>, %371, %cst_215 [1] : vector<1x50xf32> to vector<1xf32>
      %373 = vector.shape_cast %372 : vector<1xf32> to vector<1x1xf32>
      %374 = vector.shape_cast %373 : vector<1x1xf32> to vector<1x1xf32>
      %375 = vector.broadcast %374 : vector<1x1xf32> to vector<1x50xf32>
      %376 = arith.select %369, %375, %364 : vector<1x50xi1>, vector<1x50xf32>
      %c34_i32 = arith.constant 34 : i32
      %377 = vector.broadcast %c34_i32 : i32 to vector<1x50xi32>
      %378 = arith.cmpi sge, %340, %377 : vector<1x50xi32>
      %c40_i32 = arith.constant 40 : i32
      %379 = vector.broadcast %c40_i32 : i32 to vector<1x50xi32>
      %380 = arith.cmpi slt, %340, %379 : vector<1x50xi32>
      %381 = arith.andi %378, %380 : vector<1x50xi1>
      %cst_216 = arith.constant 0xFF800000 : f32
      %382 = vector.broadcast %cst_216 : f32 to vector<1x50xf32>
      %383 = arith.select %381, %339, %382 : vector<1x50xi1>, vector<1x50xf32>
      %cst_217 = arith.constant dense<0xFF800000> : vector<1xf32>
      %384 = vector.multi_reduction <maximumf>, %383, %cst_217 [1] : vector<1x50xf32> to vector<1xf32>
      %385 = vector.shape_cast %384 : vector<1xf32> to vector<1x1xf32>
      %386 = vector.shape_cast %385 : vector<1x1xf32> to vector<1x1xf32>
      %387 = vector.broadcast %386 : vector<1x1xf32> to vector<1x50xf32>
      %388 = arith.select %381, %387, %376 : vector<1x50xi1>, vector<1x50xf32>
      %c44_i32 = arith.constant 44 : i32
      %389 = vector.broadcast %c44_i32 : i32 to vector<1x50xi32>
      %390 = arith.cmpi sge, %340, %389 : vector<1x50xi32>
      %c50_i32 = arith.constant 50 : i32
      %391 = vector.broadcast %c50_i32 : i32 to vector<1x50xi32>
      %392 = arith.cmpi slt, %340, %391 : vector<1x50xi32>
      %393 = arith.andi %390, %392 : vector<1x50xi1>
      %cst_218 = arith.constant 0xFF800000 : f32
      %394 = vector.broadcast %cst_218 : f32 to vector<1x50xf32>
      %395 = arith.select %393, %339, %394 : vector<1x50xi1>, vector<1x50xf32>
      %cst_219 = arith.constant dense<0xFF800000> : vector<1xf32>
      %396 = vector.multi_reduction <maximumf>, %395, %cst_219 [1] : vector<1x50xf32> to vector<1xf32>
      %397 = vector.shape_cast %396 : vector<1xf32> to vector<1x1xf32>
      %398 = vector.shape_cast %397 : vector<1x1xf32> to vector<1x1xf32>
      %399 = vector.broadcast %398 : vector<1x1xf32> to vector<1x50xf32>
      %400 = arith.select %393, %399, %388 : vector<1x50xi1>, vector<1x50xf32>
      %401 = arith.subf %339, %400 : vector<1x50xf32>
      %402 = math.exp %401 : vector<1x50xf32>
      %cst_220 = arith.constant 0.000000e+00 : f32
      %403 = vector.broadcast %cst_220 : f32 to vector<1x50xf32>
      %404 = arith.select %345, %402, %403 : vector<1x50xi1>, vector<1x50xf32>
      %cst_221 = arith.constant dense<0.000000e+00> : vector<1xf32>
      %405 = vector.multi_reduction <add>, %404, %cst_221 [1] : vector<1x50xf32> to vector<1xf32>
      %406 = vector.shape_cast %405 : vector<1xf32> to vector<1x1xf32>
      %407 = vector.broadcast %406 : vector<1x1xf32> to vector<1x50xf32>
      %408 = arith.divf %402, %407 : vector<1x50xf32>
      %409 = arith.select %345, %408, %339 : vector<1x50xi1>, vector<1x50xf32>
      %cst_222 = arith.constant 0.000000e+00 : f32
      %410 = vector.broadcast %cst_222 : f32 to vector<1x50xf32>
      %411 = arith.select %357, %402, %410 : vector<1x50xi1>, vector<1x50xf32>
      %cst_223 = arith.constant dense<0.000000e+00> : vector<1xf32>
      %412 = vector.multi_reduction <add>, %411, %cst_223 [1] : vector<1x50xf32> to vector<1xf32>
      %413 = vector.shape_cast %412 : vector<1xf32> to vector<1x1xf32>
      %414 = vector.broadcast %413 : vector<1x1xf32> to vector<1x50xf32>
      %415 = arith.divf %402, %414 : vector<1x50xf32>
      %416 = arith.select %357, %415, %409 : vector<1x50xi1>, vector<1x50xf32>
      %cst_224 = arith.constant 0.000000e+00 : f32
      %417 = vector.broadcast %cst_224 : f32 to vector<1x50xf32>
      %418 = arith.select %369, %402, %417 : vector<1x50xi1>, vector<1x50xf32>
      %cst_225 = arith.constant dense<0.000000e+00> : vector<1xf32>
      %419 = vector.multi_reduction <add>, %418, %cst_225 [1] : vector<1x50xf32> to vector<1xf32>
      %420 = vector.shape_cast %419 : vector<1xf32> to vector<1x1xf32>
      %421 = vector.broadcast %420 : vector<1x1xf32> to vector<1x50xf32>
      %422 = arith.divf %402, %421 : vector<1x50xf32>
      %423 = arith.select %369, %422, %416 : vector<1x50xi1>, vector<1x50xf32>
      %cst_226 = arith.constant 0.000000e+00 : f32
      %424 = vector.broadcast %cst_226 : f32 to vector<1x50xf32>
      %425 = arith.select %381, %402, %424 : vector<1x50xi1>, vector<1x50xf32>
      %cst_227 = arith.constant dense<0.000000e+00> : vector<1xf32>
      %426 = vector.multi_reduction <add>, %425, %cst_227 [1] : vector<1x50xf32> to vector<1xf32>
      %427 = vector.shape_cast %426 : vector<1xf32> to vector<1x1xf32>
      %428 = vector.broadcast %427 : vector<1x1xf32> to vector<1x50xf32>
      %429 = arith.divf %402, %428 : vector<1x50xf32>
      %430 = arith.select %381, %429, %423 : vector<1x50xi1>, vector<1x50xf32>
      %cst_228 = arith.constant 0.000000e+00 : f32
      %431 = vector.broadcast %cst_228 : f32 to vector<1x50xf32>
      %432 = arith.select %393, %402, %431 : vector<1x50xi1>, vector<1x50xf32>
      %cst_229 = arith.constant dense<0.000000e+00> : vector<1xf32>
      %433 = vector.multi_reduction <add>, %432, %cst_229 [1] : vector<1x50xf32> to vector<1xf32>
      %434 = vector.shape_cast %433 : vector<1xf32> to vector<1x1xf32>
      %435 = vector.broadcast %434 : vector<1x1xf32> to vector<1x50xf32>
      %436 = arith.divf %402, %435 : vector<1x50xf32>
      %437 = arith.select %393, %436, %430 : vector<1x50xi1>, vector<1x50xf32>
      %c0_230 = arith.constant 0 : index
      %c0_231 = arith.constant 0 : index
      %c0_232 = arith.constant 0 : index
      %438 = vector.load %arg7[%c0_230, %c0_231, %c0_232] : memref<1x1x50xf32, #tpu.memory_space<vmem>>, vector<1x1x50xf32>
      %439 = vector.shape_cast %438 : vector<1x1x50xf32> to vector<1x50xf32>
      %440 = vector.shape_cast %437 : vector<1x50xf32> to vector<1x1x50xf32>
      tpu.vector_store %arg7[%c0_230, %c0_231, %c0_232], %440 {strides = array<i32>} : memref<1x1x50xf32, #tpu.memory_space<vmem>>, vector<1x1x50xf32>,
    } else {
    }
    return
  }
  func.func @transform_0(%arg0: i32, %arg1: i32) -> (i32, i32) {
    %c0_i32 = arith.constant 0 : i32
    %c0_i32_0 = arith.constant 0 : i32
    %c0_i32_1 = arith.constant 0 : i32
    return %c0_i32, %c0_i32_0 : i32, i32
  }
  func.func @transform_1(%arg0: i32, %arg1: i32) -> (i32, i32) {
    %c0_i32 = arith.constant 0 : i32
    %c0_i32_0 = arith.constant 0 : i32
    %c0_i32_1 = arith.constant 0 : i32
    return %c0_i32, %c0_i32_0 : i32, i32
  }
  func.func @transform_2(%arg0: i32, %arg1: i32) -> (i32, i32) {
    %c0_i32 = arith.constant 0 : i32
    %c0_i32_0 = arith.constant 0 : i32
    %c0_i32_1 = arith.constant 0 : i32
    return %c0_i32, %c0_i32_0 : i32, i32
  }
  func.func @transform_3(%arg0: i32, %arg1: i32) -> (i32, i32, i32) {
    %c0_i32 = arith.constant 0 : i32
    %c0_i32_0 = arith.constant 0 : i32
    return %arg0, %c0_i32, %arg1 : i32, i32, i32
  }
  func.func @transform_4(%arg0: i32, %arg1: i32) -> (i32, i32, i32) {
    %c0_i32 = arith.constant 0 : i32
    %c0_i32_0 = arith.constant 0 : i32
    %c0_i32_1 = arith.constant 0 : i32
    return %c0_i32, %arg1, %c0_i32_0 : i32, i32, i32
  }
  func.func @transform_5(%arg0: i32, %arg1: i32) -> (i32, i32, i32) {
    %c0_i32 = arith.constant 0 : i32
    %c0_i32_0 = arith.constant 0 : i32
    %c0_i32_1 = arith.constant 0 : i32
    return %arg0, %c0_i32, %c0_i32_0 : i32, i32, i32
  }
}

</mosaic_0001>

<bundles_post_ra>
// kernel: tpu_custom_call.1
= control target key start
LH: loop header
LB: loop body
LE: loop exit
PB: predicated region body
PF: predicated region fallthrough
CT: control target
= control target key end

     0   :  { %10 = vsyncpa [#allocation4], 0  ;;  %s7179_s0 = inlined_call_operand.vmem [shape: bf16[64,128], index: 0, kind: input, shape index: {}]   ;;  %s7180_s1 = inlined_call_operand.vmem [shape: f32[64,1], index: 1, kind: input, shape index: {}]   ;;  %s7181_s2 = inlined_call_operand.vmem [shape: f32[1,50], index: 2, kind: input, shape index: {}]   ;;  %s7182_s3 = inlined_call_operand.vmem [shape: f32[2,128,32], index: 3, kind: input, shape index: {}]   ;;  %s7183_s4 = inlined_call_operand.vmem [shape: bf16[64,32,50], index: 4, kind: input, shape index: {}]   ;;  %s7184_s5 = inlined_call_operand.hbm [shape: f32[2,1,50], index: 5, kind: output, shape index: {}]  }
   0x1   :  { %12 = vsyncpa [#allocation4 + $0x1], 0  ;;  %s6123_s18 = smov 0   ;;  %s6125_s19 = smov 0  }
   0x2   :  { %s6127_s20 = smov 0   ;;  %s6129_s21 = smov 0  }
   0x3   :  { %s6131_s22 = smov 0   ;;  %s6133_s23 = smov 0  }
   0x4 LB: > { %s4605_s24 = sadd.s32 4294967295, %s6087_s23   ;;  %s4606_s25 = sadd.s32 4294967294, %s6087_s23   ;;  %s6087_s23 = sphi %s6133_s23, %s18_s23   ;;  %s6083_s22 = sphi %s6131_s22, %s7201_s22   ;;  %s6079_s21 = sphi %s6129_s21, %s7200_s21   ;;  %s6075_s20 = sphi %s6127_s20, %s7199_s20   ;;  %s6071_s19 = sphi %s6125_s19, %s7198_s19   ;;  %s6067_s18 = sphi %s6123_s18, %s7197_s18  }
   0x5   : > { %s30_s26 = sadd.s32 1, %s6083_s22  ;;  %s154_s27 = sadd.s32 1, %s6075_s20 }
   0x6   : > { %p32_p0 = scmp.ge.s32.totalorder %s30_s26, 2  ;;  %p164_p1 = scmp.ne.s32.totalorder %s6075_s20, %s6071_s19 }
   0x7   : > { %p165_p2 = scmp.eq.s32.totalorder %s4605_s24, 1  ;;  %p170_p3 = scmp.ne.s32.totalorder %s6071_s19, %s6067_s18 }
   0x8   : > { %s7203_s26 = smov (%p32_p0, %s30_s26), 0  ;;  %p171_p5 = scmp.eq.s32.totalorder %s4606_s25, 1 }
   0x9   : > { %p6163_p4 = por %p165_p2, %p164_p1  ;;  %s151_s29 = ssub.s32 %s6083_s22, %s7203_s26 }
   0xa   : > { %p4610_p6 = scmp.ge.s32.totalorder %s6087_s23, 1  ;;  %p152_p7 = scmp.eq.s32.totalorder %s151_s29, 0 }
   0xb   : > { %p6170_p8 = por %p171_p5, %p170_p3  ;;  %p218_p9 = scmp.lt.s32.totalorder %s6087_s23, 3 }
   0xc   : > { %s6176_s6 = scalar_select %p152_p7, %s6075_s20, %s154_s27  }
   0xd   : > { %p219_p10 = pnand %p4610_p6, %p218_p9 }
   0xe   : > { %p253_p11 = scmp.lt.s32.totalorder (!%p219_p10), %s6079_s21, 1  ;;  %v5865_v0 = vld [vmem:[%s7179_s0] sm:$0xff] (!%p219_p10)   ;;  %v6089_v1 = vmov (!%p219_p10), 0   ;;  %v307_v3 = vld [vmem:[%s7180_s1 + $0x8] sm:$0xff] (!%p219_p10)  ;;  %v308_v4 = vld [vmem:[%s7180_s1 + $0x10] sm:$0xff] (!%p219_p10)  ;;  %v6090_v38 = vmov (!%p219_p10), 0.0  }
   0xf   : > { %222 = sbr.rel (%p219_p10) target bundleno = 1123 (0x463), region = 40  ;;  %5285 = vmatprep.mubr.bf16.mxu0 (!%p219_p10), %v5865_v0  ;;  %5863 = vset.pattern.permute.xlu0 (!%p219_p10), %v6089_v1  ;;  %v306_v2 = vld [vmem:[%s7180_s1] sm:$0xff] (!%p219_p10)  ;;  %v309_v10 = vld [vmem:[%s7180_s1 + $0x18] sm:$0xff] (!%p219_p10)  ;;  %v311_v18 = vld [vmem:[%s7180_s1 + $0x28] sm:$0xff] (!%p219_p10)  ;;  %vm6091_vm0 = vmmov (!%p219_p10), 0   ;;  %vm471_vm1 = vcmask (!%p219_p10), 261120  }
  0x10   : > { %5864 = vset.pattern.permute.xlu1 (!%p219_p10), %v6089_v1  ;;  %316 = vperm.xlu0 (!%p219_p10), %5863, %v306_v2   ;;  %v310_v14 = vld [vmem:[%s7180_s1 + $0x20] sm:$0xff] (!%p219_p10)  ;;  %v312_v19 = vld [vmem:[%s7180_s1 + $0x30] sm:$0xff] (!%p219_p10)  ;;  %v313_v20 = vld [vmem:[%s7180_s1 + $0x38] sm:$0xff] (!%p219_p10)  ;;  %vm272_vm2 = vcmask (!%p219_p10), 401408   ;;  %s6092_s24 = smov (!%p219_p10), [#allocation3]  }
  0x11   : > { %326 = vperm.xlu1 (!%p219_p10), %5864, %v308_v4   ;;  %v5866_v34 = vld [vmem:[%s7179_s0 + $0x8] sm:$0xff] (!%p219_p10)   ;;  %v5867_v35 = vld [vmem:[%s7179_s0 + $0x10] sm:$0xff] (!%p219_p10)   ;;  %v5868_v36 = vld [vmem:[%s7179_s0 + $0x18] sm:$0xff] (!%p219_p10)   ;;  %5293 = vmatprep.subr.bf16.mxu1 (!%p219_p10), %v6090_v38  ;;  %273 = vst.msk [vmem:[#allocation2] sm:$0x1] (!%p219_p10), %vm272_vm2, %v6090_v38  ;;  %s6013_s25 = sshll.u32 (!%p219_p10), %s6092_s24, 4  ;;  %s6014_s25 = int_to_ptr.vmem [resolvable:$false] %s6013_s25 }
  0x12   : > { %v5869_v37 = vld [vmem:[%s7183_s4 + $0x10] sm:$0xff] (!%p219_p10)   ;;  %v5871_v40 = vld [vmem:[%s7183_s4 + $0x18] sm:$0xff] (!%p219_p10)   ;;  %5297 = vmatprep.mubr.msk.bf16.mxu1 (!%p219_p10), %vm6091_vm0, %v6090_v38  ;;  %v5873_v58 = vld [vmem:[%s7183_s4] sm:$0xff] (!%p219_p10)   ;;  %s6015_s27 = scalar_lea.vmem (!%p219_p10), %s6014_s25, 32 }
  0x13   : > { %5294 = vmatpush3.bf16.msra.mxu1 (!%p219_p10), %v5869_v37  ;;  %v5870_v39 = vld [vmem:[%s7183_s4 + $0x50] sm:$0xff] (!%p219_p10)   ;;  %v5872_v41 = vld [vmem:[%s7183_s4 + $0x58] sm:$0xff] (!%p219_p10)  }
  0x14   : > { %321 = vperm.xlu0 (!%p219_p10), %5863, %v307_v3   ;;  %5295 = vmatprep.subr.bf16.mxu1 (!%p219_p10), %v6090_v38  ;;  %v5874_v63 = vld [vmem:[%s7183_s4 + $0x70] sm:$0xff] (!%p219_p10)  }
  0x15   : > { %331 = vperm.xlu1 (!%p219_p10), %5864, %v309_v10   ;;  %v5876_v10 = vld [vmem:[%s7183_s4 + $0x78] sm:$0xff] (!%p219_p10)   ;;  %v5894_v37 = vld [vmem:[%s7183_s4 + $0x110] sm:$0xff] (!%p219_p10)  }
  0x16   : > { %s254_s9 = scalar_select %p253_p11, %s6079_s21, 1 }
  0x17   : > { %5296 = vmatpush3.bf16.msra.mxu1 %v5871_v40  ;;  %v5895_v40 = vld [vmem:[%s7183_s4 + $0x88] sm:$0xff]  }
  0x18   : > { %s5064_s10 = sshll.u32 %s254_s9, 7  ;;  %336 = vperm.xlu0 %5863, %v310_v14   ;;  %5301 = vmatprep.subr.bf16.mxu1 %v6090_v38  ;;  %s251_s9 = sand.u32 1, %s6071_s19  }
  0x19   : > { %s6189_s15 = scalar_lea.vmem %s7182_s3, %s5064_s10  ;;  %341 = vperm.xlu1 %5864, %v311_v18   ;;  %s5061_s10 = sshll.u32 %s6079_s21, 4 }
  0x1a   : > { %v274_v5 = vld [vmem:[%s6189_s15] sm:$0xff]  ;;  %v275_v6 = vld [vmem:[%s6189_s15 + $0x8] sm:$0xff]  ;;  %v276_v7 = vld [vmem:[%s6189_s15 + $0x10] sm:$0xff]  ;;  %s252_s11 = scalar_lea.vmem [#allocation3], %s251_s9  ;;  %s7129_s16 = scalar_lea.hbm %s7184_s5, %s5061_s10 }
  0x1b   : > { %v290_v8 = vpack.c.bf16 %v275_v6, %v274_v5  ;;  %v277_v9 = vld [vmem:[%s6189_s15 + $0x18] sm:$0xff]  ;;  %v278_v12 = vld [vmem:[%s6189_s15 + $0x20] sm:$0xff]  ;;  %v279_v13 = vld [vmem:[%s6189_s15 + $0x28] sm:$0xff]  ;;  %s4521_s12 = sshll.u32 %s252_s11, 4  ;;  %s4509_s21 = scalar_lea.sflag [#allocation4], %s251_s9  ;;  %s7131_s12 = int_to_ptr.vmem [resolvable:$true] %s4521_s12 }
  0x1c   : > { %v291_v11 = vpack.c.bf16 %v277_v9, %v276_v7  ;;  %v292_v15 = vpack.c.bf16 %v279_v13, %v278_v12  ;;  %v280_v16 = vld [vmem:[%s6189_s15 + $0x30] sm:$0xff]  ;;  %v281_v17 = vld [vmem:[%s6189_s15 + $0x38] sm:$0xff]  ;;  %v282_v21 = vld [vmem:[%s6189_s15 + $0x40] sm:$0xff]  ;;  %346 = vperm.xlu0 %5863, %v312_v19   ;;  %s6009_s17 = scalar_lea.vmem %s7131_s12, 16  ;;  %p6016_p1 = scmp.lt.s32.totalorder %s7131_s12, %s6014_s25 }
  0x1d   : > { %5269 = vmatprep.subr.bf16.mxu0 %v290_v8  ;;  %v283_v22 = vld [vmem:[%s6189_s15 + $0x48] sm:$0xff]  ;;  %v293_v23 = vpack.c.bf16 %v281_v17, %v280_v16  ;;  %v284_v24 = vld [vmem:[%s6189_s15 + $0x50] sm:$0xff]  ;;  %v285_v25 = vld [vmem:[%s6189_s15 + $0x58] sm:$0xff]  ;;  %351 = vperm.xlu1 %5864, %v313_v20   ;;  %p6010_p12 = scmp.ne.s32.totalorder %s7131_s12, %s6009_s17  ;;  %p6017_p2 = scmp.lt.s32.totalorder %s6015_s27, %s6009_s17 }
  0x1e   : > { %5270 = vmatpush3.bf16.msra.mxu0 %v290_v8  ;;  %v294_v26 = vpack.c.bf16 %v283_v22, %v282_v21  ;;  %v286_v27 = vld [vmem:[%s6189_s15 + $0x60] sm:$0xff]  ;;  %v287_v28 = vld [vmem:[%s6189_s15 + $0x68] sm:$0xff]  ;;  %v295_v29 = vpack.c.bf16 %v285_v25, %v284_v24  ;;  %v288_v30 = vld [vmem:[%s6189_s15 + $0x70] sm:$0xff] }
  0x1f   : > { %5271 = vmatprep.subr.bf16.mxu0 %v291_v11  ;;  %v289_v31 = vld [vmem:[%s6189_s15 + $0x78] sm:$0xff]  ;;  %v296_v32 = vpack.c.bf16 %v287_v28, %v286_v27  ;;  %v5875_v6 = vld [vmem:[%s7183_s4 + $0x8] sm:$0xff]   ;;  %v5877_v12 = vld [vmem:[%s7183_s4 + $0x20] sm:$0xff]   ;;  %p6011_p13 = pnand %p6010_p12, %p6163_p4  ;;  %p6018_p3 = por %p6017_p2, %p6016_p1 }
  0x20   : > { %v297_v33 = vpack.c.bf16 %v289_v31, %v288_v30  ;;  %v5878_v13 = vld [vmem:[%s7183_s4 + $0x90] sm:$0xff]   ;;  %v5880_v16 = vld [vmem:[%s7183_s4 + $0x98] sm:$0xff]   ;;  %v5887_v27 = vld [vmem:[%s7183_s4 + $0x48] sm:$0xff]  }
  0x21   : > { %v5881_v17 = vld [vmem:[%s7183_s4 + $0x30] sm:$0xff]   ;;  %v5883_v21 = vld [vmem:[%s7183_s4 + $0x38] sm:$0xff]   ;;  %p6012_p0 = pneg %p6011_p13 }
  0x22   : > { %5272 = vmatpush3.bf16.msra.mxu0 %v291_v11  ;;  %v5882_v19 = vld [vmem:[%s7183_s4 + $0xb0] sm:$0xff]   ;;  %v5884_v22 = vld [vmem:[%s7183_s4 + $0xb8] sm:$0xff]  }
  0x23   : > { %5273 = vmatprep.subr.bf16.mxu0 %v292_v15  ;;  %v5886_v25 = vld [vmem:[%s7183_s4 + $0xd0] sm:$0xff]   ;;  %v5888_v28 = vld [vmem:[%s7183_s4 + $0xd8] sm:$0xff]   ;;  %p6019_p5 = pnand %p6018_p3, %p6012_p0 }
  0x24   : > { %v5890_v31 = vld [vmem:[%s7183_s4 + $0xf0] sm:$0xff]  }
  0x26   : > { %5274 = vmatpush3.bf16.msra.mxu0 %v292_v15  ;;  %v5879_v15 = vld [vmem:[%s7183_s4 + $0x28] sm:$0xff]  }
  0x27   : > { %5275 = vmatprep.subr.bf16.mxu0 %v293_v23 }
  0x2a   : > { %5276 = vmatpush3.bf16.msra.mxu0 %v293_v23  ;;  %v5885_v23 = vld [vmem:[%s7183_s4 + $0x40] sm:$0xff]  }
  0x2b   : > { %5277 = vmatprep.subr.bf16.mxu0 %v294_v26 }
  0x2e   : > { %5278 = vmatpush3.bf16.msra.mxu0 %v294_v26 }
  0x2f   : > { %5279 = vmatprep.subr.bf16.mxu0 %v295_v29 }
  0x32   : > { %5280 = vmatpush3.bf16.msra.mxu0 %v295_v29  ;;  %v5889_v29 = vld [vmem:[%s7183_s4 + $0x60] sm:$0xff]  }
  0x33   : > { %5281 = vmatprep.subr.bf16.mxu0 %v296_v32 }
  0x36   : > { %5282 = vmatpush3.bf16.msra.mxu0 %v296_v32 }
  0x37   : > { %5283 = vmatprep.subr.bf16.mxu0 %v297_v33 }
  0x3a   : > { %5284 = vmatpush3.bf16.msra.mxu0 %v297_v33  ;;  %v5891_v33 = vld [vmem:[%s7183_s4 + $0x68] sm:$0xff]  }
  0x3b   : > { %5333 = vmatprep.subr.bf16.mxu0 %v6090_v38 }
  0x3d   : > { %5286 = vmatmul.mubr.bf16.vlgmr.msra.gmra.mrb[0].mxu0 %v5866_v34  ;;  %v5892_v34 = vld [vmem:[%s7183_s4 + $0xf8] sm:$0xff]  }
  0x3e   : > { %5289 = vmatprep.mubr.bf16.mxu0 %v5867_v35  ;;  %5334 = vmatpush3.bf16.msra.mxu0 %v5870_v39  ;;  %v5893_v35 = vld [vmem:[%s7183_s4 + $0x80] sm:$0xff]  }
  0x3f   : > { %5335 = vmatprep.subr.bf16.mxu0 %v6090_v38 }
  0x42   : > { %5336 = vmatpush3.bf16.msra.mxu0 %v5872_v41  ;;  %v5896_v41 = vld [vmem:[%s7183_s4 + $0x118] sm:$0xff]  }
  0x43   : > { %5349 = vmatprep.subr.bf16.mxu0 %v6090_v38 }
  0x45   : > { %5290 = vmatmul.mubr.bf16.gmra.mrb[4].mxu0 %v5868_v36 }
  0x46   : > { %5337 = vmatprep.mubr.msk.bf16.mxu0 %vm6091_vm0, %v6090_v38 }
  0x8f   : > { %v317_v43 = vpop.permute.xlu0 %316 }
  0x90   : > { %v327_v42 = vpop.permute.xlu1 %326 }
  0x93   : > { %v322_v45 = vpop.permute.xlu0 %321 }
  0x94   : > { %v332_v44 = vpop.permute.xlu1 %331 }
  0x97   : > { %v337_v53 = vpop.permute.xlu0 %336 }
  0x98   : > { %v342_v49 = vpop.permute.xlu1 %341 }
  0x9b   : > { %v347_v0 = vpop.permute.xlu0 %346 }
  0x9c   : > { %v352_v60 = vpop.permute.xlu1 %351 }
 0x110   : > { %v5287_v46 = vpop.f32.mrb[0].mxu0 }
 0x111   : > { %v412_v47 = vpop.f32.mrb[1].mxu0  ;;  %v421_v50 = vadd.f32 %v5287_v46, %v327_v42  ;;  %v5897_v42 = vld [vmem:[%s7183_s4 + $0xa0] sm:$0xff]   ;;  %v5899_v46 = vld [vmem:[%s7183_s4 + $0xa8] sm:$0xff]  }
 0x112   : > { %v5288_v48 = vpop.f32.mrb[2].mxu0  ;;  %v413_v54 = vadd.f32 %v412_v47, %v317_v43  ;;  %v5900_v47 = vld [vmem:[%s7183_s4 + $0x138] sm:$0xff]  }
 0x113   : > { %v424_v51 = vadd.f32 %v5288_v48, %v332_v44  ;;  %v415_v52 = vpop.f32.mrb[3].mxu0  ;;  %v5898_v44 = vld [vmem:[%s7183_s4 + $0x130] sm:$0xff]   ;;  %v5901_v48 = vld [vmem:[%s7183_s4 + $0xc0] sm:$0xff]  }
 0x114   : > { %v416_v55 = vadd.f32 %v415_v52, %v322_v45  ;;  %v5903_v52 = vld [vmem:[%s7183_s4 + $0xc8] sm:$0xff]  }
 0x115   : > { %v6259_v56 = vpack.c.bf16 %v424_v51, %v421_v50  ;;  %v5902_v50 = vld [vmem:[%s7183_s4 + $0x150] sm:$0xff]  }
 0x116   : > { %v6261_v57 = vpack.c.bf16 %v416_v55, %v413_v54  ;;  %v5905_v54 = vld [vmem:[%s7183_s4 + $0xe0] sm:$0xff]  }
 0x117   : > { %v6422_v45 = vshrl.u32 %v6259_v56, 16 }
 0x118   : > { %v5291_v59 = vpop.f32.mrb[4].mxu0  ;;  %v6267_v61 = vshrl.u32 %v6261_v57, 16  ;;  %v575_v18 = vrot.slane %v6261_v57, 1  ;;  %v699_v30 = vrot.slane %v6261_v57, 2  ;;  %v823_v36 = vrot.slane %v6261_v57, 3 }
 0x119   : > { %v428_v62 = vpop.f32.mrb[5].mxu0  ;;  %v437_v3 = vadd.f32 %v5291_v59, %v347_v0  ;;  %v947_v43 = vrot.slane %v6261_v57, 4  ;;  %v1630_v51 = vrot.slane %v6422_v45, 1  ;;  %v1195_v55 = vrot.slane %v6261_v57, 6  ;;  %v5910_v0 = vld [vmem:[%s7183_s4 + $0x190] sm:$0xff]  }
 0x11a   : > { %v5292_v1 = vpop.f32.mrb[6].mxu0  ;;  %5298 = vmatmul.mubr.msk.bf16.vlgmr.msra.gmra.mrb[0].mxu1 %vm471_vm1, %v6267_v61  ;;  %v761_v2 = vrot.slane %v6267_v61, 2  ;;  %v429_v7 = vadd.f32 %v428_v62, %v337_v53  ;;  %v885_v14 = vrot.slane %v6267_v61, 3  ;;  %v1009_v20 = vrot.slane %v6267_v61, 4  ;;  %v5904_v53 = vld [vmem:[%s7183_s4 + $0x158] sm:$0xff]   ;;  %v5909_v62 = vld [vmem:[%s7183_s4 + $0x100] sm:$0xff]  }
 0x11b   : > { %v440_v4 = vadd.f32 %v5292_v1, %v352_v60  ;;  %5302 = vmatpush3.bf16.msra.mxu1 %v5873_v58  ;;  %v431_v5 = vpop.f32.mrb[7].mxu0  ;;  %5305 = vmatprep.mubr.msk.bf16.mxu1 %vm6091_vm0, %v6090_v38  ;;  %v637_v24 = vrot.slane %v6267_v61, 1  ;;  %v1133_v26 = vrot.slane %v6267_v61, 5  ;;  %v1257_v32 = vrot.slane %v6267_v61, 6  ;;  %v5906_v58 = vld [vmem:[%s7183_s4 + $0x170] sm:$0xff]   ;;  %v5907_v60 = vld [vmem:[%s7183_s4 + $0xe8] sm:$0xff]  }
 0x11c   : > { %v432_v8 = vadd.f32 %v431_v5, %v342_v49  ;;  %5338 = vmatmul.mubr.msk.bf16.vlgmr.msra.gmra.mrb[8].mxu0 %vm471_vm1, %v761_v2  ;;  %5303 = vmatprep.subr.bf16.mxu1 %v6090_v38  ;;  %v1381_v39 = vrot.slane %v6267_v61, 7  ;;  %v1071_v49 = vrot.slane %v6261_v57, 5  ;;  %v1754_v59 = vrot.slane %v6422_v45, 2  ;;  %v5908_v61 = vld [vmem:[%s7183_s4 + $0x178] sm:$0xff]   ;;  %v5911_v2 = vld [vmem:[%s7183_s4 + $0x108] sm:$0xff]  }
 0x11d   : > { %v6282_v9 = vpack.c.bf16 %v440_v4, %v437_v3  ;;  %5350 = vmatpush3.bf16.msra.mxu0 %v5874_v63  ;;  %5353 = vmatprep.mubr.msk.bf16.mxu0 %vm6091_vm0, %v6090_v38  ;;  %v1319_v63 = vrot.slane %v6261_v57, 7  ;;  %v1878_v1 = vrot.slane %v6422_v45, 3  ;;  %v5913_v3 = vld [vmem:[%s7183_s4 + $0x120] sm:$0xff]   ;;  %v5914_v4 = vld [vmem:[%s7183_s4 + $0x1b0] sm:$0xff]   ;;  %v2002_v5 = vrot.slane %v6422_v45, 4 }
 0x11e   : > { %v6289_v11 = vpack.c.bf16 %v432_v8, %v429_v7  ;;  %5351 = vmatprep.subr.bf16.mxu0 %v6090_v38  ;;  %v5916_v7 = vld [vmem:[%s7183_s4 + $0x1b8] sm:$0xff]   ;;  %v5917_v8 = vld [vmem:[%s7183_s4 + $0x140] sm:$0xff]  }
 0x11f   : > { %5304 = vmatpush3.bf16.msra.mxu1 %v5875_v6  ;;  %v5915_v6 = vld [vmem:[%s7183_s4 + $0x128] sm:$0xff]  }
 0x120   : > { %5309 = vmatprep.subr.bf16.mxu1 %v6090_v38 }
 0x121   : > { %5352 = vmatpush3.bf16.msra.mxu0 %v5876_v10  ;;  %v1568_v10 = vrot.slane %v6259_v56, 1 }
 0x122   : > { %5306 = vmatmul.mubr.msk.bf16.vlgmr.msra.gmra.mrb[4].mxu1 %vm471_vm1, %v6261_v57  ;;  %5365 = vmatprep.subr.bf16.mxu0 %v6090_v38  ;;  %v5912_v57 = vld [vmem:[%s7183_s4 + $0x198] sm:$0xff]  }
 0x123   : > { %5310 = vmatpush3.bf16.msra.mxu1 %v5877_v12  ;;  %5313 = vmatprep.mubr.msk.bf16.mxu1 %vm6091_vm0, %v6090_v38  ;;  %v5918_v12 = vld [vmem:[%s7183_s4 + $0x1d0] sm:$0xff]  }
 0x124   : > { %5354 = vmatmul.mubr.msk.bf16.vlgmr.msra.gmra.mrb[12].mxu0 %vm471_vm1, %v885_v14  ;;  %5311 = vmatprep.subr.bf16.mxu1 %v6090_v38  ;;  %v5919_v14 = vld [vmem:[%s7183_s4 + $0x148] sm:$0xff]  }
 0x125   : > { %5366 = vmatpush3.bf16.msra.mxu0 %v5878_v13  ;;  %5369 = vmatprep.mubr.msk.bf16.mxu0 %vm6091_vm0, %v6090_v38  ;;  %v2126_v13 = vrot.slane %v6422_v45, 5 }
 0x126   : > { %5367 = vmatprep.subr.bf16.mxu0 %v6090_v38 }
 0x127   : > { %5312 = vmatpush3.bf16.msra.mxu1 %v5879_v15  ;;  %v5920_v15 = vld [vmem:[%s7183_s4 + $0x1d8] sm:$0xff]  }
 0x128   : > { %5317 = vmatprep.subr.bf16.mxu1 %v6090_v38 }
 0x129   : > { %5368 = vmatpush3.bf16.msra.mxu0 %v5880_v16  ;;  %v5921_v16 = vld [vmem:[%s7183_s4 + $0x160] sm:$0xff]  }
 0x12a   : > { %5314 = vmatmul.mubr.msk.bf16.vlgmr.msra.gmra.mrb[8].mxu1 %vm471_vm1, %v575_v18  ;;  %5381 = vmatprep.subr.bf16.mxu0 %v6090_v38  ;;  %v5922_v18 = vld [vmem:[%s7183_s4 + $0x1f0] sm:$0xff]  }
 0x12b   : > { %5318 = vmatpush3.bf16.msra.mxu1 %v5881_v17  ;;  %5321 = vmatprep.mubr.msk.bf16.mxu1 %vm6091_vm0, %v6090_v38  ;;  %v1692_v17 = vrot.slane %v6259_v56, 2 }
 0x12c   : > { %5370 = vmatmul.mubr.msk.bf16.vlgmr.msra.gmra.mrb[16].mxu0 %vm471_vm1, %v1009_v20  ;;  %5319 = vmatprep.subr.bf16.mxu1 %v6090_v38  ;;  %v5923_v20 = vld [vmem:[%s7183_s4 + $0x168] sm:$0xff]  }
 0x12d   : > { %5382 = vmatpush3.bf16.msra.mxu0 %v5882_v19  ;;  %5385 = vmatprep.mubr.msk.bf16.mxu0 %vm6091_vm0, %v6090_v38  ;;  %v2250_v19 = vrot.slane %v6422_v45, 6 }
 0x12e   : > { %5383 = vmatprep.subr.bf16.mxu0 %v6090_v38 }
 0x12f   : > { %5320 = vmatpush3.bf16.msra.mxu1 %v5883_v21  ;;  %v5924_v21 = vld [vmem:[%s7183_s4 + $0x1f8] sm:$0xff]  }
 0x130   : > { %5325 = vmatprep.subr.bf16.mxu1 %v6090_v38 }
 0x131   : > { %5384 = vmatpush3.bf16.msra.mxu0 %v5884_v22  ;;  %v5925_v22 = vld [vmem:[%s7183_s4 + $0x180] sm:$0xff]  }
 0x132   : > { %5322 = vmatmul.mubr.msk.bf16.vlgmr.msra.gmra.mrb[12].mxu1 %vm471_vm1, %v637_v24  ;;  %5397 = vmatprep.subr.bf16.mxu0 %v6090_v38  ;;  %v5926_v24 = vld [vmem:[%s7183_s4 + $0x210] sm:$0xff]  }
 0x133   : > { %5326 = vmatpush3.bf16.msra.mxu1 %v5885_v23  ;;  %5329 = vmatprep.mubr.msk.bf16.mxu1 %vm6091_vm0, %v6090_v38  ;;  %v1816_v23 = vrot.slane %v6259_v56, 3 }
 0x134   : > { %5386 = vmatmul.mubr.msk.bf16.vlgmr.msra.gmra.mrb[20].mxu0 %vm471_vm1, %v1133_v26  ;;  %5327 = vmatprep.subr.bf16.mxu1 %v6090_v38  ;;  %v5927_v26 = vld [vmem:[%s7183_s4 + $0x188] sm:$0xff]  }
 0x135   : > { %5398 = vmatpush3.bf16.msra.mxu0 %v5886_v25  ;;  %5401 = vmatprep.mubr.msk.bf16.mxu0 %vm6091_vm0, %v6090_v38  ;;  %v2374_v25 = vrot.slane %v6422_v45, 7 }
 0x136   : > { %5399 = vmatprep.subr.bf16.mxu0 %v6090_v38 }
 0x137   : > { %5328 = vmatpush3.bf16.msra.mxu1 %v5887_v27  ;;  %v5928_v27 = vld [vmem:[%s7183_s4 + $0x218] sm:$0xff]  }
 0x138   : > { %5341 = vmatprep.subr.bf16.mxu1 %v6090_v38 }
 0x139   : > { %5400 = vmatpush3.bf16.msra.mxu0 %v5888_v28  ;;  %v5929_v28 = vld [vmem:[%s7183_s4 + $0x1a0] sm:$0xff]  }
 0x13a   : > { %5330 = vmatmul.mubr.msk.bf16.vlgmr.msra.gmra.mrb[16].mxu1 %vm471_vm1, %v699_v30  ;;  %5413 = vmatprep.subr.bf16.mxu0 %v6090_v38  ;;  %v5930_v30 = vld [vmem:[%s7183_s4 + $0x230] sm:$0xff]  }
 0x13b   : > { %5342 = vmatpush3.bf16.msra.mxu1 %v5889_v29  ;;  %5345 = vmatprep.mubr.msk.bf16.mxu1 %vm6091_vm0, %v6090_v38  ;;  %v1940_v29 = vrot.slane %v6259_v56, 4 }
 0x13c   : > { %5402 = vmatmul.mubr.msk.bf16.vlgmr.msra.gmra.mrb[24].mxu0 %vm471_vm1, %v1257_v32  ;;  %5343 = vmatprep.subr.bf16.mxu1 %v6090_v38  ;;  %v5931_v32 = vld [vmem:[%s7183_s4 + $0x1a8] sm:$0xff]  }
 0x13d   : > { %5414 = vmatpush3.bf16.msra.mxu0 %v5890_v31  ;;  %5417 = vmatprep.mubr.msk.bf16.mxu0 %vm6091_vm0, %v6090_v38  ;;  %v6617_v31 = vshrl.u32 %v6289_v11, 16 }
 0x13e   : > { %5415 = vmatprep.subr.bf16.mxu0 %v6090_v38 }
 0x13f   : > { %5344 = vmatpush3.bf16.msra.mxu1 %v5891_v33  ;;  %v5932_v33 = vld [vmem:[%s7183_s4 + $0x238] sm:$0xff]  }
 0x140   : > { %5357 = vmatprep.subr.bf16.mxu1 %v6090_v38 }
 0x141   : > { %5416 = vmatpush3.bf16.msra.mxu0 %v5892_v34  ;;  %v5933_v34 = vld [vmem:[%s7183_s4 + $0x1c0] sm:$0xff]  }
 0x142   : > { %5346 = vmatmul.mubr.msk.bf16.vlgmr.msra.gmra.mrb[20].mxu1 %vm471_vm1, %v823_v36  ;;  %5429 = vmatprep.subr.bf16.mxu0 %v6090_v38  ;;  %v5934_v36 = vld [vmem:[%s7183_s4 + $0x250] sm:$0xff]  }
 0x143   : > { %5358 = vmatpush3.bf16.msra.mxu1 %v5893_v35  ;;  %5361 = vmatprep.mubr.msk.bf16.mxu1 %vm6091_vm0, %v6090_v38  ;;  %v2064_v35 = vrot.slane %v6259_v56, 5 }
 0x144   : > { %5418 = vmatmul.mubr.msk.bf16.vlgmr.msra.gmra.mrb[28].mxu0 %vm471_vm1, %v1381_v39  ;;  %5359 = vmatprep.subr.bf16.mxu1 %v6090_v38  ;;  %v5935_v39 = vld [vmem:[%s7183_s4 + $0x1c8] sm:$0xff]  }
 0x145   : > { %5430 = vmatpush3.bf16.msra.mxu0 %v5894_v37  ;;  %5433 = vmatprep.mubr.msk.bf16.mxu0 %vm6091_vm0, %v6090_v38  ;;  %v2623_v37 = vrot.slane %v6617_v31, 1 }
 0x146   : > { %5431 = vmatprep.subr.bf16.mxu0 %v6090_v38 }
 0x147   : > { %5360 = vmatpush3.bf16.msra.mxu1 %v5895_v40  ;;  %v5936_v40 = vld [vmem:[%s7183_s4 + $0x258] sm:$0xff]  }
 0x148   : > { %5373 = vmatprep.subr.bf16.mxu1 %v6090_v38 }
 0x149   : > { %5432 = vmatpush3.bf16.msra.mxu0 %v5896_v41  ;;  %v5937_v41 = vld [vmem:[%s7183_s4 + $0x1e0] sm:$0xff]  }
 0x14a   : > { %5362 = vmatmul.mubr.msk.bf16.vlgmr.msra.gmra.mrb[24].mxu1 %vm471_vm1, %v947_v43  ;;  %5445 = vmatprep.subr.bf16.mxu0 %v6090_v38  ;;  %v5938_v43 = vld [vmem:[%s7183_s4 + $0x270] sm:$0xff]  }
 0x14b   : > { %5374 = vmatpush3.bf16.msra.mxu1 %v5897_v42  ;;  %5377 = vmatprep.mubr.msk.bf16.mxu1 %vm6091_vm0, %v6090_v38  ;;  %v2188_v42 = vrot.slane %v6259_v56, 6 }
 0x14c   : > { %5434 = vmatmul.mubr.msk.bf16.vlgmr.msra.gmra.mrb[32].mxu0 %vm471_vm1, %v6422_v45  ;;  %5375 = vmatprep.subr.bf16.mxu1 %v6090_v38  ;;  %v5939_v45 = vld [vmem:[%s7183_s4 + $0x1e8] sm:$0xff]  }
 0x14d   : > { %5446 = vmatpush3.bf16.msra.mxu0 %v5898_v44  ;;  %5449 = vmatprep.mubr.msk.bf16.mxu0 %vm6091_vm0, %v6090_v38  ;;  %v2747_v44 = vrot.slane %v6617_v31, 2 }
 0x14e   : > { %5447 = vmatprep.subr.bf16.mxu0 %v6090_v38 }
 0x14f   : > { %5376 = vmatpush3.bf16.msra.mxu1 %v5899_v46  ;;  %v5940_v46 = vld [vmem:[%s7183_s4 + $0x278] sm:$0xff]  }
 0x150   : > { %5389 = vmatprep.subr.bf16.mxu1 %v6090_v38 }
 0x151   : > { %5448 = vmatpush3.bf16.msra.mxu0 %v5900_v47  ;;  %v5941_v47 = vld [vmem:[%s7183_s4 + $0x200] sm:$0xff]  }
 0x152   : > { %5378 = vmatmul.mubr.msk.bf16.vlgmr.msra.gmra.mrb[28].mxu1 %vm471_vm1, %v1071_v49  ;;  %5461 = vmatprep.subr.bf16.mxu0 %v6090_v38  ;;  %v5942_v49 = vld [vmem:[%s7183_s4 + $0x290] sm:$0xff]  }
 0x153   : > { %5390 = vmatpush3.bf16.msra.mxu1 %v5901_v48  ;;  %5393 = vmatprep.mubr.msk.bf16.mxu1 %vm6091_vm0, %v6090_v38  ;;  %v2312_v48 = vrot.slane %v6259_v56, 7 }
 0x154   : > { %5450 = vmatmul.mubr.msk.bf16.vlgmr.msra.gmra.mrb[36].mxu0 %vm471_vm1, %v1630_v51  ;;  %5391 = vmatprep.subr.bf16.mxu1 %v6090_v38  ;;  %v5943_v51 = vld [vmem:[%s7183_s4 + $0x208] sm:$0xff]  }
 0x155   : > { %5462 = vmatpush3.bf16.msra.mxu0 %v5902_v50  ;;  %5465 = vmatprep.mubr.msk.bf16.mxu0 %vm6091_vm0, %v6090_v38  ;;  %v2871_v50 = vrot.slane %v6617_v31, 3 }
 0x156   : > { %5463 = vmatprep.subr.bf16.mxu0 %v6090_v38 }
 0x157   : > { %5392 = vmatpush3.bf16.msra.mxu1 %v5903_v52  ;;  %v5945_v52 = vld [vmem:[%s7183_s4 + $0x220] sm:$0xff]  }
 0x158   : > { %5405 = vmatprep.subr.bf16.mxu1 %v6090_v38 }
 0x159   : > { %5464 = vmatpush3.bf16.msra.mxu0 %v5904_v53  ;;  %v5946_v53 = vld [vmem:[%s7183_s4 + $0x2b0] sm:$0xff]  }
 0x15a   : > { %5394 = vmatmul.mubr.msk.bf16.vlgmr.msra.gmra.mrb[32].mxu1 %vm471_vm1, %v1195_v55  ;;  %5477 = vmatprep.subr.bf16.mxu0 %v6090_v38  ;;  %v5947_v55 = vld [vmem:[%s7183_s4 + $0x228] sm:$0xff]  }
 0x15b   : > { %5406 = vmatpush3.bf16.msra.mxu1 %v5905_v54  ;;  %5409 = vmatprep.mubr.msk.bf16.mxu1 %vm6091_vm0, %v6090_v38  ;;  %v2995_v54 = vrot.slane %v6617_v31, 4 }
 0x15c   : > { %5466 = vmatmul.mubr.msk.bf16.vlgmr.msra.gmra.mrb[40].mxu0 %vm471_vm1, %v1754_v59  ;;  %5407 = vmatprep.subr.bf16.mxu1 %v6090_v38  ;;  %v5949_v59 = vld [vmem:[%s7183_s4 + $0x240] sm:$0xff]  }
 0x15d   : > { %5478 = vmatpush3.bf16.msra.mxu0 %v5906_v58  ;;  %5481 = vmatprep.mubr.msk.bf16.mxu0 %vm6091_vm0, %v6090_v38  ;;  %v5948_v58 = vld [vmem:[%s7183_s4 + $0x2b8] sm:$0xff]  }
 0x15e   : > { %5479 = vmatprep.subr.bf16.mxu0 %v6090_v38 }
 0x15f   : > { %5408 = vmatpush3.bf16.msra.mxu1 %v5907_v60  ;;  %v2561_v60 = vrot.slane %v6289_v11, 1 }
 0x160   : > { %5421 = vmatprep.subr.bf16.mxu1 %v6090_v38 }
 0x161   : > { %5480 = vmatpush3.bf16.msra.mxu0 %v5908_v61  ;;  %v5950_v61 = vld [vmem:[%s7183_s4 + $0x2d0] sm:$0xff]  }
 0x162   : > { %5410 = vmatmul.mubr.msk.bf16.vlgmr.msra.gmra.mrb[36].mxu1 %vm471_vm1, %v1319_v63  ;;  %5493 = vmatprep.subr.bf16.mxu0 %v6090_v38  ;;  %v5951_v63 = vld [vmem:[%s7183_s4 + $0x248] sm:$0xff]  }
 0x163   : > { %5422 = vmatpush3.bf16.msra.mxu1 %v5909_v62  ;;  %5425 = vmatprep.mubr.msk.bf16.mxu1 %vm6091_vm0, %v6090_v38  ;;  %v3119_v62 = vrot.slane %v6617_v31, 5 }
 0x164   : > { %5482 = vmatmul.mubr.msk.bf16.vlgmr.msra.gmra.mrb[44].mxu0 %vm471_vm1, %v1878_v1  ;;  %5423 = vmatprep.subr.bf16.mxu1 %v6090_v38  ;;  %v5953_v1 = vld [vmem:[%s7183_s4 + $0x260] sm:$0xff]  }
 0x165   : > { %5494 = vmatpush3.bf16.msra.mxu0 %v5910_v0  ;;  %5497 = vmatprep.mubr.msk.bf16.mxu0 %vm6091_vm0, %v6090_v38  ;;  %v5952_v0 = vld [vmem:[%s7183_s4 + $0x2d8] sm:$0xff]  }
 0x166   : > { %5495 = vmatprep.subr.bf16.mxu0 %v6090_v38 }
 0x167   : > { %5424 = vmatpush3.bf16.msra.mxu1 %v5911_v2  ;;  %v2685_v2 = vrot.slane %v6289_v11, 2 }
 0x168   : > { %5437 = vmatprep.subr.bf16.mxu1 %v6090_v38 }
 0x169   : > { %5496 = vmatpush3.bf16.msra.mxu0 %v5912_v57  ;;  %v5954_v57 = vld [vmem:[%s7183_s4 + $0x2f0] sm:$0xff]  }
 0x16a   : > { %5426 = vmatmul.mubr.msk.bf16.vlgmr.msra.gmra.mrb[40].mxu1 %vm471_vm1, %v6259_v56  ;;  %5509 = vmatprep.subr.bf16.mxu0 %v6090_v38  ;;  %v5944_v56 = vld [vmem:[%s7183_s4 + $0x298] sm:$0xff]  }
 0x16b   : > { %5438 = vmatpush3.bf16.msra.mxu1 %v5913_v3  ;;  %5441 = vmatprep.mubr.msk.bf16.mxu1 %vm6091_vm0, %v6090_v38  ;;  %v3243_v3 = vrot.slane %v6617_v31, 6 }
 0x16c   : > { %5498 = vmatmul.mubr.msk.bf16.vlgmr.msra.gmra.mrb[48].mxu0 %vm471_vm1, %v2002_v5  ;;  %5439 = vmatprep.subr.bf16.mxu1 %v6090_v38  ;;  %v5956_v5 = vld [vmem:[%s7183_s4 + $0x2f8] sm:$0xff]  }
 0x16d   : > { %5510 = vmatpush3.bf16.msra.mxu0 %v5914_v4  ;;  %5513 = vmatprep.mubr.msk.bf16.mxu0 %vm6091_vm0, %v6090_v38  ;;  %v5955_v4 = vld [vmem:[%s7183_s4 + $0x268] sm:$0xff]  }
 0x16e   : > { %5511 = vmatprep.subr.bf16.mxu0 %v6090_v38 }
 0x16f   : > { %5440 = vmatpush3.bf16.msra.mxu1 %v5915_v6  ;;  %v5957_v6 = vld [vmem:[%s7183_s4 + $0x280] sm:$0xff]  }
 0x170   : > { %5453 = vmatprep.subr.bf16.mxu1 %v6090_v38 }
 0x171   : > { %5512 = vmatpush3.bf16.msra.mxu0 %v5916_v7  ;;  %v2809_v7 = vrot.slane %v6289_v11, 3 }
 0x172   : > { %5442 = vmatmul.mubr.msk.bf16.vlgmr.msra.gmra.mrb[44].mxu1 %vm471_vm1, %v1568_v10  ;;  %5525 = vmatprep.subr.bf16.mxu0 %v6090_v38  ;;  %v3367_v10 = vrot.slane %v6617_v31, 7 }
 0x173   : > { %5454 = vmatpush3.bf16.msra.mxu1 %v5917_v8  ;;  %5457 = vmatprep.mubr.msk.bf16.mxu1 %vm6091_vm0, %v6090_v38  ;;  %v5958_v8 = vld [vmem:[%s7183_s4 + $0x310] sm:$0xff]  }
 0x174   : > { %5514 = vmatmul.mubr.msk.bf16.vlgmr.msra.gmra.mrb[52].mxu0 %vm471_vm1, %v2126_v13  ;;  %5455 = vmatprep.subr.bf16.mxu1 %v6090_v38  ;;  %v5960_v13 = vld [vmem:[%s7183_s4 + $0x318] sm:$0xff]  }
 0x175   : > { %5526 = vmatpush3.bf16.msra.mxu0 %v5918_v12  ;;  %5529 = vmatprep.mubr.msk.bf16.mxu0 %vm6091_vm0, %v6090_v38  ;;  %v5959_v12 = vld [vmem:[%s7183_s4 + $0x288] sm:$0xff]  }
 0x176   : > { %5527 = vmatprep.subr.bf16.mxu0 %v6090_v38 }
 0x177   : > { %5456 = vmatpush3.bf16.msra.mxu1 %v5919_v14  ;;  %v5961_v14 = vld [vmem:[%s7183_s4 + $0x2a0] sm:$0xff]  }
 0x178   : > { %5469 = vmatprep.subr.bf16.mxu1 %v6090_v38 }
 0x179   : > { %5528 = vmatpush3.bf16.msra.mxu0 %v5920_v15  ;;  %v2933_v15 = vrot.slane %v6289_v11, 4 }
 0x17a   : > { %5458 = vmatmul.mubr.msk.bf16.vlgmr.msra.gmra.mrb[48].mxu1 %vm471_vm1, %v1692_v17  ;;  %5541 = vmatprep.subr.bf16.mxu0 %v6090_v38  ;;  %v6812_v17 = vshrl.u32 %v6282_v9, 16 }
 0x17b   : > { %5470 = vmatpush3.bf16.msra.mxu1 %v5921_v16  ;;  %5473 = vmatprep.mubr.msk.bf16.mxu1 %vm6091_vm0, %v6090_v38  ;;  %v5962_v16 = vld [vmem:[%s7183_s4 + $0x330] sm:$0xff]  }
 0x17c   : > { %5530 = vmatmul.mubr.msk.bf16.vlgmr.msra.gmra.mrb[56].mxu0 %vm471_vm1, %v2250_v19  ;;  %5471 = vmatprep.subr.bf16.mxu1 %v6090_v38  ;;  %v5964_v19 = vld [vmem:[%s7183_s4 + $0x338] sm:$0xff]  }
 0x17d   : > { %5542 = vmatpush3.bf16.msra.mxu0 %v5922_v18  ;;  %5545 = vmatprep.mubr.msk.bf16.mxu0 %vm6091_vm0, %v6090_v38  ;;  %v5963_v18 = vld [vmem:[%s7183_s4 + $0x2a8] sm:$0xff]  }
 0x17e   : > { %5543 = vmatprep.subr.bf16.mxu0 %v6090_v38 }
 0x17f   : > { %5472 = vmatpush3.bf16.msra.mxu1 %v5923_v20  ;;  %v5965_v20 = vld [vmem:[%s7183_s4 + $0x2c0] sm:$0xff]  }
 0x180   : > { %5485 = vmatprep.subr.bf16.mxu1 %v6090_v38 }
 0x181   : > { %5544 = vmatpush3.bf16.msra.mxu0 %v5924_v21  ;;  %v3057_v21 = vrot.slane %v6289_v11, 5 }
 0x182   : > { %5474 = vmatmul.mubr.msk.bf16.vlgmr.msra.gmra.mrb[52].mxu1 %vm471_vm1, %v1816_v23  ;;  %5557 = vmatprep.subr.bf16.mxu0 %v6090_v38  ;;  %v3616_v23 = vrot.slane %v6812_v17, 1 }
 0x183   : > { %5486 = vmatpush3.bf16.msra.mxu1 %v5925_v22  ;;  %5489 = vmatprep.mubr.msk.bf16.mxu1 %vm6091_vm0, %v6090_v38  ;;  %v5966_v22 = vld [vmem:[%s7183_s4 + $0x350] sm:$0xff]  }
 0x184   : > { %5546 = vmatmul.mubr.msk.bf16.vlgmr.msra.gmra.mrb[60].mxu0 %vm471_vm1, %v2374_v25  ;;  %5487 = vmatprep.subr.bf16.mxu1 %v6090_v38  ;;  %v5968_v25 = vld [vmem:[%s7183_s4 + $0x358] sm:$0xff]  }
 0x185   : > { %5558 = vmatpush3.bf16.msra.mxu0 %v5926_v24  ;;  %5561 = vmatprep.mubr.msk.bf16.mxu0 %vm6091_vm0, %v6090_v38  ;;  %v5967_v24 = vld [vmem:[%s7183_s4 + $0x2c8] sm:$0xff]  }
 0x186   : > { %5559 = vmatprep.subr.bf16.mxu0 %v6090_v38 }
 0x187   : > { %5488 = vmatpush3.bf16.msra.mxu1 %v5927_v26  ;;  %v5969_v26 = vld [vmem:[%s7183_s4 + $0x2e0] sm:$0xff]  }
 0x188   : > { %5501 = vmatprep.subr.bf16.mxu1 %v6090_v38 }
 0x189   : > { %5560 = vmatpush3.bf16.msra.mxu0 %v5928_v27  ;;  %v3181_v27 = vrot.slane %v6289_v11, 6 }
 0x18a   : > { %5490 = vmatmul.mubr.msk.bf16.vlgmr.msra.gmra.mrb[56].mxu1 %vm471_vm1, %v1940_v29  ;;  %5573 = vmatprep.subr.bf16.mxu0 %v6090_v38  ;;  %v3740_v29 = vrot.slane %v6812_v17, 2 }
 0x18b   : > { %5502 = vmatpush3.bf16.msra.mxu1 %v5929_v28  ;;  %5505 = vmatprep.mubr.msk.bf16.mxu1 %vm6091_vm0, %v6090_v38  ;;  %v5970_v28 = vld [vmem:[%s7183_s4 + $0x370] sm:$0xff]  }
 0x18c   : > { %5562 = vmatmul.mubr.msk.bf16.vlgmr.msra.gmra.mrb[64].mxu0 %vm471_vm1, %v6617_v31  ;;  %5503 = vmatprep.subr.bf16.mxu1 %v6090_v38  ;;  %v5972_v31 = vld [vmem:[%s7183_s4 + $0x378] sm:$0xff]  }
 0x18d   : > { %5574 = vmatpush3.bf16.msra.mxu0 %v5930_v30  ;;  %5577 = vmatprep.mubr.msk.bf16.mxu0 %vm6091_vm0, %v6090_v38  ;;  %v5971_v30 = vld [vmem:[%s7183_s4 + $0x2e8] sm:$0xff]  }
 0x18e   : > { %5575 = vmatprep.subr.bf16.mxu0 %v6090_v38 }
 0x18f   : > { %5504 = vmatpush3.bf16.msra.mxu1 %v5931_v32  ;;  %v5973_v32 = vld [vmem:[%s7183_s4 + $0x300] sm:$0xff]  }
 0x190   : > { %5517 = vmatprep.subr.bf16.mxu1 %v6090_v38 }
 0x191   : > { %5576 = vmatpush3.bf16.msra.mxu0 %v5932_v33  ;;  %v3305_v33 = vrot.slane %v6289_v11, 7 }
 0x192   : > { %5506 = vmatmul.mubr.msk.bf16.vlgmr.msra.gmra.mrb[60].mxu1 %vm471_vm1, %v2064_v35  ;;  %5589 = vmatprep.subr.bf16.mxu0 %v6090_v38  ;;  %v3864_v35 = vrot.slane %v6812_v17, 3 }
 0x193   : > { %5518 = vmatpush3.bf16.msra.mxu1 %v5933_v34  ;;  %5521 = vmatprep.mubr.msk.bf16.mxu1 %vm6091_vm0, %v6090_v38  ;;  %v5974_v34 = vld [vmem:[%s7183_s4 + $0x390] sm:$0xff]  }
 0x194   : > { %5578 = vmatmul.mubr.msk.bf16.vlgmr.msra.gmra.mrb[68].mxu0 %vm471_vm1, %v2623_v37  ;;  %5519 = vmatprep.subr.bf16.mxu1 %v6090_v38  ;;  %v5977_v37 = vld [vmem:[%s7183_s4 + $0x320] sm:$0xff]  }
 0x195   : > { %5590 = vmatpush3.bf16.msra.mxu0 %v5934_v36  ;;  %5593 = vmatprep.mubr.msk.bf16.mxu0 %vm6091_vm0, %v6090_v38  ;;  %v5975_v36 = vld [vmem:[%s7183_s4 + $0x308] sm:$0xff]  }
 0x196   : > { %5591 = vmatprep.subr.bf16.mxu0 %v6090_v38 }
 0x197   : > { %5520 = vmatpush3.bf16.msra.mxu1 %v5935_v39  ;;  %v5978_v39 = vld [vmem:[%s7183_s4 + $0x3b0] sm:$0xff]  }
 0x198   : > { %5533 = vmatprep.subr.bf16.mxu1 %v6090_v38 }
 0x199   : > { %5592 = vmatpush3.bf16.msra.mxu0 %v5936_v40  ;;  %v3988_v40 = vrot.slane %v6812_v17, 4 }
 0x19a   : > { %5522 = vmatmul.mubr.msk.bf16.vlgmr.msra.gmra.mrb[64].mxu1 %vm471_vm1, %v2188_v42  ;;  %5605 = vmatprep.subr.bf16.mxu0 %v6090_v38 }
 0x19b   : > { %5534 = vmatpush3.bf16.msra.mxu1 %v5937_v41  ;;  %5537 = vmatprep.mubr.msk.bf16.mxu1 %vm6091_vm0, %v6090_v38  ;;  %v5979_v41 = vld [vmem:[%s7183_s4 + $0x328] sm:$0xff]  }
 0x19c   : > { %5594 = vmatmul.mubr.msk.bf16.vlgmr.msra.gmra.mrb[72].mxu0 %vm471_vm1, %v2747_v44  ;;  %5535 = vmatprep.subr.bf16.mxu1 %v6090_v38 }
 0x19d   : > { %5606 = vmatpush3.bf16.msra.mxu0 %v5938_v43  ;;  %5609 = vmatprep.mubr.msk.bf16.mxu0 %vm6091_vm0, %v6090_v38  ;;  %v5980_v43 = vld [vmem:[%s7183_s4 + $0x3b8] sm:$0xff]  }
 0x19e   : > { %5607 = vmatprep.subr.bf16.mxu0 %v6090_v38 }
 0x19f   : > { %5536 = vmatpush3.bf16.msra.mxu1 %v5939_v45 }
 0x1a0   : > { %5549 = vmatprep.subr.bf16.mxu1 %v6090_v38 }
 0x1a1   : > { %5608 = vmatpush3.bf16.msra.mxu0 %v5940_v46 }
 0x1a2   : > { %5538 = vmatmul.mubr.msk.bf16.vlgmr.msra.gmra.mrb[68].mxu1 %vm471_vm1, %v2312_v48  ;;  %5621 = vmatprep.subr.bf16.mxu0 %v6090_v38 }
 0x1a3   : > { %5550 = vmatpush3.bf16.msra.mxu1 %v5941_v47  ;;  %5553 = vmatprep.mubr.msk.bf16.mxu1 %vm6091_vm0, %v6090_v38  ;;  %v5981_v47 = vld [vmem:[%s7183_s4 + $0x340] sm:$0xff]  }
 0x1a4   : > { %5610 = vmatmul.mubr.msk.bf16.vlgmr.msra.gmra.mrb[76].mxu0 %vm471_vm1, %v2871_v50  ;;  %5551 = vmatprep.subr.bf16.mxu1 %v6090_v38  ;;  %v3554_v50 = vrot.slane %v6282_v9, 1 }
 0x1a5   : > { %5622 = vmatpush3.bf16.msra.mxu0 %v5942_v49  ;;  %5625 = vmatprep.mubr.msk.bf16.mxu0 %vm6091_vm0, %v6090_v38 }
 0x1a6   : > { %5623 = vmatprep.subr.bf16.mxu0 %v6090_v38 }
 0x1a7   : > { %5552 = vmatpush3.bf16.msra.mxu1 %v5943_v51 }
 0x1a8   : > { %5565 = vmatprep.subr.bf16.mxu1 %v6090_v38 }
 0x1a9   : > { %5624 = vmatpush3.bf16.msra.mxu0 %v5944_v56  ;;  %v5982_v56 = vld [vmem:[%s7183_s4 + $0x3d0] sm:$0xff]  }
 0x1aa   : > { %5554 = vmatmul.mubr.msk.bf16.vlgmr.msra.gmra.mrb[72].mxu1 %vm471_vm1, %v6289_v11  ;;  %5637 = vmatprep.subr.bf16.mxu0 %v6090_v38  ;;  %v5976_v11 = vld [vmem:[%s7183_s4 + $0x398] sm:$0xff]  }
 0x1ab   : > { %5566 = vmatpush3.bf16.msra.mxu1 %v5945_v52  ;;  %5569 = vmatprep.mubr.msk.bf16.mxu1 %vm6091_vm0, %v6090_v38 }
 0x1ac   : > { %5626 = vmatmul.mubr.msk.bf16.vlgmr.msra.gmra.mrb[80].mxu0 %vm471_vm1, %v2995_v54  ;;  %5567 = vmatprep.subr.bf16.mxu1 %v6090_v38  ;;  %v5983_v54 = vld [vmem:[%s7183_s4 + $0x348] sm:$0xff]  }
 0x1ad   : > { %5638 = vmatpush3.bf16.msra.mxu0 %v5946_v53  ;;  %5641 = vmatprep.mubr.msk.bf16.mxu0 %vm6091_vm0, %v6090_v38  ;;  %v4112_v53 = vrot.slane %v6812_v17, 5 }
 0x1ae   : > { %5639 = vmatprep.subr.bf16.mxu0 %v6090_v38 }
 0x1af   : > { %5568 = vmatpush3.bf16.msra.mxu1 %v5947_v55 }
 0x1b0   : > { %5581 = vmatprep.subr.bf16.mxu1 %v6090_v38 }
 0x1b1   : > { %5640 = vmatpush3.bf16.msra.mxu0 %v5948_v58  ;;  %v5984_v58 = vld [vmem:[%s7183_s4 + $0x3d8] sm:$0xff]  }
 0x1b2   : > { %5570 = vmatmul.mubr.msk.bf16.vlgmr.msra.gmra.mrb[76].mxu1 %vm471_vm1, %v2561_v60  ;;  %5653 = vmatprep.subr.bf16.mxu0 %v6090_v38 }
 0x1b3   : > { %5582 = vmatpush3.bf16.msra.mxu1 %v5949_v59  ;;  %5585 = vmatprep.mubr.msk.bf16.mxu1 %vm6091_vm0, %v6090_v38 }
 0x1b4   : > { %5642 = vmatmul.mubr.msk.bf16.vlgmr.msra.gmra.mrb[84].mxu0 %vm471_vm1, %v3119_v62  ;;  %5583 = vmatprep.subr.bf16.mxu1 %v6090_v38 }
 0x1b5   : > { %5654 = vmatpush3.bf16.msra.mxu0 %v5950_v61  ;;  %5657 = vmatprep.mubr.msk.bf16.mxu0 %vm6091_vm0, %v6090_v38 }
 0x1b6   : > { %5655 = vmatprep.subr.bf16.mxu0 %v6090_v38 }
 0x1b7   : > { %5584 = vmatpush3.bf16.msra.mxu1 %v5951_v63  ;;  %v5985_v63 = vld [vmem:[%s7183_s4 + $0x360] sm:$0xff]  }
 0x1b8   : > { %5597 = vmatprep.subr.bf16.mxu1 %v6090_v38 }
 0x1b9   : > { %5656 = vmatpush3.bf16.msra.mxu0 %v5952_v0 }
 0x1ba   : > { %5586 = vmatmul.mubr.msk.bf16.vlgmr.msra.gmra.mrb[80].mxu1 %vm471_vm1, %v2685_v2  ;;  %5669 = vmatprep.subr.bf16.mxu0 %v6090_v38  ;;  %v3678_v2 = vrot.slane %v6282_v9, 2 }
 0x1bb   : > { %5598 = vmatpush3.bf16.msra.mxu1 %v5953_v1  ;;  %5601 = vmatprep.mubr.msk.bf16.mxu1 %vm6091_vm0, %v6090_v38 }
 0x1bc   : > { %5658 = vmatmul.mubr.msk.bf16.vlgmr.msra.gmra.mrb[88].mxu0 %vm471_vm1, %v3243_v3  ;;  %5599 = vmatprep.subr.bf16.mxu1 %v6090_v38  ;;  %v5986_v3 = vld [vmem:[%s7183_s4 + $0x3f0] sm:$0xff]  }
 0x1bd   : > { %5670 = vmatpush3.bf16.msra.mxu0 %v5954_v57  ;;  %5673 = vmatprep.mubr.msk.bf16.mxu0 %vm6091_vm0, %v6090_v38 }
 0x1be   : > { %5671 = vmatprep.subr.bf16.mxu0 %v6090_v38 }
 0x1bf   : > { %5600 = vmatpush3.bf16.msra.mxu1 %v5955_v4 }
 0x1c0   : > { %5613 = vmatprep.subr.bf16.mxu1 %v6090_v38 }
 0x1c1   : > { %5672 = vmatpush3.bf16.msra.mxu0 %v5956_v5  ;;  %v4236_v5 = vrot.slane %v6812_v17, 6 }
 0x1c2   : > { %5602 = vmatmul.mubr.msk.bf16.vlgmr.msra.gmra.mrb[84].mxu1 %vm471_vm1, %v2809_v7  ;;  %5685 = vmatprep.subr.bf16.mxu0 %v6090_v38 }
 0x1c3   : > { %5614 = vmatpush3.bf16.msra.mxu1 %v5957_v6  ;;  %5617 = vmatprep.mubr.msk.bf16.mxu1 %vm6091_vm0, %v6090_v38  ;;  %v5987_v6 = vld [vmem:[%s7183_s4 + $0x368] sm:$0xff]  }
 0x1c4   : > { %5674 = vmatmul.mubr.msk.bf16.vlgmr.msra.gmra.mrb[92].mxu0 %vm471_vm1, %v3367_v10  ;;  %5615 = vmatprep.subr.bf16.mxu1 %v6090_v38 }
 0x1c5   : > { %5686 = vmatpush3.bf16.msra.mxu0 %v5958_v8  ;;  %5689 = vmatprep.mubr.msk.bf16.mxu0 %vm6091_vm0, %v6090_v38  ;;  %v5988_v8 = vld [vmem:[%s7183_s4 + $0x3f8] sm:$0xff]  }
 0x1c6   : > { %5687 = vmatprep.subr.bf16.mxu0 %v6090_v38 }
 0x1c7   : > { %5616 = vmatpush3.bf16.msra.mxu1 %v5959_v12 }
 0x1c8   : > { %5629 = vmatprep.subr.bf16.mxu1 %v6090_v38 }
 0x1c9   : > { %5688 = vmatpush3.bf16.msra.mxu0 %v5960_v13 }
 0x1ca   : > { %5618 = vmatmul.mubr.msk.bf16.vlgmr.msra.gmra.mrb[88].mxu1 %vm471_vm1, %v2933_v15  ;;  %5701 = vmatprep.subr.bf16.mxu0 %v6090_v38  ;;  %v5989_v15 = vld [vmem:[%s7183_s4 + $0x380] sm:$0xff]  }
 0x1cb   : > { %5630 = vmatpush3.bf16.msra.mxu1 %v5961_v14  ;;  %5633 = vmatprep.mubr.msk.bf16.mxu1 %vm6091_vm0, %v6090_v38 }
 0x1cc   : > { %5690 = vmatmul.mubr.msk.bf16.vlgmr.msra.gmra.mrb[96].mxu0 %vm471_vm1, %v6812_v17  ;;  %5631 = vmatprep.subr.bf16.mxu1 %v6090_v38 }
 0x1cd   : > { %5702 = vmatpush3.bf16.msra.mxu0 %v5962_v16  ;;  %5705 = vmatprep.mubr.msk.bf16.mxu0 %vm6091_vm0, %v6090_v38 }
 0x1ce   : > { %5703 = vmatprep.subr.bf16.mxu0 %v6090_v38 }
 0x1cf   : > { %5632 = vmatpush3.bf16.msra.mxu1 %v5963_v18 }
 0x1d0   : > { %5645 = vmatprep.subr.bf16.mxu1 %v6090_v38 }
 0x1d1   : > { %5704 = vmatpush3.bf16.msra.mxu0 %v5964_v19  ;;  %v3802_v19 = vrot.slane %v6282_v9, 3 }
 0x1d2   : > { %5634 = vmatmul.mubr.msk.bf16.vlgmr.msra.gmra.mrb[92].mxu1 %vm471_vm1, %v3057_v21  ;;  %5717 = vmatprep.subr.bf16.mxu0 %v6090_v38 }
 0x1d3   : > { %5646 = vmatpush3.bf16.msra.mxu1 %v5965_v20  ;;  %5649 = vmatprep.mubr.msk.bf16.mxu1 %vm6091_vm0, %v6090_v38 }
 0x1d4   : > { %5706 = vmatmul.mubr.msk.bf16.vlgmr.msra.gmra.mrb[100].mxu0 %vm471_vm1, %v3616_v23  ;;  %5647 = vmatprep.subr.bf16.mxu1 %v6090_v38  ;;  %v5990_v23 = vld [vmem:[%s7183_s4 + $0x388] sm:$0xff]  }
 0x1d5   : > { %5718 = vmatpush3.bf16.msra.mxu0 %v5966_v22  ;;  %5721 = vmatprep.mubr.msk.bf16.mxu0 %vm6091_vm0, %v6090_v38  ;;  %v4360_v22 = vrot.slane %v6812_v17, 7  ;;  %v5991_v17 = vld [vmem:[%s7183_s4 + $0x3a0] sm:$0xff]  }
 0x1d6   : > { %5719 = vmatprep.subr.bf16.mxu0 %v6090_v38 }
 0x1d7   : > { %5648 = vmatpush3.bf16.msra.mxu1 %v5967_v24 }
 0x1d8   : > { %5661 = vmatprep.subr.bf16.mxu1 %v6090_v38 }
 0x1d9   : > { %5720 = vmatpush3.bf16.msra.mxu0 %v5968_v25 }
 0x1da   : > { %5650 = vmatmul.mubr.msk.bf16.vlgmr.msra.gmra.mrb[96].mxu1 %vm471_vm1, %v3181_v27  ;;  %5733 = vmatprep.subr.bf16.mxu0 %v6090_v38 }
 0x1db   : > { %5662 = vmatpush3.bf16.msra.mxu1 %v5969_v26  ;;  %5665 = vmatprep.mubr.msk.bf16.mxu1 %vm6091_vm0, %v6090_v38 }
 0x1dc   : > { %5722 = vmatmul.mubr.msk.bf16.vlgmr.msra.gmra.mrb[104].mxu0 %vm471_vm1, %v3740_v29  ;;  %5663 = vmatprep.subr.bf16.mxu1 %v6090_v38 }
 0x1dd   : > { %5734 = vmatpush3.bf16.msra.mxu0 %v5970_v28  ;;  %5737 = vmatprep.mubr.msk.bf16.mxu0 %vm6091_vm0, %v6090_v38 }
 0x1de   : > { %5735 = vmatprep.subr.bf16.mxu0 %v6090_v38 }
 0x1df   : > { %5664 = vmatpush3.bf16.msra.mxu1 %v5971_v30 }
 0x1e0   : > { %5677 = vmatprep.subr.bf16.mxu1 %v6090_v38 }
 0x1e1   : > { %5736 = vmatpush3.bf16.msra.mxu0 %v5972_v31  ;;  %v3926_v31 = vrot.slane %v6282_v9, 4 }
 0x1e2   : > { %5666 = vmatmul.mubr.msk.bf16.vlgmr.msra.gmra.mrb[100].mxu1 %vm471_vm1, %v3305_v33  ;;  %5749 = vmatprep.subr.bf16.mxu0 %v6090_v38 }
 0x1e3   : > { %5678 = vmatpush3.bf16.msra.mxu1 %v5973_v32  ;;  %5681 = vmatprep.mubr.msk.bf16.mxu1 %vm6091_vm0, %v6090_v38 }
 0x1e4   : > { %5738 = vmatmul.mubr.msk.bf16.vlgmr.msra.gmra.mrb[108].mxu0 %vm471_vm1, %v3864_v35  ;;  %5679 = vmatprep.subr.bf16.mxu1 %v6090_v38 }
 0x1e5   : > { %5750 = vmatpush3.bf16.msra.mxu0 %v5974_v34  ;;  %5753 = vmatprep.mubr.msk.bf16.mxu0 %vm6091_vm0, %v6090_v38  ;;  %v5992_v34 = vld [vmem:[%s7183_s4 + $0x3a8] sm:$0xff]  }
 0x1e6   : > { %5751 = vmatprep.subr.bf16.mxu0 %v6090_v38 }
 0x1e7   : > { %5680 = vmatpush3.bf16.msra.mxu1 %v5975_v36 }
 0x1e8   : > { %5693 = vmatprep.subr.bf16.mxu1 %v6090_v38 }
 0x1e9   : > { %5752 = vmatpush3.bf16.msra.mxu0 %v5976_v11 }
 0x1ea   : > { %5682 = vmatmul.mubr.msk.bf16.vlgmr.msra.gmra.mrb[104].mxu1 %vm471_vm1, %v6282_v9  ;;  %5765 = vmatprep.subr.bf16.mxu0 %v6090_v38 }
 0x1eb   : > { %5694 = vmatpush3.bf16.msra.mxu1 %v5977_v37  ;;  %5697 = vmatprep.mubr.msk.bf16.mxu1 %vm6091_vm0, %v6090_v38 }
 0x1ec   : > { %5754 = vmatmul.mubr.msk.bf16.vlgmr.msra.gmra.mrb[112].mxu0 %vm471_vm1, %v3988_v40  ;;  %5695 = vmatprep.subr.bf16.mxu1 %v6090_v38  ;;  %v5993_v40 = vld [vmem:[%s7183_s4 + $0x3c0] sm:$0xff]  }
 0x1ed   : > { %v509_v42 = vpop.f32.mrb[0].mxu1  ;;  %5766 = vmatpush3.bf16.msra.mxu0 %v5978_v39  ;;  %5769 = vmatprep.mubr.msk.bf16.mxu0 %vm6091_vm0, %v6090_v38 }
 0x1ee   : > { %v5299_v44 = vpop.f32.mrb[1].mxu1  ;;  %5767 = vmatprep.subr.bf16.mxu0 %v6090_v38 }
 0x1ef   : > { %5696 = vmatpush3.bf16.msra.mxu1 %v5979_v41  ;;  %v512_v45 = vpop.f32.mrb[2].mxu1  ;;  %v6925_v46 = vpop.f32.mrb[8].mxu0 }
 0x1f0   : > { %v5300_v48 = vpop.f32.mrb[3].mxu1  ;;  %v5339_v49 = vpop.f32.mrb[9].mxu0  ;;  %5709 = vmatprep.subr.bf16.mxu1 %v6090_v38 }
 0x1f1   : > { %v814_v51 = vpop.f32.mrb[10].mxu0  ;;  %5768 = vmatpush3.bf16.msra.mxu0 %v5980_v43  ;;  %v4050_v43 = vrot.slane %v6282_v9, 5  ;;  %v5994_v48 = vld [vmem:[%s7183_s4 + $0x3c8] sm:$0xff]  }
 0x1f2   : > { %v5340_v52 = vpop.f32.mrb[11].mxu0  ;;  %5698 = vmatmul.mubr.msk.bf16.vlgmr.msra.gmra.mrb[108].mxu1 %vm471_vm1, %v3554_v50  ;;  %5781 = vmatprep.subr.bf16.mxu0 %v6090_v38 }
 0x1f3   : > { %5710 = vmatpush3.bf16.msra.mxu1 %v5981_v47  ;;  %5713 = vmatprep.mubr.msk.bf16.mxu1 %vm6091_vm0, %v6090_v38  ;;  %v5995_v52 = vld [vmem:[%s7183_s4 + $0x3e0] sm:$0xff]  }
 0x1f4   : > { %5770 = vmatmul.mubr.msk.bf16.vlgmr.msra.gmra.mrb[116].mxu0 %vm471_vm1, %v4112_v53  ;;  %5711 = vmatprep.subr.bf16.mxu1 %v6090_v38 }
 0x1f5   : > { %v563_v55 = vpop.f32.mrb[4].mxu1  ;;  %5782 = vmatpush3.bf16.msra.mxu0 %v5982_v56  ;;  %5785 = vmatprep.mubr.msk.bf16.mxu0 %vm6091_vm0, %v6090_v38 }
 0x1f6   : > { %v564_v59 = vadd.f32 %v563_v55, %v509_v42  ;;  %v5307_v60 = vpop.f32.mrb[5].mxu1  ;;  %5783 = vmatprep.subr.bf16.mxu0 %v6090_v38  ;;  %v4174_v55 = vrot.slane %v6282_v9, 6 }
 0x1f7   : > { %5712 = vmatpush3.bf16.msra.mxu1 %v5983_v54  ;;  %v566_v61 = vpop.f32.mrb[6].mxu1  ;;  %v6951_v62 = vpop.f32.mrb[12].mxu0 }
 0x1f8   : > { %v5308_v0 = vpop.f32.mrb[7].mxu1  ;;  %v5355_v1 = vpop.f32.mrb[13].mxu0  ;;  %5725 = vmatprep.subr.bf16.mxu1 %v6090_v38  ;;  %v5996_v61 = vld [vmem:[%s7183_s4 + $0x3e8] sm:$0xff]  }
 0x1f9   : > { %v938_v57 = vpop.f32.mrb[14].mxu0  ;;  %5784 = vmatpush3.bf16.msra.mxu0 %v5984_v58 }
 0x1fa   : > { %v5356_v4 = vpop.f32.mrb[15].mxu0  ;;  %5714 = vmatmul.mubr.msk.bf16.vlgmr.msra.gmra.mrb[112].mxu1 %vm471_vm1, %v3678_v2  ;;  %5797 = vmatprep.subr.bf16.mxu0 %v6090_v38 }
 0x1fb   : > { %5726 = vmatpush3.bf16.msra.mxu1 %v5985_v63  ;;  %5729 = vmatprep.mubr.msk.bf16.mxu1 %vm6091_vm0, %v6090_v38  ;;  %v4298_v4 = vrot.slane %v6282_v9, 7 }
 0x1fc   : > { %5786 = vmatmul.mubr.msk.bf16.vlgmr.msra.gmra.mrb[120].mxu0 %vm471_vm1, %v4236_v5  ;;  %5727 = vmatprep.subr.bf16.mxu1 %v6090_v38 }
 0x1fd   : > { %v625_v7 = vpop.f32.mrb[8].mxu1  ;;  %5798 = vmatpush3.bf16.msra.mxu0 %v5986_v3  ;;  %5801 = vmatprep.mubr.msk.bf16.mxu0 %vm6091_vm0, %v6090_v38 }
 0x1fe   : > { %v631_v10 = vadd.f32 %v625_v7, %v564_v59  ;;  %v5315_v12 = vpop.f32.mrb[9].mxu1  ;;  %5799 = vmatprep.subr.bf16.mxu0 %v6090_v38 }
 0x1ff   : > { %5728 = vmatpush3.bf16.msra.mxu1 %v5987_v6  ;;  %v628_v13 = vpop.f32.mrb[10].mxu1  ;;  %v6977_v14 = vpop.f32.mrb[16].mxu0 }
 0x200   : > { %v5316_v16 = vpop.f32.mrb[11].mxu1  ;;  %v5371_v18 = vpop.f32.mrb[17].mxu0  ;;  %5741 = vmatprep.subr.bf16.mxu1 %v6090_v38 }
 0x201   : > { %v1062_v20 = vpop.f32.mrb[18].mxu0  ;;  %5800 = vmatpush3.bf16.msra.mxu0 %v5988_v8 }
 0x202   : > { %v5372_v21 = vpop.f32.mrb[19].mxu0  ;;  %5730 = vmatmul.mubr.msk.bf16.vlgmr.msra.gmra.mrb[116].mxu1 %vm471_vm1, %v3802_v19 }
 0x203   : > { %5742 = vmatpush3.bf16.msra.mxu1 %v5989_v15  ;;  %5745 = vmatprep.mubr.msk.bf16.mxu1 %vm6091_vm0, %v6090_v38 }
 0x204   : > { %5802 = vmatmul.mubr.msk.bf16.vlgmr.msra.gmra.mrb[124].mxu0 %vm471_vm1, %v4360_v22  ;;  %5743 = vmatprep.subr.bf16.mxu1 %v6090_v38 }
 0x205   : > { %v687_v24 = vpop.f32.mrb[12].mxu1 }
 0x206   : > { %v693_v25 = vadd.f32 %v687_v24, %v631_v10  ;;  %v5323_v26 = vpop.f32.mrb[13].mxu1 }
 0x207   : > { %5744 = vmatpush3.bf16.msra.mxu1 %v5990_v23  ;;  %v690_v27 = vpop.f32.mrb[14].mxu1  ;;  %v6993_v28 = vpop.f32.mrb[20].mxu0 }
 0x208   : > { %v5324_v29 = vpop.f32.mrb[15].mxu1  ;;  %v5387_v30 = vpop.f32.mrb[21].mxu0  ;;  %5757 = vmatprep.subr.bf16.mxu1 %v6090_v38 }
 0x209   : > { %v1186_v32 = vpop.f32.mrb[22].mxu0 }
 0x20a   : > { %v5388_v33 = vpop.f32.mrb[23].mxu0  ;;  %5746 = vmatmul.mubr.msk.bf16.vlgmr.msra.gmra.mrb[120].mxu1 %vm471_vm1, %v3926_v31 }
 0x20b   : > { %5758 = vmatpush3.bf16.msra.mxu1 %v5991_v17  ;;  %5761 = vmatprep.mubr.msk.bf16.mxu1 %vm6091_vm0, %v6090_v38 }
 0x20c   : > { %5759 = vmatprep.subr.bf16.mxu1 %v6090_v38 }
 0x20d   : > { %v749_v35 = vpop.f32.mrb[16].mxu1 }
 0x20e   : > { %v755_v36 = vadd.f32 %v749_v35, %v693_v25  ;;  %v5331_v11 = vpop.f32.mrb[17].mxu1 }
 0x20f   : > { %5760 = vmatpush3.bf16.msra.mxu1 %v5992_v34  ;;  %v752_v37 = vpop.f32.mrb[18].mxu1  ;;  %v7007_v39 = vpop.f32.mrb[24].mxu0 }
 0x210   : > { %v5332_v41 = vpop.f32.mrb[19].mxu1  ;;  %v5403_v42 = vpop.f32.mrb[25].mxu0  ;;  %5773 = vmatprep.subr.bf16.mxu1 %v6090_v38  ;;  %v817_v44 = vadd.f32 %v6925_v46, %v755_v36 }
 0x211   : > { %v1310_v45 = vpop.f32.mrb[26].mxu0 }
 0x212   : > { %v5404_v47 = vpop.f32.mrb[27].mxu0  ;;  %5762 = vmatmul.mubr.msk.bf16.vlgmr.msra.gmra.mrb[124].mxu1 %vm471_vm1, %v4050_v43 }
 0x213   : > { %5774 = vmatpush3.bf16.msra.mxu1 %v5993_v40  ;;  %5777 = vmatprep.mubr.msk.bf16.mxu1 %vm6091_vm0, %v6090_v38 }
 0x214   : > { %5775 = vmatprep.subr.bf16.mxu1 %v6090_v38 }
 0x215   : > { %v873_v49 = vpop.f32.mrb[20].mxu1 }
 0x216   : > { %v879_v50 = vadd.f32 %v873_v49, %v817_v44  ;;  %v5347_v51 = vpop.f32.mrb[21].mxu1 }
 0x217   : > { %5776 = vmatpush3.bf16.msra.mxu1 %v5994_v48  ;;  %v876_v56 = vpop.f32.mrb[22].mxu1  ;;  %v1431_v46 = vpop.f32.mrb[28].mxu0 }
 0x218   : > { %v5348_v53 = vpop.f32.mrb[23].mxu1  ;;  %v5419_v54 = vpop.f32.mrb[29].mxu0  ;;  %5789 = vmatprep.subr.bf16.mxu1 %v6090_v38  ;;  %v941_v58 = vadd.f32 %v6951_v62, %v879_v50 }
 0x219   : > { %v1434_v59 = vpop.f32.mrb[30].mxu0 }
 0x21a   : > { %v5420_v60 = vpop.f32.mrb[31].mxu0  ;;  %5778 = vmatmul.mubr.msk.bf16.vlgmr.msra.gmra.mrb[128].mxu1 %vm471_vm1, %v4174_v55 }
 0x21b   : > { %5790 = vmatpush3.bf16.msra.mxu1 %v5995_v52  ;;  %5793 = vmatprep.mubr.msk.bf16.mxu1 %vm6091_vm0, %v6090_v38 }
 0x21c   : > { %5791 = vmatprep.subr.bf16.mxu1 %v6090_v38 }
 0x21d   : > { %v997_v63 = vpop.f32.mrb[24].mxu1 }
 0x21e   : > { %v1003_v0 = vadd.f32 %v997_v63, %v941_v58  ;;  %v5363_v1 = vpop.f32.mrb[25].mxu1 }
 0x21f   : > { %5792 = vmatpush3.bf16.msra.mxu1 %v5996_v61  ;;  %v1000_v2 = vpop.f32.mrb[26].mxu1  ;;  %v1555_v62 = vpop.f32.mrb[32].mxu0 }
 0x220   : > { %v5364_v57 = vpop.f32.mrb[27].mxu1  ;;  %v5435_v3 = vpop.f32.mrb[33].mxu0  ;;  %v1065_v5 = vadd.f32 %v6977_v14, %v1003_v0 }
 0x221   : > { %v1558_v6 = vpop.f32.mrb[34].mxu0 }
 0x222   : > { %v5436_v7 = vpop.f32.mrb[35].mxu0  ;;  %5794 = vmatmul.mubr.msk.bf16.vlgmr.msra.gmra.mrb[132].mxu1 %vm471_vm1, %v4298_v4 }
 0x225   : > { %v1121_v8 = vpop.f32.mrb[28].mxu1 }
 0x226   : > { %v1127_v10 = vadd.f32 %v1121_v8, %v1065_v5  ;;  %v5379_v12 = vpop.f32.mrb[29].mxu1 }
 0x227   : > { %v1124_v13 = vpop.f32.mrb[30].mxu1  ;;  %v1680_v15 = vpop.f32.mrb[36].mxu0 }
 0x228   : > { %v5380_v16 = vpop.f32.mrb[31].mxu1  ;;  %v5451_v18 = vpop.f32.mrb[37].mxu0  ;;  %v1189_v19 = vadd.f32 %v6993_v28, %v1127_v10 }
 0x229   : > { %v1683_v20 = vpop.f32.mrb[38].mxu0 }
 0x22a   : > { %v5452_v21 = vpop.f32.mrb[39].mxu0 }
 0x22d   : > { %v1245_v22 = vpop.f32.mrb[32].mxu1 }
 0x22e   : > { %v1251_v23 = vadd.f32 %v1245_v22, %v1189_v19  ;;  %v5395_v9 = vpop.f32.mrb[33].mxu1 }
 0x22f   : > { %v1248_v24 = vpop.f32.mrb[34].mxu1  ;;  %v1804_v14 = vpop.f32.mrb[40].mxu0 }
 0x230   : > { %v5396_v25 = vpop.f32.mrb[35].mxu1  ;;  %v5467_v26 = vpop.f32.mrb[41].mxu0  ;;  %v1313_v27 = vadd.f32 %v7007_v39, %v1251_v23 }
 0x231   : > { %v1807_v17 = vpop.f32.mrb[42].mxu0 }
 0x232   : > { %v5468_v29 = vpop.f32.mrb[43].mxu0 }
 0x235   : > { %v1369_v30 = vpop.f32.mrb[36].mxu1 }
 0x236   : > { %v1375_v31 = vadd.f32 %v1369_v30, %v1313_v27  ;;  %v5411_v32 = vpop.f32.mrb[37].mxu1 }
 0x237   : > { %v1372_v33 = vpop.f32.mrb[38].mxu1  ;;  %v1928_v34 = vpop.f32.mrb[44].mxu0 }
 0x238   : > { %v5412_v35 = vpop.f32.mrb[39].mxu1  ;;  %v5483_v28 = vpop.f32.mrb[45].mxu0  ;;  %v1437_v36 = vadd.f32 %v1431_v46, %v1375_v31 }
 0x239   : > { %v1931_v11 = vpop.f32.mrb[46].mxu0 }
 0x23a   : > { %v5484_v37 = vpop.f32.mrb[47].mxu0 }
 0x23d   : > { %v1492_v40 = vpop.f32.mrb[40].mxu1 }
 0x23e   : > { %v1498_v41 = vadd.f32 %v1492_v40, %v1437_v36  ;;  %v5427_v42 = vpop.f32.mrb[41].mxu1 }
 0x23f   : > { %v1495_v43 = vpop.f32.mrb[42].mxu1  ;;  %v2052_v44 = vpop.f32.mrb[48].mxu0 }
 0x240   : > { %v5428_v45 = vpop.f32.mrb[43].mxu1  ;;  %v5499_v47 = vpop.f32.mrb[49].mxu0  ;;  %v1561_v39 = vadd.f32 %v1555_v62, %v1498_v41 }
 0x241   : > { %v2055_v48 = vpop.f32.mrb[50].mxu0 }
 0x242   : > { %v5500_v49 = vpop.f32.mrb[51].mxu0 }
 0x245   : > { %v1618_v50 = vpop.f32.mrb[44].mxu1 }
 0x246   : > { %v1624_v51 = vadd.f32 %v1618_v50, %v1561_v39  ;;  %v5443_v56 = vpop.f32.mrb[45].mxu1 }
 0x247   : > { %v1621_v52 = vpop.f32.mrb[46].mxu1  ;;  %v2176_v53 = vpop.f32.mrb[52].mxu0 }
 0x248   : > { %v5444_v54 = vpop.f32.mrb[47].mxu1  ;;  %v5515_v55 = vpop.f32.mrb[53].mxu0  ;;  %v1686_v46 = vadd.f32 %v1680_v15, %v1624_v51 }
 0x249   : > { %v2179_v58 = vpop.f32.mrb[54].mxu0 }
 0x24a   : > { %v5516_v59 = vpop.f32.mrb[55].mxu0 }
 0x24d   : > { %v1742_v60 = vpop.f32.mrb[48].mxu1 }
 0x24e   : > { %v1748_v61 = vadd.f32 %v1742_v60, %v1686_v46  ;;  %v5459_v63 = vpop.f32.mrb[49].mxu1 }
 0x24f   : > { %v1745_v0 = vpop.f32.mrb[50].mxu1  ;;  %v2300_v1 = vpop.f32.mrb[56].mxu0 }
 0x250   : > { %v5460_v2 = vpop.f32.mrb[51].mxu1  ;;  %v5531_v57 = vpop.f32.mrb[57].mxu0  ;;  %v1810_v62 = vadd.f32 %v1804_v14, %v1748_v61 }
 0x251   : > { %v2303_v3 = vpop.f32.mrb[58].mxu0 }
 0x252   : > { %v5532_v4 = vpop.f32.mrb[59].mxu0 }
 0x255   : > { %v1866_v5 = vpop.f32.mrb[52].mxu1 }
 0x256   : > { %v1872_v6 = vadd.f32 %v1866_v5, %v1810_v62  ;;  %v5475_v7 = vpop.f32.mrb[53].mxu1 }
 0x257   : > { %v1869_v8 = vpop.f32.mrb[54].mxu1  ;;  %v2424_v10 = vpop.f32.mrb[60].mxu0 }
 0x258   : > { %v5476_v12 = vpop.f32.mrb[55].mxu1  ;;  %v5547_v13 = vpop.f32.mrb[61].mxu0  ;;  %v1934_v15 = vadd.f32 %v1928_v34, %v1872_v6 }
 0x259   : > { %v2427_v16 = vpop.f32.mrb[62].mxu0 }
 0x25a   : > { %v5548_v18 = vpop.f32.mrb[63].mxu0 }
 0x25d   : > { %v1990_v19 = vpop.f32.mrb[56].mxu1 }
 0x25e   : > { %v1996_v20 = vadd.f32 %v1990_v19, %v1934_v15  ;;  %v5491_v21 = vpop.f32.mrb[57].mxu1 }
 0x25f   : > { %v1993_v22 = vpop.f32.mrb[58].mxu1  ;;  %v2548_v23 = vpop.f32.mrb[64].mxu0 }
 0x260   : > { %v5492_v9 = vpop.f32.mrb[59].mxu1  ;;  %v5563_v24 = vpop.f32.mrb[65].mxu0  ;;  %v2058_v14 = vadd.f32 %v2052_v44, %v1996_v20 }
 0x261   : > { %v2551_v25 = vpop.f32.mrb[66].mxu0 }
 0x262   : > { %v5564_v26 = vpop.f32.mrb[67].mxu0 }
 0x265   : > { %v2114_v27 = vpop.f32.mrb[60].mxu1 }
 0x266   : > { %v2120_v17 = vadd.f32 %v2114_v27, %v2058_v14  ;;  %v5507_v29 = vpop.f32.mrb[61].mxu1 }
 0x267   : > { %v2117_v30 = vpop.f32.mrb[62].mxu1  ;;  %v2673_v31 = vpop.f32.mrb[68].mxu0 }
 0x268   : > { %v5508_v32 = vpop.f32.mrb[63].mxu1  ;;  %v5579_v33 = vpop.f32.mrb[69].mxu0  ;;  %v2182_v34 = vadd.f32 %v2176_v53, %v2120_v17 }
 0x269   : > { %v2676_v35 = vpop.f32.mrb[70].mxu0 }
 0x26a   : > { %v5580_v28 = vpop.f32.mrb[71].mxu0 }
 0x26d   : > { %v2238_v36 = vpop.f32.mrb[64].mxu1 }
 0x26e   : > { %v2244_v11 = vadd.f32 %v2238_v36, %v2182_v34  ;;  %v5523_v37 = vpop.f32.mrb[65].mxu1 }
 0x26f   : > { %v2241_v40 = vpop.f32.mrb[66].mxu1  ;;  %v2797_v41 = vpop.f32.mrb[72].mxu0 }
 0x270   : > { %v5524_v42 = vpop.f32.mrb[67].mxu1  ;;  %v5595_v43 = vpop.f32.mrb[73].mxu0  ;;  %v2306_v44 = vadd.f32 %v2300_v1, %v2244_v11 }
 0x271   : > { %v2800_v45 = vpop.f32.mrb[74].mxu0 }
 0x272   : > { %v5596_v47 = vpop.f32.mrb[75].mxu0 }
 0x275   : > { %v2362_v39 = vpop.f32.mrb[68].mxu1 }
 0x276   : > { %v2368_v48 = vadd.f32 %v2362_v39, %v2306_v44  ;;  %v5539_v49 = vpop.f32.mrb[69].mxu1 }
 0x277   : > { %v2365_v50 = vpop.f32.mrb[70].mxu1  ;;  %v2921_v51 = vpop.f32.mrb[76].mxu0 }
 0x278   : > { %v5540_v56 = vpop.f32.mrb[71].mxu1  ;;  %v5611_v52 = vpop.f32.mrb[77].mxu0  ;;  %v2430_v53 = vadd.f32 %v2424_v10, %v2368_v48 }
 0x279   : > { %v2924_v54 = vpop.f32.mrb[78].mxu0 }
 0x27a   : > { %v5612_v55 = vpop.f32.mrb[79].mxu0 }
 0x27d   : > { %v2485_v46 = vpop.f32.mrb[72].mxu1 }
 0x27e   : > { %v2491_v58 = vadd.f32 %v2485_v46, %v2430_v53  ;;  %v5555_v59 = vpop.f32.mrb[73].mxu1 }
 0x27f   : > { %v2488_v60 = vpop.f32.mrb[74].mxu1  ;;  %v3045_v61 = vpop.f32.mrb[80].mxu0 }
 0x280   : > { %v5556_v63 = vpop.f32.mrb[75].mxu1  ;;  %v5627_v0 = vpop.f32.mrb[81].mxu0  ;;  %v2554_v1 = vadd.f32 %v2548_v23, %v2491_v58 }
 0x281   : > { %v3048_v38 = vpop.f32.mrb[82].mxu0 }
 0x282   : > { %v5628_v2 = vpop.f32.mrb[83].mxu0 }
 0x285   : > { %v2611_v57 = vpop.f32.mrb[76].mxu1 }
 0x286   : > { %v2617_v62 = vadd.f32 %v2611_v57, %v2554_v1  ;;  %v5571_v3 = vpop.f32.mrb[77].mxu1 }
 0x287   : > { %v2614_v4 = vpop.f32.mrb[78].mxu1  ;;  %v3169_v5 = vpop.f32.mrb[84].mxu0 }
 0x288   : > { %v5572_v6 = vpop.f32.mrb[79].mxu1  ;;  %v5643_v7 = vpop.f32.mrb[85].mxu0  ;;  %v2679_v8 = vadd.f32 %v2673_v31, %v2617_v62 }
 0x289   : > { %v3172_v10 = vpop.f32.mrb[86].mxu0 }
 0x28a   : > { %v5644_v12 = vpop.f32.mrb[87].mxu0 }
 0x28d   : > { %v2735_v13 = vpop.f32.mrb[80].mxu1 }
 0x28e   : > { %v2741_v15 = vadd.f32 %v2735_v13, %v2679_v8  ;;  %v5587_v16 = vpop.f32.mrb[81].mxu1 }
 0x28f   : > { %v2738_v18 = vpop.f32.mrb[82].mxu1  ;;  %v3293_v19 = vpop.f32.mrb[88].mxu0 }
 0x290   : > { %v5588_v20 = vpop.f32.mrb[83].mxu1  ;;  %v5659_v21 = vpop.f32.mrb[89].mxu0  ;;  %v2803_v22 = vadd.f32 %v2797_v41, %v2741_v15 }
 0x291   : > { %v3296_v23 = vpop.f32.mrb[90].mxu0 }
 0x292   : > { %v5660_v9 = vpop.f32.mrb[91].mxu0 }
 0x295   : > { %v2859_v24 = vpop.f32.mrb[84].mxu1 }
 0x296   : > { %v2865_v14 = vadd.f32 %v2859_v24, %v2803_v22  ;;  %v5603_v25 = vpop.f32.mrb[85].mxu1 }
 0x297   : > { %v2862_v26 = vpop.f32.mrb[86].mxu1  ;;  %v3417_v27 = vpop.f32.mrb[92].mxu0 }
 0x298   : > { %v5604_v17 = vpop.f32.mrb[87].mxu1  ;;  %v5675_v29 = vpop.f32.mrb[93].mxu0  ;;  %v2927_v30 = vadd.f32 %v2921_v51, %v2865_v14 }
 0x299   : > { %v3420_v31 = vpop.f32.mrb[94].mxu0 }
 0x29a   : > { %v5676_v32 = vpop.f32.mrb[95].mxu0 }
 0x29d   : > { %v2983_v33 = vpop.f32.mrb[88].mxu1 }
 0x29e   : > { %v2989_v34 = vadd.f32 %v2983_v33, %v2927_v30  ;;  %v5619_v35 = vpop.f32.mrb[89].mxu1 }
 0x29f   : > { %v2986_v28 = vpop.f32.mrb[90].mxu1  ;;  %v3541_v36 = vpop.f32.mrb[96].mxu0 }
 0x2a0   : > { %v5620_v11 = vpop.f32.mrb[91].mxu1  ;;  %v5691_v37 = vpop.f32.mrb[97].mxu0  ;;  %v3051_v40 = vadd.f32 %v3045_v61, %v2989_v34 }
 0x2a1   : > { %v3544_v41 = vpop.f32.mrb[98].mxu0 }
 0x2a2   : > { %v5692_v42 = vpop.f32.mrb[99].mxu0 }
 0x2a5   : > { %v3107_v43 = vpop.f32.mrb[92].mxu1 }
 0x2a6   : > { %v3113_v44 = vadd.f32 %v3107_v43, %v3051_v40  ;;  %v5635_v45 = vpop.f32.mrb[93].mxu1 }
 0x2a7   : > { %v3110_v47 = vpop.f32.mrb[94].mxu1  ;;  %v3666_v39 = vpop.f32.mrb[100].mxu0 }
 0x2a8   : > { %v5636_v48 = vpop.f32.mrb[95].mxu1  ;;  %v5707_v49 = vpop.f32.mrb[101].mxu0  ;;  %v3175_v50 = vadd.f32 %v3169_v5, %v3113_v44 }
 0x2a9   : > { %v3669_v51 = vpop.f32.mrb[102].mxu0 }
 0x2aa   : > { %v5708_v56 = vpop.f32.mrb[103].mxu0 }
 0x2ad   : > { %v3231_v52 = vpop.f32.mrb[96].mxu1 }
 0x2ae   : > { %v3237_v53 = vadd.f32 %v3231_v52, %v3175_v50  ;;  %v5651_v54 = vpop.f32.mrb[97].mxu1 }
 0x2af   : > { %v3234_v55 = vpop.f32.mrb[98].mxu1  ;;  %v3790_v46 = vpop.f32.mrb[104].mxu0 }
 0x2b0   : > { %v5652_v58 = vpop.f32.mrb[99].mxu1  ;;  %v5723_v59 = vpop.f32.mrb[105].mxu0  ;;  %v3299_v60 = vadd.f32 %v3293_v19, %v3237_v53 }
 0x2b1   : > { %v3793_v61 = vpop.f32.mrb[106].mxu0 }
 0x2b2   : > { %v5724_v63 = vpop.f32.mrb[107].mxu0 }
 0x2b5   : > { %v3355_v0 = vpop.f32.mrb[100].mxu1 }
 0x2b6   : > { %v3361_v1 = vadd.f32 %v3355_v0, %v3299_v60  ;;  %v5667_v38 = vpop.f32.mrb[101].mxu1 }
 0x2b7   : > { %v3358_v2 = vpop.f32.mrb[102].mxu1  ;;  %v3914_v57 = vpop.f32.mrb[108].mxu0 }
 0x2b8   : > { %v5668_v62 = vpop.f32.mrb[103].mxu1  ;;  %v5739_v3 = vpop.f32.mrb[109].mxu0  ;;  %v3423_v4 = vadd.f32 %v3417_v27, %v3361_v1 }
 0x2b9   : > { %v3917_v5 = vpop.f32.mrb[110].mxu0 }
 0x2ba   : > { %v5740_v6 = vpop.f32.mrb[111].mxu0 }
 0x2bb   : > { %v4427_v6 = vlaneseq }
 0x2bd   : > { %v3478_v7 = vpop.f32.mrb[104].mxu1 }
 0x2be   : > { %v3484_v8 = vadd.f32 %v3478_v7, %v3423_v4  ;;  %v5683_v10 = vpop.f32.mrb[105].mxu1  ;;  %v4417_v4 = vld [vmem:[#allocation2] sm:$0x1] }
 0x2bf   : > { %v3481_v12 = vpop.f32.mrb[106].mxu1  ;;  %v4038_v13 = vpop.f32.mrb[112].mxu0 }
 0x2c0   : > { %v5684_v15 = vpop.f32.mrb[107].mxu1  ;;  %v5755_v16 = vpop.f32.mrb[113].mxu0  ;;  %v3547_v18 = vadd.f32 %v3541_v36, %v3484_v8  ;;  %v4428_v12 = vand.u32 127, %v4427_v6 }
 0x2c1   : > { %v4041_v19 = vpop.f32.mrb[114].mxu0 }
 0x2c2   : > { %v5756_v20 = vpop.f32.mrb[115].mxu0  ;;  %vm4437_vm3 = vcmp.ge.s32.totalorder %v4428_v12, 14  ;;  %vm4438_vm4 = vcmp.lt.s32.totalorder %v4428_v12, 20  ;;  %vm4429_vm5 = vcmp.ge.s32.totalorder %v4428_v12, 4  ;;  %vm4430_vm6 = vcmp.lt.s32.totalorder %v4428_v12, 10 }
 0x2c3   : > { %vm4461_vm7 = vcmp.ge.s32.totalorder %v4428_v12, 44  ;;  %vm4462_vm8 = vcmp.lt.s32.totalorder %v4428_v12, 50  ;;  %vm7046_vm9 = vmand %vm4437_vm3, %vm4438_vm4  ;;  %vm4445_vm10 = vcmp.ge.s32.totalorder %v4428_v12, 24  ;;  %vm4446_vm11 = vcmp.lt.s32.totalorder %v4428_v12, 30 }
 0x2c4   : > { %vm7050_vm12 = vmand %vm4429_vm5, %vm4430_vm6  ;;  %vm4453_vm15 = vcmp.ge.s32.totalorder %v4428_v12, 34  ;;  %vm4454_vm0 = vcmp.lt.s32.totalorder %v4428_v12, 40 }
 0x2c5   : > { %v3604_v21 = vpop.f32.mrb[108].mxu1  ;;  %vm7056_vm13 = vmand %vm4461_vm7, %vm4462_vm8 }
 0x2c6   : > { %v3610_v22 = vadd.f32 %v3604_v21, %v3547_v18  ;;  %v5699_v23 = vpop.f32.mrb[109].mxu1  ;;  %vm7060_vm14 = vmand %vm4445_vm10, %vm4446_vm11 }
 0x2c7   : > { %v3607_v9 = vpop.f32.mrb[110].mxu1  ;;  %v4162_v24 = vpop.f32.mrb[116].mxu0  ;;  %vm7078_vm1 = vmand %vm4453_vm15, %vm4454_vm0 }
 0x2c8   : > { %v5700_v14 = vpop.f32.mrb[111].mxu1  ;;  %v5771_v25 = vpop.f32.mrb[117].mxu0  ;;  %v3672_v26 = vadd.f32 %v3666_v39, %v3610_v22 }
 0x2c9   : > { %v4165_v27 = vpop.f32.mrb[118].mxu0 }
 0x2ca   : > { %v5772_v17 = vpop.f32.mrb[119].mxu0 }
 0x2cd   : > { %v3728_v29 = vpop.f32.mrb[112].mxu1 }
 0x2ce   : > { %v3734_v30 = vadd.f32 %v3728_v29, %v3672_v26  ;;  %v5715_v31 = vpop.f32.mrb[113].mxu1 }
 0x2cf   : > { %v3731_v32 = vpop.f32.mrb[114].mxu1  ;;  %v4286_v33 = vpop.f32.mrb[120].mxu0 }
 0x2d0   : > { %v5716_v34 = vpop.f32.mrb[115].mxu1  ;;  %v5787_v35 = vpop.f32.mrb[121].mxu0  ;;  %v3796_v28 = vadd.f32 %v3790_v46, %v3734_v30 }
 0x2d1   : > { %v4289_v36 = vpop.f32.mrb[122].mxu0 }
 0x2d2   : > { %v5788_v11 = vpop.f32.mrb[123].mxu0 }
 0x2d5   : > { %v3852_v37 = vpop.f32.mrb[116].mxu1 }
 0x2d6   : > { %v3858_v40 = vadd.f32 %v3852_v37, %v3796_v28  ;;  %v5731_v41 = vpop.f32.mrb[117].mxu1 }
 0x2d7   : > { %v3855_v42 = vpop.f32.mrb[118].mxu1  ;;  %v4410_v43 = vpop.f32.mrb[124].mxu0 }
 0x2d8   : > { %v5732_v44 = vpop.f32.mrb[119].mxu1  ;;  %v5803_v45 = vpop.f32.mrb[125].mxu0  ;;  %v3920_v47 = vadd.f32 %v3914_v57, %v3858_v40 }
 0x2d9   : > { %v4413_v39 = vpop.f32.mrb[126].mxu0 }
 0x2da   : > { %v5804_v48 = vpop.f32.mrb[127].mxu0 }
 0x2dd   : > { %v3976_v49 = vpop.f32.mrb[120].mxu1 }
 0x2de   : > { %v3982_v50 = vadd.f32 %v3976_v49, %v3920_v47  ;;  %v5747_v51 = vpop.f32.mrb[121].mxu1 }
 0x2df   : > { %v3979_v56 = vpop.f32.mrb[122].mxu1 }
 0x2e0   : > { %v5748_v52 = vpop.f32.mrb[123].mxu1  ;;  %v4044_v53 = vadd.f32 %v4038_v13, %v3982_v50  ;;  %v4425_v13 = vld [vmem:[%s7181_s2] sm:$0x1] }
 0x2e5   : > { %v4100_v54 = vpop.f32.mrb[124].mxu1 }
 0x2e6   : > { %v4106_v55 = vadd.f32 %v4100_v54, %v4044_v53  ;;  %v5763_v46 = vpop.f32.mrb[125].mxu1 }
 0x2e7   : > { %v4103_v58 = vpop.f32.mrb[126].mxu1 }
 0x2e8   : > { %v5764_v59 = vpop.f32.mrb[127].mxu1  ;;  %v4168_v60 = vadd.f32 %v4162_v24, %v4106_v55 }
 0x2ed   : > { %v4224_v61 = vpop.f32.mrb[128].mxu1 }
 0x2ee   : > { %v4230_v63 = vadd.f32 %v4224_v61, %v4168_v60  ;;  %v5779_v0 = vpop.f32.mrb[129].mxu1 }
 0x2ef   : > { %v4227_v1 = vpop.f32.mrb[130].mxu1 }
 0x2f0   : > { %v5780_v38 = vpop.f32.mrb[131].mxu1  ;;  %v4292_v2 = vadd.f32 %v4286_v33, %v4230_v63 }
 0x2f5   : > { %v4348_v57 = vpop.f32.mrb[132].mxu1 }
 0x2f6   : > { %v4354_v62 = vadd.f32 %v4348_v57, %v4292_v2  ;;  %v5795_v3 = vpop.f32.mrb[133].mxu1 }
 0x2f7   : > { %v4351_v5 = vpop.f32.mrb[134].mxu1 }
 0x2f8   : > { %v4416_v7 = vadd.f32 %v4410_v43, %v4354_v62  ;;  %v5796_v8 = vpop.f32.mrb[135].mxu1 }
 0x2fa   : > { %v4418_v10 = vadd.f32 %v4417_v4, %v4416_v7 }
 0x2fc   : > { %4420 = vst.msk [vmem:[#allocation2] sm:$0x1] %vm272_vm2, %v4418_v10 }
 0x303   : > { %v4424_v16 = vld [vmem:[#allocation2] sm:$0x1] }
 0x304   : > { %v7054_v19 = vadd.f32 %v4425_v13, %v4424_v16 }
 0x306   : > { %v4440_v22 = vsel %vm7046_vm9, %v7054_v19, -inf  ;;  %v4432_v23 = vsel %vm7050_vm12, %v7054_v19, -inf  ;;  %v4464_v14 = vsel %vm7056_vm13, %v7054_v19, -inf  ;;  %v4448_v25 = vsel %vm7060_vm14, %v7054_v19, -inf }
 0x307   : > { %v4441_v9 = vsel %vm272_vm2, %v4440_v22, -inf  ;;  %v4433_v24 = vsel %vm272_vm2, %v4432_v23, -inf  ;;  %v4465_v27 = vsel %vm272_vm2, %v4464_v14, -inf  ;;  %v4449_v17 = vsel %vm272_vm2, %v4448_v25, -inf }
 0x308   : > { %4442 = vmax.xlane.f32.xlu1 %v4441_v9  ;;  %4434 = vmax.xlane.f32.xlu0 %v4433_v24  ;;  %v4456_v29 = vsel %vm7078_vm1, %v7054_v19, -inf }
 0x309   : > { %v4457_v30 = vsel %vm272_vm2, %v4456_v29, -inf }
 0x30c   : > { %4466 = vmax.xlane.f32.xlu1 %v4465_v27  ;;  %4450 = vmax.xlane.f32.xlu0 %v4449_v17 }
 0x310   : > { %4458 = vmax.xlane.f32.xlu0 %v4457_v30 }
 0x395   : > { %v4435_v31 = vpop.xlane.xlu0 %4434  ;;  %v4443_v32 = vpop.xlane.xlu1 %4442 }
 0x396   : > { %v4436_v33 = vsel %vm7050_vm12, %v4435_v31, %v7054_v19 }
 0x397   : > { %v4444_v35 = vsel %vm7046_vm9, %v4443_v32, %v4436_v33 }
 0x399   : > { %v4451_v34 = vpop.xlane.xlu0 %4450  ;;  %v4467_v11 = vpop.xlane.xlu1 %4466 }
 0x39a   : > { %v4452_v28 = vsel %vm7060_vm14, %v4451_v34, %v4444_v35 }
 0x39d   : > { %v4459_v36 = vpop.xlane.xlu0 %4458 }
 0x39e   : > { %v4460_v37 = vsel %vm7078_vm1, %v4459_v36, %v4452_v28 }
 0x39f   : > { %v4468_v40 = vsel %vm7056_vm13, %v4467_v11, %v4460_v37 }
 0x3a0   : > { %v4469_v41 = vsub.f32 %v7054_v19, %v4468_v40 }
 0x3a2   : > { %v4470_v42 = vmul.f32 1.442695, %v4469_v41 }
 0x3a4   : > { %5997 = vpow2.f32 %v4470_v42 }
 0x3ae   : > { %v5998_v43 = vpop.eup %5997 }
 0x3af   : > { %v4479_v44 = vsel %vm7046_vm9, %v5998_v43, 0.0  ;;  %v4472_v45 = vsel %vm7050_vm12, %v5998_v43, 0.0  ;;  %v4493_v48 = vsel %vm7078_vm1, %v5998_v43, 0.0  ;;  %v4486_v49 = vsel %vm7060_vm14, %v5998_v43, 0.0 }
 0x3b0   : > { %v4480_v47 = vsel %vm272_vm2, %v4479_v44, 0.0  ;;  %v4473_v39 = vsel %vm272_vm2, %v4472_v45, 0.0  ;;  %v4494_v50 = vsel %vm272_vm2, %v4493_v48, 0.0  ;;  %v4487_v51 = vsel %vm272_vm2, %v4486_v49, 0.0 }
 0x3b1   : > { %4481 = vadd.xlane.f32.xlu1 %v4480_v47  ;;  %4474 = vadd.xlane.f32.xlu0 %v4473_v39  ;;  %v4500_v56 = vsel %vm7056_vm13, %v5998_v43, 0.0 }
 0x3b2   : > { %v4501_v52 = vsel %vm272_vm2, %v4500_v56, 0.0 }
 0x3b5   : > { %4495 = vadd.xlane.f32.xlu1 %v4494_v50  ;;  %4488 = vadd.xlane.f32.xlu0 %v4487_v51 }
 0x3b9   : > { %4502 = vadd.xlane.f32.xlu0 %v4501_v52 }
 0x43e   : > { %v4482_v53 = vpop.xlane.xlu1 %4481  ;;  %v4475_v54 = vpop.xlane.xlu0 %4474 }
 0x43f   : > { %5999 = vrcp.f32 %v4482_v53 }
 0x440   : > { %6001 = vrcp.f32 %v4475_v54 }
 0x442   : > { %v4496_v55 = vpop.xlane.xlu1 %4495  ;;  %v4489_v46 = vpop.xlane.xlu0 %4488 }
 0x443   : > { %6003 = vrcp.f32 %v4496_v55 }
 0x444   : > { %6005 = vrcp.f32 %v4489_v46 }
 0x446   : > { %v4503_v58 = vpop.xlane.xlu0 %4502 }
 0x447   : > { %6007 = vrcp.f32 %v4503_v58 }
 0x449   : > { %v6000_v59 = vpop.eup %5999 }
 0x44a   : > { %v6002_v60 = vpop.eup %6001  ;;  %v4484_v63 = vmul.f32 %v6000_v59, %v5998_v43 }
 0x44b   : > { %v4477_v61 = vmul.f32 %v6002_v60, %v5998_v43 }
 0x44d   : > { %v6004_v0 = vpop.eup %6003  ;;  %v4478_v1 = vsel %vm7050_vm12, %v4477_v61, %v7054_v19 }
 0x44e   : > { %v6006_v38 = vpop.eup %6005  ;;  %v4498_v2 = vmul.f32 %v6004_v0, %v5998_v43  ;;  %v4485_v62 = vsel %vm7046_vm9, %v4484_v63, %v4478_v1 }
 0x44f   : > { %v4491_v57 = vmul.f32 %v6006_v38, %v5998_v43 }
 0x451   : > { %v6008_v3 = vpop.eup %6007  ;;  %v4492_v4 = vsel %vm7060_vm14, %v4491_v57, %v4485_v62 }
 0x452   : > { %v4505_v5 = vmul.f32 %v6008_v3, %v5998_v43  ;;  %v4499_v6 = vsel %vm7078_vm1, %v4498_v2, %v4492_v4 }
 0x454   : > { %v4506_v7 = vsel %vm7056_vm13, %v4505_v5, %v4499_v6 }
 0x455   : > { %4507 = vst.msk [vmem:[%s252_s11] sm:$0x1] %vm272_vm2, %v4506_v7 }
 0x456   : > { %6022 = shalt.err (!%p6019_p5)
}
 0x457   : > { %s6023_s15 = scalar_lea.hbm %s7129_s16, 16  ;;  %s6027_s8 = scalar_lea.hbm %s7184_s5, 32 }
 0x458   : > { %p6024_p6 = scmp.ne.s32.totalorder %s7129_s16, %s6023_s15  ;;  %p6028_p10 = scmp.lt.u32.totalorder %s7129_s16, %s7184_s5 }
 0x459   : > { %p6029_p11 = scmp.lt.u32.totalorder %s6027_s8, %s6023_s15  ;;  %p6031_p13 = scmp.lt.u32.totalorder %s6023_s15, %s7129_s16 }
 0x45a   : > { %p6025_p7 = pnand %p6024_p6, %p6163_p4 }
 0x45b   : > { %p6030_p12 = por %p6029_p11, %p6028_p10 }
 0x45c   : > { %p6026_p9 = pneg %p6025_p7 }
 0x45d   : > { %p6032_p0 = por %p6031_p13, %p6030_p12 }
 0x45f   : > { %p6033_p1 = pnand %p6032_p0, %p6026_p9 }
 0x461   : > { %6036 = shalt.err (!%p6033_p1)
}
 0x462   : > { %5805 = dma.vmem_to_hbm [thread:$0]  (%p6163_p4), %s7131_s12, 16, %s7129_s16, %s4509_s21  }
 0x463 PF: > { %p5811_p2 = scmp.ge.s32.totalorder %s6087_s23, 2  ;;  %s4533_s11 = sand.u32 1, %s6067_s18  }
 0x464   : > { %s4534_s13 = scalar_lea.sflag [#allocation4], %s4533_s11 }
 0x465   : > { %p5808_p3 = pnand %p5811_p2, %p6170_p8 }
 0x467   : > { %6062 = dma.done.wait (!%p5808_p3), %s4534_s13, 16  }
 0x468   : > { %6064 = vsyncadd (!%p5808_p3), %s4534_s13, 4294967280  ;;  %s18_s23 = sadd.s32 1, %s6087_s23   ;;  %s7197_s18 = smov %s6071_s19 }
 0x469   : > { %p15_p5 = scmp.ge.s32.totalorder %s18_s23, 4   ;;  %s7198_s19 = smov %s6075_s20 }
 0x46a   : > { %s7199_s20 = smov %s6176_s6  ;;  %s7200_s21 = smov %s6083_s22 }
 0x46b   : > { %s7201_s22 = smov %s7203_s26  ;;  %17 = sbr.rel (!%p15_p5) target bundleno = 4 (0x4), region = 149 }
 0x472   :  { %4538 = vsyncpa [#allocation4], 1 }
 0x473   :  { %4540 = vsyncpa [#allocation4 + $0x1], 1 }

</bundles_post_ra>
